<compile_context>
chip_gen: v7x
topology: tpu7x:2x2x1
jax: 0.10.0
libtpu: 0.0.40
codegen_flags: <defaults>
</compile_context>

<pallas_src>
import jax
import jax.numpy as jnp
from jax.experimental import pallas as pl
from jax.experimental.pallas import tpu as pltpu


def _split_linear_kernel(x_ref, w_ref, o_ref):
    # x_ref: (B, dD, S)  activations for dD consecutive split indices
    # w_ref: (dD, S, S)  weights in the original torch Linear (out, in) layout
    # o_ref: (B, dD, S)
    #
    # In-kernel (out,in)->(in,out) transpose of the weight tile: a last-two-dims
    # transpose on the XLU, overlapped with the (dominant) weight DMA, so no
    # extra HBM pass over the weights is ever needed.
    w = jnp.swapaxes(w_ref[...], 1, 2)               # (dD, S_in, S_out)
    y = jnp.einsum(
        "bdk,dkj->bdj",
        x_ref[...],
        w,
        preferred_element_type=jnp.float32,          # keep f32 accumulation
    )
    o_ref[...] = y.astype(o_ref.dtype)


def _choose_block_d(D, B, S, itemsize=4, vmem_budget_bytes=32 * 1024 * 1024):
    """How many split indices to process per grid step.

    Constraints:
      * dD is the 2nd-to-last dim of the x/out blocks -> must be a multiple
        of 8 or equal the full D (the (8,128) rule).
      * double-buffered tiles (weights + x + out) must fit the VMEM budget
        (budget chosen to be safe even on v7x's 64 MiB / TC).
      * prefer D // dD >= 2 so the 'parallel' grid axis can use both v7x TCs.
    """
    def tile_bytes(dd):
        w = dd * S * S * itemsize          # weight tile
        xo = 2 * B * dd * S * itemsize     # x tile + out tile
        return 2 * (w + xo)                # double-buffered by the pipeline

    cands = [d for d in range(8, D + 1, 8) if D % d == 0]
    if D not in cands:
        cands.append(D)                    # block == full dim is always legal
    cands = sorted(set(cands))

    fitting = [d for d in cands if tile_bytes(d) <= vmem_budget_bytes]
    if not fitting:
        return min(cands)                  # smallest legal block as fallback
    multi_step = [d for d in fitting if D // d >= 2]
    return max(multi_step) if multi_step else max(fitting)


def split_linear_forward(x, weights):
    """x: [B, D, S]; weights: [D, S, S] in torch Linear layout (out, in).

    Returns [B, D, S] with out[b, i, :] = x[b, i, :] @ weights[i].T
    """
    B, D, S = x.shape
    assert weights.shape == (D, S, S)

    dD = _choose_block_d(D, B, S, itemsize=x.dtype.itemsize)
    grid = (D // dD,)

    return pl.pallas_call(
        _split_linear_kernel,
        out_shape=jax.ShapeDtypeStruct((B, D, S), x.dtype),
        grid_spec=pltpu.PrefetchScalarGridSpec(
            num_scalar_prefetch=0,
            grid=grid,
            in_specs=[
                pl.BlockSpec((B, dD, S), lambda i: (0, i, 0)),   # x block
                pl.BlockSpec((dD, S, S), lambda i: (i, 0, 0)),   # weight block
            ],
            out_specs=pl.BlockSpec((B, dD, S), lambda i: (0, i, 0)),
        ),
        compiler_params=pltpu.CompilerParams(
            dimension_semantics=("parallel",),       # shard D across TCs on v7x
            vmem_limit_bytes=48 * 1024 * 1024,        # > default scoped caps,
        ),                                            # < v7x 64 MiB physical
    )(x, weights)


if __name__ == "__main__":
    # Small but TPU-friendly shapes: S=128 keeps stores lane-dense, D=16 with
    # dD=8 exercises a 2-step 'parallel' grid.
    B, D, S = 8, 16, 128

    key = jax.random.PRNGKey(0)
    kx, kw = jax.random.split(key)

    x = jax.random.normal(kx, (B, D, S), dtype=jnp.float32)
    # torch Linear layout: (out_features, in_features), U(-1/sqrt(S), 1/sqrt(S))
    bound = 1.0 / (S ** 0.5)
    weights = jax.random.uniform(
        kw, (D, S, S), dtype=jnp.float32, minval=-bound, maxval=bound
    )

    fwd = jax.jit(split_linear_forward)
    out = fwd(x, weights)
    out = jax.block_until_ready(out)

    # Pure-JAX reference: out[b, i, j] = sum_k x[b, i, k] * W[i, j, k]
    ref = jnp.einsum("bik,ijk->bij", x, weights)

    assert out.shape == (B, D, S), out.shape
    assert jnp.allclose(out, ref, atol=1e-3, rtol=1e-3), "mismatch vs reference"

    print("KERNEL_OK")
</pallas_src>

<mosaic_0001>
module attributes {stable_mosaic.version = 11 : i64} {
  func.func @_split_linear_kernel(%arg0: i32, %arg1: memref<8x8x128xf32, #tpu.memory_space<vmem>>, %arg2: memref<8x128x128xf32, #tpu.memory_space<vmem>>, %arg3: memref<8x8x128xf32, #tpu.memory_space<vmem>>) attributes {dimension_semantics = [#tpu.dimension_semantics<parallel>], iteration_bounds = array<i64: 2>, scalar_prefetch = 0 : i64, scratch_operands = 0 : i64, tpu.core_type = #tpu.core_type<tc>, window_params = [{transform_indices = @transform_0, window_bounds = array<i64: 8, 8, 128>}, {transform_indices = @transform_1, window_bounds = array<i64: 8, 128, 128>}, {transform_indices = @transform_2, window_bounds = array<i64: 8, 8, 128>}]} {
    %c0 = arith.constant 0 : index
    %c0_0 = arith.constant 0 : index
    %c0_1 = arith.constant 0 : index
    %0 = vector.load %arg2[%c0, %c0_0, %c0_1] : memref<8x128x128xf32, #tpu.memory_space<vmem>>, vector<8x128x128xf32>
    %1 = tpu.transpose %0, [0, 2, 1] : vector<8x128x128xf32> -> vector<8x128x128xf32>
    %c0_2 = arith.constant 0 : index
    %c0_3 = arith.constant 0 : index
    %c0_4 = arith.constant 0 : index
    %2 = vector.load %arg1[%c0_2, %c0_3, %c0_4] : memref<8x8x128xf32, #tpu.memory_space<vmem>>, vector<8x8x128xf32>
    "tpu.trace_start"() <{level = 10 : i32, message = "bdk,dkj->bdj"}> : () -> ()
    %cst = arith.constant dense<0.000000e+00> : vector<8x128x8xf32>
    %3 = tpu.matmul %1, %2, %cst {dimension_numbers = #tpu.dot_dimension_numbers<[1], [2], [2], [0], [0, 0, 0, 2, 1, 0], [0], [1]>} : vector<8x128x128xf32>, vector<8x8x128xf32>, vector<8x128x8xf32> -> vector<8x128x8xf32>
    %4 = tpu.transpose %3, [2, 0, 1] : vector<8x128x8xf32> -> vector<8x8x128xf32>
    "tpu.trace_stop"() : () -> ()
    %c0_5 = arith.constant 0 : index
    %c0_6 = arith.constant 0 : index
    %c0_7 = arith.constant 0 : index
    %5 = vector.load %arg3[%c0_5, %c0_6, %c0_7] : memref<8x8x128xf32, #tpu.memory_space<vmem>>, vector<8x8x128xf32>
    tpu.vector_store %arg3[%c0_5, %c0_6, %c0_7], %4 {strides = array<i32>} : memref<8x8x128xf32, #tpu.memory_space<vmem>>, vector<8x8x128xf32>,
    return
  }
  func.func @transform_0(%arg0: i32) -> (i32, i32, i32) {
    %c0_i32 = arith.constant 0 : i32
    %c0_i32_0 = arith.constant 0 : i32
    %c0_i32_1 = arith.constant 0 : i32
    return %c0_i32, %arg0, %c0_i32_0 : i32, i32, i32
  }
  func.func @transform_1(%arg0: i32) -> (i32, i32, i32) {
    %c0_i32 = arith.constant 0 : i32
    %c0_i32_0 = arith.constant 0 : i32
    %c0_i32_1 = arith.constant 0 : i32
    return %arg0, %c0_i32, %c0_i32_0 : i32, i32, i32
  }
  func.func @transform_2(%arg0: i32) -> (i32, i32, i32) {
    %c0_i32 = arith.constant 0 : i32
    %c0_i32_0 = arith.constant 0 : i32
    %c0_i32_1 = arith.constant 0 : i32
    return %c0_i32, %arg0, %c0_i32_0 : i32, i32, i32
  }
}

</mosaic_0001>

<bundles_post_ra>
// kernel: split_linear_forward.1
= control target key start
LH: loop header
LB: loop body
LE: loop exit
PB: predicated region body
PF: predicated region fallthrough
CT: control target
= control target key end

     0   :  { %7 = vsyncpa [#allocation3], 0  ;;  %s16549_s0 = inlined_call_operand.hbm [shape: f32[8,16,128], index: 0, kind: input, shape index: {}]   ;;  %s16550_s1 = inlined_call_operand.hbm [shape: f32[16,128,128], index: 1, kind: input, shape index: {}]   ;;  %s16551_s2 = inlined_call_operand.hbm [shape: f32[8,16,128], index: 2, kind: output, shape index: {}]  }
   0x1   :  { %9 = vsyncpa [#allocation3 + $0x1], 0 }
   0x2   :  { %10 = vsyncpa [#allocation6], 0 }
   0x3   :  { %12 = vsyncpa [#allocation6 + $0x1], 0 }
   0x4   :  { %13 = vsyncpa [#allocation4], 0 }
   0x5   :  { %15 = vsyncpa [#allocation4 + $0x1], 0  ;;  %s13317_s9 = smov 0   ;;  %s13319_s10 = smov 0  }
   0x6   :  { %s13321_s11 = smov 0   ;;  %s13323_s12 = smov 0  }
   0x7 LB: > { %s13338_s13 = sadd.s32 4294967295, %s13289_s12   ;;  %s11224_s14 = sadd.s32 4294967294, %s13289_s12   ;;  %s13289_s12 = sphi %s13323_s12, %s17126_s12   ;;  %s13285_s11 = sphi %s13321_s11, %s17125_s11   ;;  %s13281_s10 = sphi %s13319_s10, %s17124_s10   ;;  %s13277_s9 = sphi %s13317_s9, %s17123_s9  }
   0x8   : > { %s13342_s15 = sadd.s32 1, %s13289_s12   ;;  %s28_s16 = sadd.s32 1, %s13285_s11 }
   0x9   : > { %s25_s17 = ssub.s32 %s13289_s12, %s13342_s15  ;;  %p35_p0 = scmp.ne.s32.totalorder %s13285_s11, %s13281_s10 }
   0xa   : > { %p26_p1 = scmp.eq.s32.totalorder %s25_s17, 0  ;;  %p36_p2 = scmp.eq.s32.totalorder %s13289_s12, 0 }
   0xb   : > { %p41_p3 = scmp.ne.s32.totalorder %s13281_s10, %s13277_s9  ;;  %p42_p4 = scmp.eq.s32.totalorder %s13338_s13, 0 }
   0xc   : > { %s13354_s18 = scalar_select %p26_p1, %s13285_s11, %s28_s16  }
   0xd   : > { %p13356_p5 = por %p36_p2, %p35_p0  ;;  %p13360_p6 = por %p42_p4, %p41_p3 }
   0xe   : > { %p91_p7 = scmp.eq.s32.totalorder %s13338_s13, 1  ;;  %p97_p8 = scmp.eq.s32.totalorder %s11224_s14, 1 }
   0xf   : > { %s16685_s20 = scalar_select %p13360_p6, 1, 0 }
  0x10   : > { %p12220_p10 = scmp.lt.s32.totalorder %s13289_s12, 2  ;;  %p13367_p11 = por %p91_p7, %p35_p0 }
  0x11   : > { %p13371_p12 = por %p97_p8, %p41_p3  ;;  %s13376_s23 = sand.u32 1, %s13285_s11  }
  0x12   : > { %s16686_s21 = scalar_select %p13367_p11, 1, 0 }
  0x13   : > { %s16687_s22 = scalar_select %p13371_p12, 1, 0 }
  0x14   : > { %s11228_s24 = sshll.u32 %s13289_s12, 7  ;;  %s11227_s25 = sshll.u32 %s13376_s23, 6 }
  0x15   : > { %s13383_s28 = scalar_lea.hbm %s16549_s0, %s11228_s24  ;;  %s121_s29 = scalar_lea.vmem [#allocation2], %s11227_s25 }
  0x16   : > { %s127_s30 = sshll.u32 %s121_s29, 4  ;;  %p13387_p13 = pnand %p12220_p10, %p13356_p5  ;;  %s13391_s30 = int_to_ptr.vmem [resolvable:$true] %s127_s30 }
  0x17   : > { %s118_s4 = scalar_lea.sflag [#allocation3], %s13376_s23  ;;  %s13159_s5 = scalar_lea.hbm %s13383_s28, 1024 }
  0x18   : > { %p13160_p1 = scmp.ne.s32.totalorder %s13383_s28, %s13159_s5  ;;  %p13161_p2 = pneg %p13387_p13 }
  0x19   : > { %s13164_s8 = scalar_lea.hbm %s16549_s0, 2048  ;;  %p13165_p5 = scmp.lt.u32.totalorder %s13383_s28, %s16549_s0 }
  0x1a   : > { %p13162_p3 = pnand %p13161_p2, %p13160_p1  ;;  %p13166_p7 = scmp.lt.u32.totalorder %s13164_s8, %s13159_s5 }
  0x1b   : > { %p13168_p10 = scmp.lt.u32.totalorder %s13159_s5, %s13383_s28 }
  0x1c   : > { %p13163_p4 = pneg %p13162_p3  ;;  %p13167_p8 = por %p13166_p7, %p13165_p5 }
  0x1e   : > { %p13169_p9 = por %p13168_p10, %p13167_p8 }
  0x20   : > { %p13170_p0 = pnand %p13169_p9, %p13163_p4 }
  0x22   : > { %13173 = shalt.err (!%p13170_p0)
}
  0x23   : > { %s13174_s17 = scalar_lea.vmem %s13391_s30, 1024  ;;  %s13291_s19 = smov [#allocation2]  }
  0x24   : > { %p13175_p1 = scmp.ne.s32.totalorder %s13391_s30, %s13174_s17  ;;  %s13179_s24 = sshll.u32 %s13291_s19, 4  ;;  %s13180_s24 = int_to_ptr.vmem [resolvable:$false] %s13179_s24 }
  0x25   : > { %s13181_s25 = scalar_lea.vmem %s13180_s24, 2048  ;;  %p13182_p11 = scmp.lt.s32.totalorder %s13391_s30, %s13180_s24 }
  0x26   : > { %p13177_p3 = pnand %p13175_p1, %p13161_p2  ;;  %p13183_p5 = scmp.lt.s32.totalorder %s13181_s25, %s13174_s17 }
  0x28   : > { %p13178_p12 = pneg %p13177_p3  ;;  %p13184_p7 = por %p13183_p5, %p13182_p11 }
  0x2a   : > { %p13185_p8 = pnand %p13184_p7, %p13178_p12 }
  0x2c   : > { %13188 = shalt.err (!%p13185_p8)
}
  0x2d   : > { %s13292_s26 = smov 256   ;;  %s13293_s27 = smov 128  }
  0x2e   : > { %s13294_s29 = smov 8   ;;  %p157_p9 = scmp.lt.s32.totalorder %s13289_s12, 3 }
  0x2f   : > { %12212 = dma.hbm_to_vmem [thread:$0]  (!%p13387_p13), %s13383_s28, 1024, %s13391_s30, %s118_s4, %s13292_s26, %s13293_s27, %s13294_s29  }
  0x30   : > { %s11229_s5 = sshll.u32 %s13376_s23, 10  ;;  %s11242_s6 = sshll.u32 %s13289_s12, 14 }
  0x31   : > { %p16689_p11 = scmp.ge.s32.totalorder %s13289_s12, 1  ;;  %s13436_s16 = scalar_lea.hbm %s16550_s1, %s11242_s6 }
  0x32   : > { %s141_s17 = scalar_lea.vmem [#allocation5], %s11229_s5  ;;  %s138_s28 = scalar_lea.sflag [#allocation6], %s13376_s23 }
  0x33   : > { %p13429_p12 = pnand %p16689_p11, %p157_p9  ;;  %s149_s19 = sshll.u32 %s141_s17, 4  ;;  %s13438_s19 = int_to_ptr.vmem [resolvable:$true] %s149_s19 }
  0x34   : > { %s13189_s30 = scalar_lea.hbm %s13436_s16, 16384  ;;  %s13194_s25 = scalar_lea.hbm %s16550_s1, 32768 }
  0x35   : > { %p13190_p0 = scmp.ne.s32.totalorder %s13436_s16, %s13189_s30  ;;  %p13195_p1 = scmp.lt.u32.totalorder %s13436_s16, %s16550_s1 }
  0x36   : > { %p13196_p3 = scmp.lt.u32.totalorder %s13194_s25, %s13189_s30  ;;  %p13198_p7 = scmp.lt.u32.totalorder %s13189_s30, %s13436_s16 }
  0x37   : > { %p13192_p4 = pnand %p13190_p0, %p13161_p2 }
  0x38   : > { %p13197_p5 = por %p13196_p3, %p13195_p1 }
  0x39   : > { %p13193_p10 = pneg %p13192_p4 }
  0x3a   : > { %p13199_p8 = por %p13198_p7, %p13197_p5 }
  0x3c   : > { %p13200_p9 = pnand %p13199_p8, %p13193_p10 }
  0x3e   : > { %13203 = shalt.err (!%p13200_p9)
}
  0x3f   : > { %s13204_s5 = scalar_lea.vmem %s13438_s19, 16384  ;;  %s13295_s8 = smov [#allocation5]  }
  0x40   : > { %p13205_p11 = scmp.ne.s32.totalorder %s13438_s19, %s13204_s5  ;;  %s13209_s14 = sshll.u32 %s13295_s8, 4  ;;  %s13210_s14 = int_to_ptr.vmem [resolvable:$false] %s13209_s14 }
  0x41   : > { %s13211_s17 = scalar_lea.vmem %s13210_s14, 32768  ;;  %p13212_p6 = scmp.lt.s32.totalorder %s13438_s19, %s13210_s14 }
  0x42   : > { %p13207_p0 = pnand %p13205_p11, %p13161_p2  ;;  %p13213_p1 = scmp.lt.s32.totalorder %s13211_s17, %s13204_s5 }
  0x44   : > { %p13208_p4 = pneg %p13207_p0  ;;  %p13214_p3 = por %p13213_p1, %p13212_p6 }
  0x46   : > { %p13215_p5 = pnand %p13214_p3, %p13208_p4 }
  0x48   : > { %13218 = shalt.err (!%p13215_p5)
}
  0x49   : > { %12215 = dma.hbm_to_vmem [thread:$0]  (!%p13387_p13), %s13436_s16, 16384, %s13438_s19, %s138_s28, %s13293_s27, %s13293_s27, %s13294_s29  }
  0x4a   : > { %161 = sbr.rel (%p13429_p12) target bundleno = 1518 (0x5ee), region = 28 }
  0x51   : > { %s13472_s30 = sand.u32 1, %s13281_s10   ;;  %p16691_p6 = scmp.ne.s32.totalorder %s16685_s20, 0 }
  0x52   : > { %s11234_s4 = sshll.u32 %s13472_s30, 6  ;;  %s164_s3 = scalar_lea.sflag [#allocation3], %s13472_s30 }
  0x53   : > { %s13478_s24 = scalar_lea.vmem [#allocation2], %s11234_s4 }
  0x54   : > { %13264 = dma.done.wait (%p16691_p6), %s164_s3, 1024  }
  0x55   : > { %13266 = vsyncadd (%p16691_p6), %s164_s3, 4294966272  ;;  %s11235_s23 = sshll.u32 %s13472_s30, 10  ;;  %s173_s27 = scalar_lea.sflag [#allocation6], %s13472_s30 }
  0x56   : > { %s13486_s29 = scalar_lea.vmem [#allocation5], %s11235_s23 }
  0x57   : > { %13268 = dma.done.wait (%p16691_p6), %s173_s27, 16384  }
  0x58   : > { %13270 = vsyncadd (%p16691_p6), %s173_s27, 4294950912  ;;  %v235_v0 = vld [vmem:[%s13486_s29 + $0x100] sm:$0xff]  ;;  %v236_v5 = vld [vmem:[%s13486_s29 + $0x108] sm:$0xff]  ;;  %s16480_s20 = scalar_lea.vmem [#allocation7], %s11234_s4  ;;  %s11238_s16 = sshll.u32 %s13338_s13, 7 }
  0x59   : > { %v251_v1 = vld [vmem:[%s13486_s29 + $0x180] sm:$0xff]  ;;  %v252_v6 = vld [vmem:[%s13486_s29 + $0x188] sm:$0xff]  ;;  %v237_v12 = vld [vmem:[%s13486_s29 + $0x110] sm:$0xff]  ;;  %s11128_s7 = sshll.u32 %s16480_s20, 4  ;;  %s16497_s28 = scalar_lea.hbm %s16551_s2, %s11238_s16  ;;  %s16492_s7 = int_to_ptr.vmem [resolvable:$true] %s11128_s7 }
  0x5a   : > { %v203_v2 = vld [vmem:[%s13486_s29] sm:$0xff]  ;;  %v12375_v3 = vpack.i.bf16 %v251_v1, %v235_v0  ;;  %v204_v8 = vld [vmem:[%s13486_s29 + $0x8] sm:$0xff]  ;;  %v12377_v10 = vpack.i.bf16 %v252_v6, %v236_v5  ;;  %v253_v13 = vld [vmem:[%s13486_s29 + $0x190] sm:$0xff]  ;;  %s11116_s25 = scalar_lea.sflag [#allocation4], %s13472_s30  ;;  %s13219_s26 = scalar_lea.vmem %s16492_s7, 1024 }
  0x5b   : > { %v219_v4 = vld [vmem:[%s13486_s29 + $0x80] sm:$0xff]  ;;  %v220_v9 = vld [vmem:[%s13486_s29 + $0x88] sm:$0xff]  ;;  %v205_v14 = vld [vmem:[%s13486_s29 + $0x10] sm:$0xff]  ;;  %v12379_v16 = vpack.i.bf16 %v253_v13, %v237_v12  ;;  %p13220_p13 = scmp.ne.s32.totalorder %s16492_s7, %s13219_s26  ;;  %p17120_p2 = scmp.ne.s32.totalorder %s16686_s21, 0 }
  0x5c   : > { %v12263_v7 = vpack.i.bf16 %v219_v4, %v203_v2  ;;  %12376 = vxpose.xlu1.b32.start [1/16] %v12375_v3, 128  ;;  %v12265_v11 = vpack.i.bf16 %v220_v9, %v204_v8  ;;  %v221_v15 = vld [vmem:[%s13486_s29 + $0x90] sm:$0xff]  ;;  %v238_v18 = vld [vmem:[%s13486_s29 + $0x118] sm:$0xff]  ;;  %v239_v24 = vld [vmem:[%s13486_s29 + $0x120] sm:$0xff]  ;;  %s13298_s6 = smov [#allocation7]  }
  0x5d   : > { %v12267_v17 = vpack.i.bf16 %v221_v15, %v205_v14  ;;  %v254_v19 = vld [vmem:[%s13486_s29 + $0x198] sm:$0xff]  ;;  %v255_v25 = vld [vmem:[%s13486_s29 + $0x1a0] sm:$0xff]  ;;  %v240_v30 = vld [vmem:[%s13486_s29 + $0x128] sm:$0xff]  ;;  %p13221_p12 = pnand %p13220_p13, %p17120_p2  ;;  %s13223_s5 = sshll.u32 %s13298_s6, 4  ;;  %s13224_s5 = int_to_ptr.vmem [resolvable:$false] %s13223_s5 }
  0x5e   : > { %12264 = vxpose.xlu0.b32.start [1/16] %v12263_v7, 128  ;;  %v206_v20 = vld [vmem:[%s13486_s29 + $0x18] sm:$0xff]  ;;  %v12381_v22 = vpack.i.bf16 %v254_v19, %v238_v18  ;;  %v207_v26 = vld [vmem:[%s13486_s29 + $0x20] sm:$0xff]  ;;  %v12383_v28 = vpack.i.bf16 %v255_v25, %v239_v24  ;;  %v256_v31 = vld [vmem:[%s13486_s29 + $0x1a8] sm:$0xff]  ;;  %s13225_s8 = scalar_lea.vmem %s13224_s5, 2048  ;;  %p13226_p7 = scmp.lt.s32.totalorder %s16492_s7, %s13224_s5 }
  0x5f   : > { %v222_v21 = vld [vmem:[%s13486_s29 + $0x98] sm:$0xff]  ;;  %v223_v27 = vld [vmem:[%s13486_s29 + $0xa0] sm:$0xff]  ;;  %v208_v32 = vld [vmem:[%s13486_s29 + $0x28] sm:$0xff]  ;;  %v12385_v34 = vpack.i.bf16 %v256_v31, %v240_v30  ;;  %p13222_p10 = pneg %p13221_p12  ;;  %p13227_p8 = scmp.lt.s32.totalorder %s13225_s8, %s13219_s26 }
  0x60   : > { %12378 = vxpose.xlu1.b32.cont [2/16] %v12377_v10, 128  ;;  %v12269_v23 = vpack.i.bf16 %v222_v21, %v206_v20  ;;  %v12271_v29 = vpack.i.bf16 %v223_v27, %v207_v26  ;;  %v224_v33 = vld [vmem:[%s13486_s29 + $0xa8] sm:$0xff]  ;;  %v241_v36 = vld [vmem:[%s13486_s29 + $0x130] sm:$0xff]  ;;  %v242_v42 = vld [vmem:[%s13486_s29 + $0x138] sm:$0xff] }
  0x61   : > { %v12273_v35 = vpack.i.bf16 %v224_v33, %v208_v32  ;;  %v257_v37 = vld [vmem:[%s13486_s29 + $0x1b0] sm:$0xff]  ;;  %v258_v43 = vld [vmem:[%s13486_s29 + $0x1b8] sm:$0xff]  ;;  %v243_v48 = vld [vmem:[%s13486_s29 + $0x140] sm:$0xff]  ;;  %p13228_p9 = por %p13227_p8, %p13226_p7 }
  0x62   : > { %12266 = vxpose.xlu0.b32.cont [2/16] %v12265_v11, 128  ;;  %v209_v38 = vld [vmem:[%s13486_s29 + $0x30] sm:$0xff]  ;;  %v12387_v40 = vpack.i.bf16 %v257_v37, %v241_v36  ;;  %v210_v44 = vld [vmem:[%s13486_s29 + $0x38] sm:$0xff]  ;;  %v12389_v46 = vpack.i.bf16 %v258_v43, %v242_v42  ;;  %v259_v49 = vld [vmem:[%s13486_s29 + $0x1c0] sm:$0xff] }
  0x63   : > { %v225_v39 = vld [vmem:[%s13486_s29 + $0xb0] sm:$0xff]  ;;  %v226_v45 = vld [vmem:[%s13486_s29 + $0xb8] sm:$0xff]  ;;  %v211_v50 = vld [vmem:[%s13486_s29 + $0x40] sm:$0xff]  ;;  %v12391_v52 = vpack.i.bf16 %v259_v49, %v243_v48  ;;  %p13229_p11 = pnand %p13228_p9, %p13222_p10 }
  0x64   : > { %12380 = vxpose.xlu1.b32.cont [3/16] %v12379_v16, 128  ;;  %v12275_v41 = vpack.i.bf16 %v225_v39, %v209_v38  ;;  %v12277_v47 = vpack.i.bf16 %v226_v45, %v210_v44  ;;  %v227_v51 = vld [vmem:[%s13486_s29 + $0xc0] sm:$0xff]  ;;  %v244_v54 = vld [vmem:[%s13486_s29 + $0x148] sm:$0xff]  ;;  %v245_v60 = vld [vmem:[%s13486_s29 + $0x150] sm:$0xff] }
  0x65   : > { %v12279_v53 = vpack.i.bf16 %v227_v51, %v211_v50  ;;  %v260_v55 = vld [vmem:[%s13486_s29 + $0x1c8] sm:$0xff]  ;;  %v261_v61 = vld [vmem:[%s13486_s29 + $0x1d0] sm:$0xff]  ;;  %v246_v2 = vld [vmem:[%s13486_s29 + $0x158] sm:$0xff] }
  0x66   : > { %12268 = vxpose.xlu0.b32.cont [3/16] %v12267_v17, 128  ;;  %v212_v56 = vld [vmem:[%s13486_s29 + $0x48] sm:$0xff]  ;;  %v12393_v58 = vpack.i.bf16 %v260_v55, %v244_v54  ;;  %v213_v62 = vld [vmem:[%s13486_s29 + $0x50] sm:$0xff]  ;;  %v12395_v0 = vpack.i.bf16 %v261_v61, %v245_v60  ;;  %v262_v3 = vld [vmem:[%s13486_s29 + $0x1d8] sm:$0xff] }
  0x67   : > { %v228_v57 = vld [vmem:[%s13486_s29 + $0xc8] sm:$0xff]  ;;  %v229_v63 = vld [vmem:[%s13486_s29 + $0xd0] sm:$0xff]  ;;  %v214_v4 = vld [vmem:[%s13486_s29 + $0x58] sm:$0xff]  ;;  %v12397_v6 = vpack.i.bf16 %v262_v3, %v246_v2 }
  0x68   : > { %12382 = vxpose.xlu1.b32.cont [4/16] %v12381_v22, 128  ;;  %v12281_v59 = vpack.i.bf16 %v228_v57, %v212_v56  ;;  %v12283_v1 = vpack.i.bf16 %v229_v63, %v213_v62  ;;  %v230_v5 = vld [vmem:[%s13486_s29 + $0xd8] sm:$0xff]  ;;  %v247_v8 = vld [vmem:[%s13486_s29 + $0x160] sm:$0xff]  ;;  %v248_v14 = vld [vmem:[%s13486_s29 + $0x168] sm:$0xff] }
  0x69   : > { %v12285_v7 = vpack.i.bf16 %v230_v5, %v214_v4  ;;  %v263_v9 = vld [vmem:[%s13486_s29 + $0x1e0] sm:$0xff]  ;;  %v264_v15 = vld [vmem:[%s13486_s29 + $0x1e8] sm:$0xff]  ;;  %v249_v20 = vld [vmem:[%s13486_s29 + $0x170] sm:$0xff] }
  0x6a   : > { %12270 = vxpose.xlu0.b32.cont [4/16] %v12269_v23, 128  ;;  %v215_v10 = vld [vmem:[%s13486_s29 + $0x60] sm:$0xff]  ;;  %v12399_v12 = vpack.i.bf16 %v263_v9, %v247_v8  ;;  %v216_v16 = vld [vmem:[%s13486_s29 + $0x68] sm:$0xff]  ;;  %v12401_v18 = vpack.i.bf16 %v264_v15, %v248_v14  ;;  %v265_v21 = vld [vmem:[%s13486_s29 + $0x1f0] sm:$0xff] }
  0x6b   : > { %v231_v11 = vld [vmem:[%s13486_s29 + $0xe0] sm:$0xff]  ;;  %v232_v17 = vld [vmem:[%s13486_s29 + $0xe8] sm:$0xff]  ;;  %v217_v22 = vld [vmem:[%s13486_s29 + $0x70] sm:$0xff]  ;;  %v12403_v24 = vpack.i.bf16 %v265_v21, %v249_v20 }
  0x6c   : > { %12384 = vxpose.xlu1.b32.cont [5/16] %v12383_v28, 128  ;;  %v12287_v13 = vpack.i.bf16 %v231_v11, %v215_v10  ;;  %v12289_v19 = vpack.i.bf16 %v232_v17, %v216_v16  ;;  %v233_v23 = vld [vmem:[%s13486_s29 + $0xf0] sm:$0xff]  ;;  %v250_v26 = vld [vmem:[%s13486_s29 + $0x178] sm:$0xff]  ;;  %v299_v32 = vld [vmem:[%s13486_s29 + $0x300] sm:$0xff] }
  0x6d   : > { %v12291_v25 = vpack.i.bf16 %v233_v23, %v217_v22  ;;  %v266_v27 = vld [vmem:[%s13486_s29 + $0x1f8] sm:$0xff]  ;;  %v315_v33 = vld [vmem:[%s13486_s29 + $0x380] sm:$0xff]  ;;  %v300_v38 = vld [vmem:[%s13486_s29 + $0x308] sm:$0xff] }
  0x6e   : > { %12272 = vxpose.xlu0.b32.cont [5/16] %v12271_v29, 128  ;;  %v218_v28 = vld [vmem:[%s13486_s29 + $0x78] sm:$0xff]  ;;  %v12405_v30 = vpack.i.bf16 %v266_v27, %v250_v26  ;;  %v12599_v36 = vpack.i.bf16 %v315_v33, %v299_v32  ;;  %v316_v39 = vld [vmem:[%s13486_s29 + $0x388] sm:$0xff]  ;;  %v301_v44 = vld [vmem:[%s13486_s29 + $0x310] sm:$0xff] }
  0x6f   : > { %v234_v29 = vld [vmem:[%s13486_s29 + $0xf8] sm:$0xff]  ;;  %v12601_v42 = vpack.i.bf16 %v316_v39, %v300_v38  ;;  %v317_v45 = vld [vmem:[%s13486_s29 + $0x390] sm:$0xff]  ;;  %v303_v56 = vld [vmem:[%s13486_s29 + $0x320] sm:$0xff] }
  0x70   : > { %12386 = vxpose.xlu1.b32.cont [6/16] %v12385_v34, 128  ;;  %v12293_v31 = vpack.i.bf16 %v234_v29, %v218_v28  ;;  %v267_v34 = vld [vmem:[%s13486_s29 + $0x200] sm:$0xff]  ;;  %v12603_v48 = vpack.i.bf16 %v317_v45, %v301_v44  ;;  %v302_v50 = vld [vmem:[%s13486_s29 + $0x318] sm:$0xff]  ;;  %v304_v62 = vld [vmem:[%s13486_s29 + $0x328] sm:$0xff] }
  0x71   : > { %v318_v51 = vld [vmem:[%s13486_s29 + $0x398] sm:$0xff]  ;;  %v319_v57 = vld [vmem:[%s13486_s29 + $0x3a0] sm:$0xff]  ;;  %v320_v63 = vld [vmem:[%s13486_s29 + $0x3a8] sm:$0xff] }
  0x72   : > { %12274 = vxpose.xlu0.b32.cont [6/16] %v12273_v35, 128  ;;  %v283_v35 = vld [vmem:[%s13486_s29 + $0x280] sm:$0xff]  ;;  %v12605_v54 = vpack.i.bf16 %v318_v51, %v302_v50  ;;  %v12607_v60 = vpack.i.bf16 %v319_v57, %v303_v56  ;;  %v12609_v2 = vpack.i.bf16 %v320_v63, %v304_v62  ;;  %v305_v4 = vld [vmem:[%s13486_s29 + $0x330] sm:$0xff]  ;;  %v306_v10 = vld [vmem:[%s13486_s29 + $0x338] sm:$0xff] }
  0x73   : > { %v12487_v37 = vpack.i.bf16 %v283_v35, %v267_v34  ;;  %v321_v5 = vld [vmem:[%s13486_s29 + $0x3b0] sm:$0xff]  ;;  %v322_v11 = vld [vmem:[%s13486_s29 + $0x3b8] sm:$0xff]  ;;  %v307_v16 = vld [vmem:[%s13486_s29 + $0x340] sm:$0xff] }
  0x74   : > { %12388 = vxpose.xlu1.b32.cont [7/16] %v12387_v40, 128  ;;  %v268_v40 = vld [vmem:[%s13486_s29 + $0x208] sm:$0xff]  ;;  %v12611_v8 = vpack.i.bf16 %v321_v5, %v305_v4  ;;  %v12613_v14 = vpack.i.bf16 %v322_v11, %v306_v10  ;;  %v323_v17 = vld [vmem:[%s13486_s29 + $0x3c0] sm:$0xff]  ;;  %v309_v28 = vld [vmem:[%s13486_s29 + $0x350] sm:$0xff] }
  0x75   : > { %v12615_v20 = vpack.i.bf16 %v323_v17, %v307_v16  ;;  %v308_v22 = vld [vmem:[%s13486_s29 + $0x348] sm:$0xff]  ;;  %v325_v29 = vld [vmem:[%s13486_s29 + $0x3d0] sm:$0xff]  ;;  %v310_v34 = vld [vmem:[%s13486_s29 + $0x358] sm:$0xff] }
  0x76   : > { %12276 = vxpose.xlu0.b32.cont [7/16] %v12275_v41, 128  ;;  %v284_v41 = vld [vmem:[%s13486_s29 + $0x288] sm:$0xff]  ;;  %v12619_v32 = vpack.i.bf16 %v325_v29, %v309_v28  ;;  %v326_v35 = vld [vmem:[%s13486_s29 + $0x3d8] sm:$0xff] }
  0x77   : > { %v12489_v43 = vpack.i.bf16 %v284_v41, %v268_v40  ;;  %v324_v23 = vld [vmem:[%s13486_s29 + $0x3c8] sm:$0xff]  ;;  %v12621_v38 = vpack.i.bf16 %v326_v35, %v310_v34  ;;  %v311_v40 = vld [vmem:[%s13486_s29 + $0x360] sm:$0xff] }
  0x78   : > { %12390 = vxpose.xlu1.b32.cont [8/16] %v12389_v46, 128  ;;  %v269_v46 = vld [vmem:[%s13486_s29 + $0x210] sm:$0xff]  ;;  %v12617_v26 = vpack.i.bf16 %v324_v23, %v308_v22  ;;  %v327_v41 = vld [vmem:[%s13486_s29 + $0x3e0] sm:$0xff] }
  0x79   : > { %v12623_v44 = vpack.i.bf16 %v327_v41, %v311_v40 }
  0x7a   : > { %12278 = vxpose.xlu0.b32.cont [8/16] %v12277_v47, 128  ;;  %v285_v47 = vld [vmem:[%s13486_s29 + $0x290] sm:$0xff] }
  0x7b   : > { %v12491_v49 = vpack.i.bf16 %v285_v47, %v269_v46  ;;  %v312_v46 = vld [vmem:[%s13486_s29 + $0x368] sm:$0xff] }
  0x7c   : > { %12392 = vxpose.xlu1.b32.cont [9/16] %v12391_v52, 128  ;;  %v270_v52 = vld [vmem:[%s13486_s29 + $0x218] sm:$0xff]  ;;  %v328_v47 = vld [vmem:[%s13486_s29 + $0x3e8] sm:$0xff] }
  0x7d   : > { %v12625_v50 = vpack.i.bf16 %v328_v47, %v312_v46 }
  0x7e   : > { %12280 = vxpose.xlu0.b32.cont [9/16] %v12279_v53, 128  ;;  %v286_v53 = vld [vmem:[%s13486_s29 + $0x298] sm:$0xff] }
  0x7f   : > { %v12493_v55 = vpack.i.bf16 %v286_v53, %v270_v52  ;;  %v313_v52 = vld [vmem:[%s13486_s29 + $0x370] sm:$0xff] }
  0x80   : > { %12394 = vxpose.xlu1.b32.cont [10/16] %v12393_v58, 128  ;;  %v271_v58 = vld [vmem:[%s13486_s29 + $0x220] sm:$0xff]  ;;  %v329_v53 = vld [vmem:[%s13486_s29 + $0x3f0] sm:$0xff] }
  0x81   : > { %v12627_v56 = vpack.i.bf16 %v329_v53, %v313_v52 }
  0x82   : > { %12282 = vxpose.xlu0.b32.cont [10/16] %v12281_v59, 128  ;;  %v287_v59 = vld [vmem:[%s13486_s29 + $0x2a0] sm:$0xff] }
  0x83   : > { %v12495_v61 = vpack.i.bf16 %v287_v59, %v271_v58  ;;  %v314_v58 = vld [vmem:[%s13486_s29 + $0x378] sm:$0xff] }
  0x84   : > { %12396 = vxpose.xlu1.b32.cont [11/16] %v12395_v0, 128  ;;  %v272_v0 = vld [vmem:[%s13486_s29 + $0x228] sm:$0xff]  ;;  %v330_v59 = vld [vmem:[%s13486_s29 + $0x3f8] sm:$0xff] }
  0x85   : > { %v12629_v62 = vpack.i.bf16 %v330_v59, %v314_v58 }
  0x86   : > { %12284 = vxpose.xlu0.b32.cont [11/16] %v12283_v1, 128  ;;  %v288_v1 = vld [vmem:[%s13486_s29 + $0x2a8] sm:$0xff] }
  0x87   : > { %v12497_v3 = vpack.i.bf16 %v288_v1, %v272_v0  ;;  %v588_v0 = vld [vmem:[%s13478_s24 + $0x8] sm:$0xff]  ;;  %v587_v1 = vld [vmem:[%s13478_s24] sm:$0xff] }
  0x88   : > { %12398 = vxpose.xlu1.b32.cont [12/16] %v12397_v6, 128  ;;  %v273_v6 = vld [vmem:[%s13486_s29 + $0x230] sm:$0xff] }
  0x8a   : > { %12286 = vxpose.xlu0.b32.cont [12/16] %v12285_v7, 128  ;;  %v289_v7 = vld [vmem:[%s13486_s29 + $0x2b0] sm:$0xff] }
  0x8b   : > { %v12499_v9 = vpack.i.bf16 %v289_v7, %v273_v6 }
  0x8c   : > { %12400 = vxpose.xlu1.b32.cont [13/16] %v12399_v12, 128  ;;  %v274_v12 = vld [vmem:[%s13486_s29 + $0x238] sm:$0xff] }
  0x8e   : > { %12288 = vxpose.xlu0.b32.cont [13/16] %v12287_v13, 128  ;;  %v290_v13 = vld [vmem:[%s13486_s29 + $0x2b8] sm:$0xff] }
  0x8f   : > { %v12501_v15 = vpack.i.bf16 %v290_v13, %v274_v12 }
  0x90   : > { %12402 = vxpose.xlu1.b32.cont [14/16] %v12401_v18, 128  ;;  %v275_v18 = vld [vmem:[%s13486_s29 + $0x240] sm:$0xff] }
  0x92   : > { %12290 = vxpose.xlu0.b32.cont [14/16] %v12289_v19, 128  ;;  %v291_v19 = vld [vmem:[%s13486_s29 + $0x2c0] sm:$0xff] }
  0x93   : > { %v12503_v21 = vpack.i.bf16 %v291_v19, %v275_v18 }
  0x94   : > { %12404 = vxpose.xlu1.b32.cont [15/16] %v12403_v24, 128  ;;  %v276_v24 = vld [vmem:[%s13486_s29 + $0x248] sm:$0xff] }
  0x96   : > { %12292 = vxpose.xlu0.b32.cont [15/16] %v12291_v25, 128  ;;  %v292_v25 = vld [vmem:[%s13486_s29 + $0x2c8] sm:$0xff] }
  0x97   : > { %v12505_v27 = vpack.i.bf16 %v292_v25, %v276_v24 }
  0x98   : > { %12406 = vxpose.xlu1.b32.end [16/16] %v12405_v30, 128  ;;  %v277_v30 = vld [vmem:[%s13486_s29 + $0x250] sm:$0xff] }
  0x9a   : > { %12294 = vxpose.xlu0.b32.end [16/16] %v12293_v31, 128  ;;  %v293_v31 = vld [vmem:[%s13486_s29 + $0x2d0] sm:$0xff] }
  0x9b   : > { %v12507_v33 = vpack.i.bf16 %v293_v31, %v277_v30 }
  0x9c   : > { %12600 = vxpose.xlu1.b32.start [1/16] %v12599_v36, 128  ;;  %v278_v36 = vld [vmem:[%s13486_s29 + $0x258] sm:$0xff] }
  0x9e   : > { %12488 = vxpose.xlu0.b32.start [1/16] %v12487_v37, 128  ;;  %v294_v37 = vld [vmem:[%s13486_s29 + $0x2d8] sm:$0xff] }
  0x9f   : > { %v12509_v39 = vpack.i.bf16 %v294_v37, %v278_v36 }
  0xa0   : > { %12602 = vxpose.xlu1.b32.cont [2/16] %v12601_v42, 128  ;;  %v279_v42 = vld [vmem:[%s13486_s29 + $0x260] sm:$0xff] }
  0xa2   : > { %12490 = vxpose.xlu0.b32.cont [2/16] %v12489_v43, 128  ;;  %v295_v43 = vld [vmem:[%s13486_s29 + $0x2e0] sm:$0xff] }
  0xa3   : > { %v12511_v45 = vpack.i.bf16 %v295_v43, %v279_v42 }
  0xa4   : > { %12604 = vxpose.xlu1.b32.cont [3/16] %v12603_v48, 128  ;;  %v280_v48 = vld [vmem:[%s13486_s29 + $0x268] sm:$0xff] }
  0xa6   : > { %12492 = vxpose.xlu0.b32.cont [3/16] %v12491_v49, 128  ;;  %v296_v49 = vld [vmem:[%s13486_s29 + $0x2e8] sm:$0xff] }
  0xa7   : > { %v12513_v51 = vpack.i.bf16 %v296_v49, %v280_v48 }
  0xa8   : > { %12606 = vxpose.xlu1.b32.cont [4/16] %v12605_v54, 128  ;;  %v281_v54 = vld [vmem:[%s13486_s29 + $0x270] sm:$0xff] }
  0xaa   : > { %12494 = vxpose.xlu0.b32.cont [4/16] %v12493_v55, 128  ;;  %v297_v55 = vld [vmem:[%s13486_s29 + $0x2f0] sm:$0xff] }
  0xab   : > { %v12515_v57 = vpack.i.bf16 %v297_v55, %v281_v54 }
  0xac   : > { %12608 = vxpose.xlu1.b32.cont [5/16] %v12607_v60, 128  ;;  %v282_v60 = vld [vmem:[%s13486_s29 + $0x278] sm:$0xff] }
  0xae   : > { %12496 = vxpose.xlu0.b32.cont [5/16] %v12495_v61, 128  ;;  %v298_v61 = vld [vmem:[%s13486_s29 + $0x2f8] sm:$0xff] }
  0xaf   : > { %v12517_v63 = vpack.i.bf16 %v298_v61, %v282_v60 }
  0xb0   : > { %12610 = vxpose.xlu1.b32.cont [6/16] %v12609_v2, 128 }
  0xb2   : > { %12498 = vxpose.xlu0.b32.cont [6/16] %v12497_v3, 128 }
  0xb4   : > { %12612 = vxpose.xlu1.b32.cont [7/16] %v12611_v8, 128 }
  0xb6   : > { %12500 = vxpose.xlu0.b32.cont [7/16] %v12499_v9, 128 }
  0xb8   : > { %12614 = vxpose.xlu1.b32.cont [8/16] %v12613_v14, 128 }
  0xba   : > { %12502 = vxpose.xlu0.b32.cont [8/16] %v12501_v15, 128 }
  0xbc   : > { %12616 = vxpose.xlu1.b32.cont [9/16] %v12615_v20, 128 }
  0xbe   : > { %12504 = vxpose.xlu0.b32.cont [9/16] %v12503_v21, 128 }
  0xc0   : > { %12618 = vxpose.xlu1.b32.cont [10/16] %v12617_v26, 128 }
  0xc2   : > { %12506 = vxpose.xlu0.b32.cont [10/16] %v12505_v27, 128 }
  0xc4   : > { %12620 = vxpose.xlu1.b32.cont [11/16] %v12619_v32, 128  ;;  %v590_v32 = vld [vmem:[%s13478_s24 + $0x18] sm:$0xff] }
  0xc6   : > { %12508 = vxpose.xlu0.b32.cont [11/16] %v12507_v33, 128  ;;  %v589_v33 = vld [vmem:[%s13478_s24 + $0x10] sm:$0xff] }
  0xc8   : > { %12622 = vxpose.xlu1.b32.cont [12/16] %v12621_v38, 128 }
  0xca   : > { %12510 = vxpose.xlu0.b32.cont [12/16] %v12509_v39, 128 }
  0xcc   : > { %12624 = vxpose.xlu1.b32.cont [13/16] %v12623_v44, 128 }
  0xce   : > { %12512 = vxpose.xlu0.b32.cont [13/16] %v12511_v45, 128 }
  0xd0   : > { %12626 = vxpose.xlu1.b32.cont [14/16] %v12625_v50, 128 }
  0xd2   : > { %12514 = vxpose.xlu0.b32.cont [14/16] %v12513_v51, 128 }
  0xd4   : > { %12628 = vxpose.xlu1.b32.cont [15/16] %v12627_v56, 128 }
  0xd6   : > { %12516 = vxpose.xlu0.b32.cont [15/16] %v12515_v57, 128 }
  0xd8   : > { %12630 = vxpose.xlu1.b32.end [16/16] %v12629_v62, 128 }
  0xda   : > { %12518 = vxpose.xlu0.b32.end [16/16] %v12517_v63, 128 }
  0xdc   : > { %627 = vxpose.xlu1.b32.start.end [1/1] (short) %v588_v0, 128  ;;  %v13622_v2 = vpop.trf.xlu1  ;;  %v592_v0 = vld [vmem:[%s13478_s24 + $0x28] sm:$0xff] }
  0xdd   : > { %16692 = vst [vmem:[#allocation11_spill] sm:$0xff] %v13622_v2 }
  0xde   : > { %595 = vxpose.xlu0.b32.start.end [1/1] (short) %v587_v1, 128  ;;  %v13624_v3 = vpop.trf.xlu0 }
  0xdf   : > { %16693 = vst [vmem:[#allocation12_spill] sm:$0xff] %v13624_v3 }
  0xe0   : > { %v13626_v4 = vpop.trf.xlu1 }
  0xe1   : > { %16694 = vst [vmem:[#allocation13_spill] sm:$0xff] %v13626_v4 }
  0xe2   : > { %v13628_v5 = vpop.trf.xlu0 }
  0xe3   : > { %16695 = vst [vmem:[#allocation14_spill] sm:$0xff] %v13628_v5 }
  0xe4   : > { %v13630_v6 = vpop.trf.xlu1 }
  0xe5   : > { %16696 = vst [vmem:[#allocation15_spill] sm:$0xff] %v13630_v6 }
  0xe6   : > { %v13632_v7 = vpop.trf.xlu0 }
  0xe7   : > { %16697 = vst [vmem:[#allocation16_spill] sm:$0xff] %v13632_v7 }
  0xe8   : > { %v13634_v8 = vpop.trf.xlu1 }
  0xe9   : > { %16698 = vst [vmem:[#allocation17_spill] sm:$0xff] %v13634_v8 }
  0xea   : > { %v13636_v9 = vpop.trf.xlu0 }
  0xeb   : > { %16699 = vst [vmem:[#allocation18_spill] sm:$0xff] %v13636_v9 }
  0xec   : > { %v13638_v10 = vpop.trf.xlu1 }
  0xed   : > { %16700 = vst [vmem:[#allocation19_spill] sm:$0xff] %v13638_v10 }
  0xee   : > { %v13640_v11 = vpop.trf.xlu0 }
  0xef   : > { %16701 = vst [vmem:[#allocation20_spill] sm:$0xff] %v13640_v11 }
  0xf0   : > { %v13642_v12 = vpop.trf.xlu1 }
  0xf1   : > { %16702 = vst [vmem:[#allocation21_spill] sm:$0xff] %v13642_v12 }
  0xf2   : > { %v13644_v13 = vpop.trf.xlu0 }
  0xf3   : > { %16703 = vst [vmem:[#allocation22_spill] sm:$0xff] %v13644_v13 }
  0xf4   : > { %v13646_v14 = vpop.trf.xlu1 }
  0xf5   : > { %16704 = vst [vmem:[#allocation23_spill] sm:$0xff] %v13646_v14 }
  0xf6   : > { %v13648_v15 = vpop.trf.xlu0 }
  0xf7   : > { %16705 = vst [vmem:[#allocation24_spill] sm:$0xff] %v13648_v15 }
  0xf8   : > { %v13650_v16 = vpop.trf.xlu1 }
  0xf9   : > { %16706 = vst [vmem:[#allocation25_spill] sm:$0xff] %v13650_v16 }
  0xfa   : > { %v13652_v17 = vpop.trf.xlu0 }
  0xfb   : > { %16707 = vst [vmem:[#allocation26_spill] sm:$0xff] %v13652_v17 }
  0xfc   : > { %v13654_v18 = vpop.trf.xlu1 }
  0xfd   : > { %16708 = vst [vmem:[#allocation27_spill] sm:$0xff] %v13654_v18 }
  0xfe   : > { %v13656_v19 = vpop.trf.xlu0 }
  0xff   : > { %16709 = vst [vmem:[#allocation28_spill] sm:$0xff] %v13656_v19 }
 0x100   : > { %v13658_v20 = vpop.trf.xlu1 }
 0x101   : > { %16710 = vst [vmem:[#allocation29_spill] sm:$0xff] %v13658_v20 }
 0x102   : > { %v13660_v21 = vpop.trf.xlu0 }
 0x103   : > { %16711 = vst [vmem:[#allocation30_spill] sm:$0xff] %v13660_v21 }
 0x104   : > { %v13662_v22 = vpop.trf.xlu1 }
 0x105   : > { %16712 = vst [vmem:[#allocation31_spill] sm:$0xff] %v13662_v22 }
 0x106   : > { %v13664_v23 = vpop.trf.xlu0 }
 0x107   : > { %16713 = vst [vmem:[#allocation32_spill] sm:$0xff] %v13664_v23 }
 0x108   : > { %v13666_v24 = vpop.trf.xlu1 }
 0x109   : > { %16714 = vst [vmem:[#allocation33_spill] sm:$0xff] %v13666_v24 }
 0x10a   : > { %v13668_v25 = vpop.trf.xlu0 }
 0x10b   : > { %16715 = vst [vmem:[#allocation34_spill] sm:$0xff] %v13668_v25 }
 0x10c   : > { %v13670_v26 = vpop.trf.xlu1 }
 0x10d   : > { %16716 = vst [vmem:[#allocation35_spill] sm:$0xff] %v13670_v26 }
 0x10e   : > { %v13672_v27 = vpop.trf.xlu0 }
 0x10f   : > { %16717 = vst [vmem:[#allocation36_spill] sm:$0xff] %v13672_v27 }
 0x110   : > { %v13674_v28 = vpop.trf.xlu1 }
 0x111   : > { %16718 = vst [vmem:[#allocation37_spill] sm:$0xff] %v13674_v28 }
 0x112   : > { %v13676_v29 = vpop.trf.xlu0 }
 0x113   : > { %16719 = vst [vmem:[#allocation38_spill] sm:$0xff] %v13676_v29 }
 0x114   : > { %v13678_v30 = vpop.trf.xlu1 }
 0x115   : > { %16720 = vst [vmem:[#allocation39_spill] sm:$0xff] %v13678_v30 }
 0x116   : > { %v13680_v31 = vpop.trf.xlu0 }
 0x117   : > { %16721 = vst [vmem:[#allocation40_spill] sm:$0xff] %v13680_v31 }
 0x118   : > { %v13684_v34 = vpop.trf.xlu1 }
 0x119   : > { %16722 = vst [vmem:[#allocation41_spill] sm:$0xff] %v13684_v34  ;;  %691 = vxpose.xlu1.b32.start.end [1/1] (short) %v590_v32, 128  ;;  %v591_v32 = vld [vmem:[%s13478_s24 + $0x20] sm:$0xff] }
 0x11a   : > { %v13686_v35 = vpop.trf.xlu0 }
 0x11b   : > { %16723 = vst [vmem:[#allocation42_spill] sm:$0xff] %v13686_v35  ;;  %659 = vxpose.xlu0.b32.start.end [1/1] (short) %v589_v33, 128  ;;  %v856_v35 = vlaneseq }
 0x11c   : > { %v13688_v36 = vpop.trf.xlu1 }
 0x11d   : > { %16724 = vst [vmem:[#allocation43_spill] sm:$0xff] %v13688_v36  ;;  %v13810_v29 = vshrl.u32 %v856_v35, 7 }
 0x11e   : > { %v13690_v37 = vpop.trf.xlu0 }
 0x11f   : > { %16725 = vst [vmem:[#allocation44_spill] sm:$0xff] %v13690_v37  ;;  %v13296_v37 = vmov 1983009808  }
 0x120   : > { %v13692_v38 = vpop.trf.xlu1  ;;  %v854_v36 = vunpack.c.l.s4 %v13296_v37 }
 0x121   : > { %16726 = vst [vmem:[#allocation45_spill] sm:$0xff] %v13692_v38  ;;  %v593_v38 = vld [vmem:[%s13478_s24 + $0x30] sm:$0xff] }
 0x122   : > { %v13694_v39 = vpop.trf.xlu0  ;;  %v855_v30 = vunpack.c.0.s8 %v854_v36 }
 0x123   : > { %16727 = vst [vmem:[#allocation46_spill] sm:$0xff] %v13694_v39  ;;  %v594_v39 = vld [vmem:[%s13478_s24 + $0x38] sm:$0xff] }
 0x124   : > { %v13696_v40 = vpop.trf.xlu1  ;;  %v13817_v26 = vsub.s32 %v855_v30, %v13810_v29 }
 0x125   : > { %16728 = vst [vmem:[#allocation47_spill] sm:$0xff] %v13696_v40 }
 0x126   : > { %v13698_v41 = vpop.trf.xlu0  ;;  %16760 = vst [vmem:[#allocation79_spill] sm:$0xff] %v13817_v26 }
 0x127   : > { %16729 = vst [vmem:[#allocation48_spill] sm:$0xff] %v13698_v41 }
 0x128   : > { %v13700_v42 = vpop.trf.xlu1 }
 0x129   : > { %16730 = vst [vmem:[#allocation49_spill] sm:$0xff] %v13700_v42 }
 0x12a   : > { %v13702_v43 = vpop.trf.xlu0 }
 0x12b   : > { %16731 = vst [vmem:[#allocation50_spill] sm:$0xff] %v13702_v43 }
 0x12c   : > { %v13704_v44 = vpop.trf.xlu1 }
 0x12d   : > { %16732 = vst [vmem:[#allocation51_spill] sm:$0xff] %v13704_v44 }
 0x12e   : > { %v13706_v45 = vpop.trf.xlu0 }
 0x12f   : > { %16733 = vst [vmem:[#allocation52_spill] sm:$0xff] %v13706_v45 }
 0x130   : > { %v13708_v46 = vpop.trf.xlu1 }
 0x131   : > { %16734 = vst [vmem:[#allocation53_spill] sm:$0xff] %v13708_v46 }
 0x132   : > { %v13710_v47 = vpop.trf.xlu0 }
 0x133   : > { %16735 = vst [vmem:[#allocation54_spill] sm:$0xff] %v13710_v47 }
 0x134   : > { %v13712_v48 = vpop.trf.xlu1 }
 0x135   : > { %16736 = vst [vmem:[#allocation55_spill] sm:$0xff] %v13712_v48 }
 0x136   : > { %v13714_v49 = vpop.trf.xlu0 }
 0x137   : > { %16737 = vst [vmem:[#allocation56_spill] sm:$0xff] %v13714_v49 }
 0x138   : > { %v13716_v50 = vpop.trf.xlu1 }
 0x139   : > { %16738 = vst [vmem:[#allocation57_spill] sm:$0xff] %v13716_v50 }
 0x13a   : > { %v13718_v51 = vpop.trf.xlu0 }
 0x13b   : > { %16739 = vst [vmem:[#allocation58_spill] sm:$0xff] %v13718_v51 }
 0x13c   : > { %v13720_v52 = vpop.trf.xlu1 }
 0x13d   : > { %16740 = vst [vmem:[#allocation59_spill] sm:$0xff] %v13720_v52 }
 0x13e   : > { %v13722_v53 = vpop.trf.xlu0 }
 0x13f   : > { %16741 = vst [vmem:[#allocation60_spill] sm:$0xff] %v13722_v53 }
 0x140   : > { %v13724_v54 = vpop.trf.xlu1 }
 0x141   : > { %16742 = vst [vmem:[#allocation61_spill] sm:$0xff] %v13724_v54 }
 0x142   : > { %v13726_v55 = vpop.trf.xlu0 }
 0x143   : > { %16743 = vst [vmem:[#allocation62_spill] sm:$0xff] %v13726_v55 }
 0x144   : > { %v13728_v56 = vpop.trf.xlu1 }
 0x145   : > { %16744 = vst [vmem:[#allocation63_spill] sm:$0xff] %v13728_v56 }
 0x146   : > { %v13730_v57 = vpop.trf.xlu0 }
 0x147   : > { %16745 = vst [vmem:[#allocation64_spill] sm:$0xff] %v13730_v57 }
 0x148   : > { %v13732_v58 = vpop.trf.xlu1 }
 0x149   : > { %16746 = vst [vmem:[#allocation65_spill] sm:$0xff] %v13732_v58 }
 0x14a   : > { %v13734_v59 = vpop.trf.xlu0 }
 0x14b   : > { %16747 = vst [vmem:[#allocation66_spill] sm:$0xff] %v13734_v59 }
 0x14c   : > { %v13736_v60 = vpop.trf.xlu1 }
 0x14d   : > { %16748 = vst [vmem:[#allocation67_spill] sm:$0xff] %v13736_v60 }
 0x14e   : > { %v13738_v61 = vpop.trf.xlu0 }
 0x14f   : > { %16749 = vst [vmem:[#allocation68_spill] sm:$0xff] %v13738_v61 }
 0x150   : > { %v13740_v62 = vpop.trf.xlu1 }
 0x151   : > { %16750 = vst [vmem:[#allocation69_spill] sm:$0xff] %v13740_v62 }
 0x152   : > { %v13742_v63 = vpop.trf.xlu0 }
 0x153   : > { %16751 = vst [vmem:[#allocation70_spill] sm:$0xff] %v13742_v63 }
 0x154   : > { %v13745_v1 = vpop.trf.xlu1 }
 0x155   : > { %16752 = vst [vmem:[#allocation71_spill] sm:$0xff] %v13745_v1 }
 0x156   : > { %v13748_v33 = vpop.trf.xlu0  ;;  %755 = vxpose.xlu1.b32.start.end [1/1] (short) %v592_v0, 128 }
 0x157   : > { %16753 = vst [vmem:[#allocation72_spill] sm:$0xff] %v13748_v33 }
 0x158   : > { %723 = vxpose.xlu0.b32.start.end [1/1] (short) %v591_v32, 128  ;;  %v13750_v57 = vpop.trf.xlu1 }
 0x159   : > { %16754 = vst [vmem:[#allocation73_spill] sm:$0xff] %v13750_v57 }
 0x15a   : > { %v13752_v58 = vpop.trf.xlu0 }
 0x15b   : > { %16755 = vst [vmem:[#allocation74_spill] sm:$0xff] %v13752_v58 }
 0x15c   : > { %v643_v59 = vpop.trf.xlu1 }
 0x15e   : > { %v611_v60 = vpop.trf.xlu0 }
 0x160   : > { %v644_v56 = vpop.trf.xlu1 }
 0x162   : > { %v13754_v61 = vpop.trf.xlu0 }
 0x164   : > { %v13756_v62 = vpop.trf.xlu1 }
 0x166   : > { %v13758_v63 = vpop.trf.xlu0 }
 0x168   : > { %v13760_v55 = vpop.trf.xlu1 }
 0x16a   : > { %v13762_v1 = vpop.trf.xlu0 }
 0x16c   : > { %v13764_v33 = vpop.trf.xlu1 }
 0x16e   : > { %v13766_v0 = vpop.trf.xlu0 }
 0x170   : > { %v13768_v32 = vpop.trf.xlu1 }
 0x172   : > { %v13770_v58 = vpop.trf.xlu0 }
 0x174   : > { %v13772_v57 = vpop.trf.xlu1 }
 0x176   : > { %v13774_v54 = vpop.trf.xlu0 }
 0x178   : > { %v13776_v53 = vpop.trf.xlu1 }
 0x17a   : > { %v13778_v52 = vpop.trf.xlu0 }
 0x17c   : > { %v13780_v51 = vpop.trf.xlu1 }
 0x17e   : > { %v13782_v50 = vpop.trf.xlu0 }
 0x180   : > { %v13784_v49 = vpop.trf.xlu1 }
 0x182   : > { %v13786_v48 = vpop.trf.xlu0 }
 0x184   : > { %v13788_v47 = vpop.trf.xlu1 }
 0x186   : > { %v13790_v46 = vpop.trf.xlu0 }
 0x188   : > { %v13792_v45 = vpop.trf.xlu1 }
 0x18a   : > { %v13794_v44 = vpop.trf.xlu0 }
 0x18c   : > { %v13796_v43 = vpop.trf.xlu1 }
 0x18e   : > { %v13798_v42 = vpop.trf.xlu0 }
 0x190   : > { %v13800_v41 = vpop.trf.xlu1 }
 0x192   : > { %v13802_v40 = vpop.trf.xlu0 }
 0x194   : > { %v13806_v34 = vpop.trf.xlu1  ;;  %819 = vxpose.xlu1.b32.start.end [1/1] (short) %v594_v39, 128 }
 0x195   : > { %16756 = vst [vmem:[#allocation75_spill] sm:$0xff] %v13806_v34 }
 0x196   : > { %v13808_v31 = vpop.trf.xlu0  ;;  %787 = vxpose.xlu0.b32.start.end [1/1] (short) %v593_v38, 128 }
 0x197   : > { %16757 = vst [vmem:[#allocation76_spill] sm:$0xff] %v13808_v31 }
 0x198   : > { %v13812_v28 = vpop.trf.xlu1 }
 0x199   : > { %16758 = vst [vmem:[#allocation77_spill] sm:$0xff] %v13812_v28 }
 0x19a   : > { %v13814_v27 = vpop.trf.xlu0 }
 0x19b   : > { %16759 = vst [vmem:[#allocation78_spill] sm:$0xff] %v13814_v27 }
 0x19c   : > { %v707_v25 = vpop.trf.xlu1 }
 0x19d   : > { %v867_v24 = vcombine.low %v643_v59, %v707_v25  ;;  %v868_v37 = vcombine.high %v643_v59, %v707_v25 }
 0x19e   : > { %v675_v23 = vpop.trf.xlu0 }
 0x19f   : > { %v851_v22 = vcombine.low %v611_v60, %v675_v23  ;;  %v852_v21 = vcombine.high %v611_v60, %v675_v23  ;;  %v13820_v39 = vrot.slane %v867_v24, %v13817_v26  ;;  %v13823_v36 = vrot.slane %v868_v37, %v13817_v26 }
 0x1a0   : > { %v708_v30 = vpop.trf.xlu1 }
 0x1a1   : > { %v13826_v35 = vrot.slane %v851_v22, %v13817_v26  ;;  %v13829_v38 = vrot.slane %v852_v21, %v13817_v26  ;;  %v1003_v20 = vcombine.low %v644_v56, %v708_v30  ;;  %v1004_v19 = vcombine.high %v644_v56, %v708_v30 }
 0x1a2   : > { %v676_v18 = vpop.trf.xlu0 }
 0x1a3   : > { %v13840_v59 = vrot.slane %v1003_v20, %v13817_v26  ;;  %v13843_v21 = vrot.slane %v1004_v19, %v13817_v26  ;;  %v987_v56 = vcombine.low %v13754_v61, %v676_v18  ;;  %v988_v60 = vcombine.high %v13754_v61, %v676_v18 }
 0x1a4   : > { %v709_v37 = vpop.trf.xlu1 }
 0x1a5   : > { %v13848_v30 = vrot.slane %v987_v56, %v13817_v26  ;;  %v13851_v23 = vrot.slane %v988_v60, %v13817_v26  ;;  %v1139_v24 = vcombine.low %v13756_v62, %v709_v37  ;;  %v1140_v22 = vcombine.high %v13756_v62, %v709_v37 }
 0x1a6   : > { %v677_v20 = vpop.trf.xlu0 }
 0x1a7   : > { %v1123_v25 = vcombine.low %v13758_v63, %v677_v20  ;;  %v1124_v19 = vcombine.high %v13758_v63, %v677_v20  ;;  %v13866_v60 = vrot.slane %v1139_v24, %v13817_v26  ;;  %v13869_v62 = vrot.slane %v1140_v22, %v13817_v26 }
 0x1a8   : > { %v710_v20 = vpop.trf.xlu1 }
 0x1a9   : > { %v13872_v63 = vrot.slane %v1123_v25, %v13817_v26  ;;  %v13875_v37 = vrot.slane %v1124_v19, %v13817_v26  ;;  %v1275_v18 = vcombine.low %v13760_v55, %v710_v20  ;;  %v1276_v61 = vcombine.high %v13760_v55, %v710_v20 }
 0x1aa   : > { %v678_v17 = vpop.trf.xlu0 }
 0x1ab   : > { %v13888_v19 = vrot.slane %v1275_v18, %v13817_v26  ;;  %v13891_v16 = vrot.slane %v1276_v61, %v13817_v26  ;;  %v1259_v55 = vcombine.low %v13762_v1, %v678_v17  ;;  %v1260_v20 = vcombine.high %v13762_v1, %v678_v17 }
 0x1ac   : > { %v711_v56 = vpop.trf.xlu1 }
 0x1ad   : > { %v13896_v15 = vrot.slane %v1259_v55, %v13817_v26  ;;  %v13899_v24 = vrot.slane %v1260_v20, %v13817_v26  ;;  %v1411_v22 = vcombine.low %v13764_v33, %v711_v56  ;;  %v1412_v25 = vcombine.high %v13764_v33, %v711_v56 }
 0x1ae   : > { %v679_v18 = vpop.trf.xlu0 }
 0x1af   : > { %v1395_v14 = vcombine.low %v13766_v0, %v679_v18  ;;  %v1396_v61 = vcombine.high %v13766_v0, %v679_v18  ;;  %v13914_v20 = vrot.slane %v1411_v22, %v13817_v26  ;;  %v13917_v33 = vrot.slane %v1412_v25, %v13817_v26 }
 0x1b0   : > { %v712_v18 = vpop.trf.xlu1 }
 0x1b1   : > { %v13920_v0 = vrot.slane %v1395_v14, %v13817_v26  ;;  %v13923_v56 = vrot.slane %v1396_v61, %v13817_v26  ;;  %v1547_v17 = vcombine.low %v13768_v32, %v712_v18  ;;  %v1548_v1 = vcombine.high %v13768_v32, %v712_v18 }
 0x1b2   : > { %v680_v13 = vpop.trf.xlu0 }
 0x1b3   : > { %v13936_v61 = vrot.slane %v1547_v17, %v13817_v26  ;;  %v13939_v12 = vrot.slane %v1548_v1, %v13817_v26  ;;  %v1531_v32 = vcombine.low %v13770_v58, %v680_v13  ;;  %v1532_v18 = vcombine.high %v13770_v58, %v680_v13 }
 0x1b4   : > { %v713_v55 = vpop.trf.xlu1 }
 0x1b5   : > { %16761 = vst [vmem:[#allocation80_spill] sm:$0xff] %v13939_v12  ;;  %v13944_v11 = vrot.slane %v1531_v32, %v13817_v26  ;;  %v13947_v22 = vrot.slane %v1532_v18, %v13817_v26  ;;  %v1683_v25 = vcombine.low %v13772_v57, %v713_v55  ;;  %v1684_v14 = vcombine.high %v13772_v57, %v713_v55 }
 0x1b6   : > { %v681_v17 = vpop.trf.xlu0 }
 0x1b7   : > { %v1667_v10 = vcombine.low %v13774_v54, %v681_v17  ;;  %v1668_v1 = vcombine.high %v13774_v54, %v681_v17  ;;  %v13962_v18 = vrot.slane %v1683_v25, %v13817_v26  ;;  %v13965_v57 = vrot.slane %v1684_v14, %v13817_v26 }
 0x1b8   : > { %v714_v17 = vpop.trf.xlu1 }
 0x1b9   : > { %16762 = vst [vmem:[#allocation81_spill] sm:$0xff] %v13962_v18  ;;  %16763 = vst [vmem:[#allocation82_spill] sm:$0xff] %v13965_v57  ;;  %v13968_v54 = vrot.slane %v1667_v10, %v13817_v26  ;;  %v13971_v55 = vrot.slane %v1668_v1, %v13817_v26  ;;  %v1819_v13 = vcombine.low %v13776_v53, %v714_v17 }
 0x1ba   : > { %v1820_v58 = vcombine.high %v13776_v53, %v714_v17  ;;  %v682_v9 = vpop.trf.xlu0 }
 0x1bb   : > { %16764 = vst [vmem:[#allocation83_spill] sm:$0xff] %v13968_v54  ;;  %16765 = vst [vmem:[#allocation84_spill] sm:$0xff] %v13971_v55  ;;  %v13984_v1 = vrot.slane %v1819_v13, %v13817_v26  ;;  %v1803_v53 = vcombine.low %v13778_v52, %v682_v9  ;;  %v1804_v17 = vcombine.high %v13778_v52, %v682_v9 }
 0x1bc   : > { %v13987_v8 = vrot.slane %v1820_v58, %v13817_v26  ;;  %v715_v32 = vpop.trf.xlu1 }
 0x1bd   : > { %16766 = vst [vmem:[#allocation85_spill] sm:$0xff] %v13984_v1  ;;  %v13992_v7 = vrot.slane %v1803_v53, %v13817_v26  ;;  %v13995_v25 = vrot.slane %v1804_v17, %v13817_v26  ;;  %v1955_v14 = vcombine.low %v13780_v51, %v715_v32  ;;  %v1956_v10 = vcombine.high %v13780_v51, %v715_v32 }
 0x1be   : > { %16767 = vst [vmem:[#allocation86_spill] sm:$0xff] %v13987_v8  ;;  %v683_v13 = vpop.trf.xlu0 }
 0x1bf   : > { %16768 = vst [vmem:[#allocation87_spill] sm:$0xff] %v13992_v7  ;;  %16769 = vst [vmem:[#allocation88_spill] sm:$0xff] %v13995_v25  ;;  %v1939_v6 = vcombine.low %v13782_v50, %v683_v13  ;;  %v1940_v58 = vcombine.high %v13782_v50, %v683_v13  ;;  %v14010_v17 = vrot.slane %v1955_v14, %v13817_v26 }
 0x1c0   : > { %v14013_v51 = vrot.slane %v1956_v10, %v13817_v26  ;;  %v716_v13 = vpop.trf.xlu1 }
 0x1c1   : > { %16770 = vst [vmem:[#allocation89_spill] sm:$0xff] %v14010_v17  ;;  %v14016_v50 = vrot.slane %v1939_v6, %v13817_v26  ;;  %v14019_v32 = vrot.slane %v1940_v58, %v13817_v26  ;;  %v2091_v9 = vcombine.low %v13784_v49, %v716_v13  ;;  %v2092_v52 = vcombine.high %v13784_v49, %v716_v13 }
 0x1c2   : > { %16771 = vst [vmem:[#allocation90_spill] sm:$0xff] %v14013_v51  ;;  %v684_v5 = vpop.trf.xlu0 }
 0x1c3   : > { %16772 = vst [vmem:[#allocation91_spill] sm:$0xff] %v14016_v50  ;;  %16773 = vst [vmem:[#allocation92_spill] sm:$0xff] %v14019_v32  ;;  %v14032_v58 = vrot.slane %v2091_v9, %v13817_v26  ;;  %v14035_v4 = vrot.slane %v2092_v52, %v13817_v26  ;;  %v2075_v49 = vcombine.low %v13786_v48, %v684_v5 }
 0x1c4   : > { %v2076_v13 = vcombine.high %v13786_v48, %v684_v5  ;;  %v717_v53 = vpop.trf.xlu1 }
 0x1c5   : > { %16774 = vst [vmem:[#allocation93_spill] sm:$0xff] %v14032_v58  ;;  %16775 = vst [vmem:[#allocation94_spill] sm:$0xff] %v14035_v4  ;;  %v14040_v3 = vrot.slane %v2075_v49, %v13817_v26  ;;  %v2227_v10 = vcombine.low %v13788_v47, %v717_v53  ;;  %v2228_v6 = vcombine.high %v13788_v47, %v717_v53 }
 0x1c6   : > { %v14043_v14 = vrot.slane %v2076_v13, %v13817_v26  ;;  %v685_v9 = vpop.trf.xlu0 }
 0x1c7   : > { %16776 = vst [vmem:[#allocation95_spill] sm:$0xff] %v14040_v3  ;;  %v2211_v2 = vcombine.low %v13790_v46, %v685_v9  ;;  %v2212_v52 = vcombine.high %v13790_v46, %v685_v9  ;;  %v14058_v13 = vrot.slane %v2227_v10, %v13817_v26  ;;  %v14061_v47 = vrot.slane %v2228_v6, %v13817_v26 }
 0x1c8   : > { %16777 = vst [vmem:[#allocation96_spill] sm:$0xff] %v14043_v14  ;;  %v718_v9 = vpop.trf.xlu1 }
 0x1c9   : > { %16778 = vst [vmem:[#allocation97_spill] sm:$0xff] %v14058_v13  ;;  %16779 = vst [vmem:[#allocation98_spill] sm:$0xff] %v14061_v47  ;;  %v14064_v46 = vrot.slane %v2211_v2, %v13817_v26  ;;  %v14067_v53 = vrot.slane %v2212_v52, %v13817_v26  ;;  %v2363_v5 = vcombine.low %v13792_v45, %v718_v9 }
 0x1ca   : > { %v2364_v48 = vcombine.high %v13792_v45, %v718_v9  ;;  %v686_v27 = vpop.trf.xlu0 }
 0x1cb   : > { %16780 = vst [vmem:[#allocation99_spill] sm:$0xff] %v14064_v46  ;;  %16781 = vst [vmem:[#allocation100_spill] sm:$0xff] %v14067_v53  ;;  %v14080_v52 = vrot.slane %v2363_v5, %v13817_v26  ;;  %v2347_v45 = vcombine.low %v13794_v44, %v686_v27  ;;  %v2348_v9 = vcombine.high %v13794_v44, %v686_v27 }
 0x1cc   : > { %v14083_v28 = vrot.slane %v2364_v48, %v13817_v26  ;;  %v719_v49 = vpop.trf.xlu1 }
 0x1cd   : > { %16782 = vst [vmem:[#allocation101_spill] sm:$0xff] %v14080_v52  ;;  %v14088_v31 = vrot.slane %v2347_v45, %v13817_v26  ;;  %v14091_v10 = vrot.slane %v2348_v9, %v13817_v26  ;;  %v2499_v6 = vcombine.low %v13796_v43, %v719_v49  ;;  %v2500_v2 = vcombine.high %v13796_v43, %v719_v49 }
 0x1ce   : > { %v687_v5 = vpop.trf.xlu0 }
 0x1cf   : > { %16783 = vst [vmem:[#allocation102_spill] sm:$0xff] %v14088_v31  ;;  %v2483_v47 = vcombine.low %v13798_v42, %v687_v5  ;;  %v2484_v48 = vcombine.high %v13798_v42, %v687_v5  ;;  %v14106_v9 = vrot.slane %v2499_v6, %v13817_v26  ;;  %v14109_v43 = vrot.slane %v2500_v2, %v13817_v26 }
 0x1d0   : > { %v720_v5 = vpop.trf.xlu1 }
 0x1d1   : > { %16784 = vst [vmem:[#allocation103_spill] sm:$0xff] %v14106_v9  ;;  %16785 = vst [vmem:[#allocation104_spill] sm:$0xff] %v14109_v43  ;;  %v14112_v42 = vrot.slane %v2483_v47, %v13817_v26  ;;  %v14115_v49 = vrot.slane %v2484_v48, %v13817_v26  ;;  %v2635_v27 = vcombine.low %v13800_v41, %v720_v5 }
 0x1d2   : > { %v2636_v53 = vcombine.high %v13800_v41, %v720_v5  ;;  %v688_v44 = vpop.trf.xlu0 }
 0x1d3   : > { %16786 = vst [vmem:[#allocation105_spill] sm:$0xff] %v14112_v42  ;;  %16787 = vst [vmem:[#allocation106_spill] sm:$0xff] %v14115_v49  ;;  %v14128_v48 = vrot.slane %v2635_v27, %v13817_v26  ;;  %v2619_v41 = vcombine.low %v13802_v40, %v688_v44  ;;  %v2620_v5 = vcombine.high %v13802_v40, %v688_v44 }
 0x1d4   : > { %v14131_v52 = vrot.slane %v2636_v53, %v13817_v26  ;;  %v14135_v45 = vpop.trf.xlu1 }
 0x1d5   : > { %16788 = vst [vmem:[#allocation107_spill] sm:$0xff] %v14128_v48  ;;  %16790 = vst [vmem:[#allocation109_spill] sm:$0xff] %v14135_v45  ;;  %v14138_v6 = vrot.slane %v2619_v41, %v13817_v26  ;;  %v14141_v2 = vrot.slane %v2620_v5, %v13817_v26 }
 0x1d6   : > { %16789 = vst [vmem:[#allocation108_spill] sm:$0xff] %v14131_v52  ;;  %v14143_v9 = vpop.trf.xlu0 }
 0x1d7   : > { %16791 = vst [vmem:[#allocation110_spill] sm:$0xff] %v14138_v6  ;;  %16792 = vst [vmem:[#allocation111_spill] sm:$0xff] %v14141_v2 }
 0x1d8   : > { %16793 = vst [vmem:[#allocation112_spill] sm:$0xff] %v14143_v9  ;;  %v14153_v44 = vpop.trf.xlu1 }
 0x1d9   : > { %16794 = vst [vmem:[#allocation113_spill] sm:$0xff] %v14153_v44 }
 0x1da   : > { %v14155_v41 = vpop.trf.xlu0 }
 0x1db   : > { %16795 = vst [vmem:[#allocation114_spill] sm:$0xff] %v14155_v41 }
 0x1dc   : > { %v771_v5 = vpop.trf.xlu1 }
 0x1de   : > { %v739_v43 = vpop.trf.xlu0 }
 0x1e0   : > { %v14157_v49 = vpop.trf.xlu1 }
 0x1e2   : > { %v14159_v42 = vpop.trf.xlu0 }
 0x1e4   : > { %v14161_v27 = vpop.trf.xlu1 }
 0x1e6   : > { %v14163_v31 = vpop.trf.xlu0 }
 0x1e8   : > { %v14165_v53 = vpop.trf.xlu1 }
 0x1ea   : > { %v14167_v47 = vpop.trf.xlu0 }
 0x1ec   : > { %v14169_v48 = vpop.trf.xlu1 }
 0x1ee   : > { %v14171_v40 = vpop.trf.xlu0 }
 0x1f0   : > { %v14173_v52 = vpop.trf.xlu1 }
 0x1f2   : > { %v14175_v2 = vpop.trf.xlu0 }
 0x1f4   : > { %v14177_v41 = vpop.trf.xlu1 }
 0x1f6   : > { %v14179_v6 = vpop.trf.xlu0 }
 0x1f8   : > { %v14181_v44 = vpop.trf.xlu1 }
 0x1f9   : > { %16796 = vst [vmem:[#allocation115_spill] sm:$0xff] %v14181_v44 }
 0x1fa   : > { %v14183_v9 = vpop.trf.xlu0 }
 0x1fb   : > { %16797 = vst [vmem:[#allocation116_spill] sm:$0xff] %v14183_v9 }
 0x1fc   : > { %v14185_v34 = vpop.trf.xlu1 }
 0x1fd   : > { %16798 = vst [vmem:[#allocation117_spill] sm:$0xff] %v14185_v34 }
 0x1fe   : > { %v14187_v45 = vpop.trf.xlu0 }
 0x1ff   : > { %16799 = vst [vmem:[#allocation118_spill] sm:$0xff] %v14187_v45 }
 0x200   : > { %v14189_v13 = vpop.trf.xlu1 }
 0x201   : > { %16800 = vst [vmem:[#allocation119_spill] sm:$0xff] %v14189_v13 }
 0x202   : > { %v14191_v46 = vpop.trf.xlu0 }
 0x203   : > { %16801 = vst [vmem:[#allocation120_spill] sm:$0xff] %v14191_v46 }
 0x204   : > { %v14193_v4 = vpop.trf.xlu1 }
 0x205   : > { %16802 = vst [vmem:[#allocation121_spill] sm:$0xff] %v14193_v4  ;;  %v13297_v4 = vmov 1934713408  }
 0x206   : > { %v14195_v14 = vpop.trf.xlu0 }
 0x207   : > { %16803 = vst [vmem:[#allocation122_spill] sm:$0xff] %v14195_v14  ;;  %v918_v14 = vunpack.c.l.s4 %v13297_v4 }
 0x208   : > { %v14197_v58 = vpop.trf.xlu1 }
 0x209   : > { %v919_v25 = vunpack.c.0.s8 %v918_v14 }
 0x20a   : > { %v14199_v3 = vpop.trf.xlu0 }
 0x20c   : > { %v14201_v51 = vpop.trf.xlu1 }
 0x20d   : > { %16804 = vst [vmem:[#allocation123_spill] sm:$0xff] %v14201_v51 }
 0x20e   : > { %v14203_v32 = vpop.trf.xlu0 }
 0x20f   : > { %16805 = vst [vmem:[#allocation124_spill] sm:$0xff] %v14203_v32 }
 0x210   : > { %v14205_v17 = vpop.trf.xlu1 }
 0x211   : > { %16806 = vst [vmem:[#allocation125_spill] sm:$0xff] %v14205_v17 }
 0x212   : > { %v14207_v34 = vpop.trf.xlu0 }
 0x213   : > { %16807 = vst [vmem:[#allocation126_spill] sm:$0xff] %v14207_v34 }
 0x214   : > { %v14209_v45 = vpop.trf.xlu1 }
 0x215   : > { %16808 = vst [vmem:[#allocation127_spill] sm:$0xff] %v14209_v45 }
 0x216   : > { %v14211_v13 = vpop.trf.xlu0 }
 0x217   : > { %16809 = vst [vmem:[#allocation128_spill] sm:$0xff] %v14211_v13  ;;  %v14220_v13 = vsub.s32 %v919_v25, %v13810_v29 }
 0x218   : > { %v14213_v46 = vpop.trf.xlu1 }
 0x219   : > { %16810 = vst [vmem:[#allocation129_spill] sm:$0xff] %v14213_v46 }
 0x21a   : > { %v14215_v50 = vpop.trf.xlu0 }
 0x21b   : > { %16811 = vst [vmem:[#allocation130_spill] sm:$0xff] %v14215_v50 }
 0x21c   : > { %v835_v8 = vpop.trf.xlu1 }
 0x21d   : > { %v899_v1 = vcombine.low %v771_v5, %v835_v8  ;;  %v900_v51 = vcombine.high %v771_v5, %v835_v8  ;;  %v16813_v5 = vcombine.high %v13826_v35, %v13820_v39 }
 0x21e   : > { %v803_v7 = vpop.trf.xlu0 }
 0x21f   : > { %v883_v32 = vcombine.low %v739_v43, %v803_v7  ;;  %v884_v57 = vcombine.high %v739_v43, %v803_v7  ;;  %v907_v17 = vrot.slane %v899_v1, %v13817_v26  ;;  %v914_v46 = vrot.slane %v900_v51, %v13817_v26 }
 0x220   : > { %v836_v45 = vpop.trf.xlu1  ;;  %v16812_v7 = vcombine.low %v13826_v35, %v13820_v39  ;;  %v16814_v39 = vcombine.low %v13829_v38, %v13823_v36 }
 0x221   : > { %v891_v34 = vrot.slane %v883_v32, %v13817_v26  ;;  %v898_v4 = vrot.slane %v884_v57, %v13817_v26  ;;  %v1035_v29 = vcombine.low %v14157_v49, %v836_v45 }
 0x222   : > { %v804_v50 = vpop.trf.xlu0  ;;  %v923_v8 = vrot.slane %v16812_v7, %v14220_v13  ;;  %v930_v7 = vrot.slane %v16813_v5, %v14220_v13  ;;  %v939_v35 = vrot.slane %v16814_v39, %v14220_v13 }
 0x223   : > { %v947_v55 = vcombine.low %v891_v34, %v907_v17  ;;  %v948_v14 = vcombine.high %v891_v34, %v907_v17  ;;  %v963_v32 = vcombine.low %v898_v4, %v914_v46  ;;  %v1019_v51 = vcombine.low %v14159_v42, %v804_v50 }
 0x224   : > { %v14224_v9 = vpop.trf.xlu1  ;;  %v1043_v18 = vrot.slane %v1035_v29, %v13817_v26  ;;  %v1020_v29 = vcombine.high %v14159_v42, %v804_v50 }
 0x225   : > { %v955_v1 = vrot.slane %v947_v55, %v14220_v13  ;;  %v962_v34 = vrot.slane %v948_v14, %v14220_v13  ;;  %v964_v55 = vcombine.high %v898_v4, %v914_v46  ;;  %v1027_v54 = vrot.slane %v1019_v51, %v13817_v26 }
 0x226   : > { %v14232_v25 = vpop.trf.xlu0  ;;  %v1036_v46 = vcombine.high %v14157_v49, %v836_v45  ;;  %v1034_v50 = vrot.slane %v1020_v29, %v13817_v26  ;;  %v1171_v39 = vcombine.low %v14161_v27, %v14224_v9 }
 0x227   : > { %v980_v57 = vcombine.high %v923_v8, %v955_v1  ;;  %v979_v43 = vcombine.low %v923_v8, %v955_v1  ;;  %v982_v12 = vcombine.high %v930_v7, %v962_v34  ;;  %v971_v8 = vrot.slane %v963_v32, %v14220_v13 }
 0x228   : > { %v14236_v17 = vpop.trf.xlu1  ;;  %v981_v14 = vcombine.low %v930_v7, %v962_v34  ;;  %v1083_v51 = vcombine.low %v1027_v54, %v1043_v18  ;;  %v978_v32 = vrot.slane %v964_v55, %v14220_v13  ;;  %v16815_v34 = vcombine.high %v13829_v38, %v13823_v36 }
 0x229   : > { %3059 = vxpose.xlu1.b32.start.end [1/1] (short) (narrow) %v980_v57, 8  ;;  %3027 = vxpose.xlu0.b32.start.end [1/1] (short) (narrow) %v979_v43, 8  ;;  %v984_v57 = vcombine.high %v939_v35, %v971_v8  ;;  %v983_v43 = vcombine.low %v939_v35, %v971_v8  ;;  %v1050_v45 = vrot.slane %v1036_v46, %v13817_v26 }
 0x22a   : > { %v14242_v44 = vpop.trf.xlu0  ;;  %v946_v5 = vrot.slane %v16815_v34, %v14220_v13  ;;  %v1084_v42 = vcombine.high %v1027_v54, %v1043_v18  ;;  %v1091_v55 = vrot.slane %v1083_v51, %v14220_v13  ;;  %v16816_v36 = vcombine.low %v13848_v30, %v13840_v59 }
 0x22b   : > { %v1099_v46 = vcombine.low %v1034_v50, %v1050_v45  ;;  %v1155_v18 = vcombine.low %v14163_v31, %v14232_v25  ;;  %v1100_v34 = vcombine.high %v1034_v50, %v1050_v45  ;;  %v1172_v45 = vcombine.high %v14161_v27, %v14224_v9 }
 0x22c   : > { %v14247_v1 = vpop.trf.xlu1  ;;  %v986_v7 = vcombine.high %v946_v5, %v978_v32  ;;  %v985_v8 = vcombine.low %v946_v5, %v978_v32  ;;  %v1059_v38 = vrot.slane %v16816_v36, %v14220_v13  ;;  %v1098_v29 = vrot.slane %v1084_v42, %v14220_v13 }
 0x22d   : > { %3123 = vxpose.xlu1.b32.start.end [1/1] (short) (narrow) %v982_v12, 8  ;;  %3091 = vxpose.xlu0.b32.start.end [1/1] (short) (narrow) %v981_v14, 8  ;;  %v16817_v32 = vcombine.high %v13848_v30, %v13840_v59  ;;  %v1107_v42 = vrot.slane %v1099_v46, %v14220_v13  ;;  %v16818_v59 = vcombine.low %v13851_v23, %v13843_v21 }
 0x22e   : > { %v14254_v4 = vpop.trf.xlu0  ;;  %v1116_v54 = vcombine.high %v1059_v38, %v1091_v55  ;;  %v1115_v51 = vcombine.low %v1059_v38, %v1091_v55  ;;  %v1186_v9 = vrot.slane %v1172_v45, %v13817_v26 }
 0x22f   : > { %v1075_v30 = vrot.slane %v16818_v59, %v14220_v13  ;;  %v1307_v59 = vcombine.low %v14165_v53, %v14236_v17 }
 0x230   : > { %v14258_v12 = vpop.trf.xlu1 }
 0x231   : > { %3187 = vxpose.xlu1.b32.start.end [1/1] (short) (narrow) %v984_v57, 8  ;;  %3155 = vxpose.xlu0.b32.start.end [1/1] (short) (narrow) %v983_v43, 8  ;;  %v1066_v43 = vrot.slane %v16817_v32, %v14220_v13  ;;  %v1120_v46 = vcombine.high %v1075_v30, %v1107_v42  ;;  %v16819_v32 = vcombine.high %v13851_v23, %v13843_v21 }
 0x232   : > { %v14265_v49 = vpop.trf.xlu0  ;;  %v16820_v23 = vcombine.low %v13872_v63, %v13866_v60 }
 0x233   : > { %v1118_v36 = vcombine.high %v1066_v43, %v1098_v29  ;;  %v1117_v55 = vcombine.low %v1066_v43, %v1098_v29  ;;  %v1119_v29 = vcombine.low %v1075_v30, %v1107_v42  ;;  %v1082_v43 = vrot.slane %v16819_v32, %v14220_v13 }
 0x234   : > { %v14269_v14 = vpop.trf.xlu1  ;;  %v1195_v21 = vrot.slane %v16820_v23, %v14220_v13 }
 0x235   : > { %3251 = vxpose.xlu1.b32.start.end [1/1] (short) (narrow) %v986_v7, 8  ;;  %3219 = vxpose.xlu0.b32.start.end [1/1] (short) (narrow) %v985_v8, 8  ;;  %v1179_v7 = vrot.slane %v1171_v39, %v13817_v26  ;;  %v1163_v8 = vrot.slane %v1155_v18, %v13817_v26  ;;  %v1156_v39 = vcombine.high %v14163_v31, %v14232_v25 }
 0x236   : > { %v14277_v35 = vpop.trf.xlu0 }
 0x237   : > { %v1219_v18 = vcombine.low %v1163_v8, %v1179_v7  ;;  %v1170_v31 = vrot.slane %v1156_v39, %v13817_v26  ;;  %v1220_v25 = vcombine.high %v1163_v8, %v1179_v7  ;;  %v1291_v7 = vcombine.low %v14167_v47, %v14242_v44 }
 0x238   : > { %v14282_v57 = vpop.trf.xlu1 }
 0x239   : > { %3315 = vxpose.xlu1.b32.start.end [1/1] (short) (narrow) %v1116_v54, 8  ;;  %3283 = vxpose.xlu0.b32.start.end [1/1] (short) (narrow) %v1115_v51, 8  ;;  %v1114_v54 = vrot.slane %v1100_v34, %v14220_v13  ;;  %v1227_v34 = vrot.slane %v1219_v18, %v14220_v13  ;;  %v1235_v45 = vcombine.low %v1170_v31, %v1186_v9 }
 0x23a   : > { %v14288_v5 = vpop.trf.xlu0  ;;  %v1234_v39 = vrot.slane %v1220_v25, %v14220_v13  ;;  %v1236_v32 = vcombine.high %v1170_v31, %v1186_v9  ;;  %v1299_v25 = vrot.slane %v1291_v7, %v13817_v26  ;;  %v16822_v9 = vcombine.low %v13875_v37, %v13869_v62 }
 0x23b   : > { %v1121_v42 = vcombine.low %v1082_v43, %v1114_v54  ;;  %v1252_v8 = vcombine.high %v1195_v21, %v1227_v34  ;;  %v1251_v18 = vcombine.low %v1195_v21, %v1227_v34  ;;  %v1243_v23 = vrot.slane %v1235_v45, %v14220_v13 }
 0x23c   : > { %v14293_v38 = vpop.trf.xlu1  ;;  %v1211_v31 = vrot.slane %v16822_v9, %v14220_v13  ;;  %v1292_v45 = vcombine.high %v14167_v47, %v14242_v44 }
 0x23d   : > { %3379 = vxpose.xlu1.b32.start.end [1/1] (short) (narrow) %v1118_v36, 8  ;;  %3347 = vxpose.xlu0.b32.start.end [1/1] (short) (narrow) %v1117_v55, 8  ;;  %v1122_v36 = vcombine.high %v1082_v43, %v1114_v54  ;;  %v16821_v54 = vcombine.high %v13872_v63, %v13866_v60 }
 0x23e   : > { %v14301_v50 = vpop.trf.xlu0  ;;  %v1306_v47 = vrot.slane %v1292_v45, %v13817_v26  ;;  %v16825_v45 = vcombine.high %v13896_v15, %v13888_v19 }
 0x240   : > { %v14306_v51 = vpop.trf.xlu1 }
 0x241   : > { %3443 = vxpose.xlu1.b32.start.end [1/1] (short) (narrow) %v1120_v46, 8  ;;  %3411 = vxpose.xlu0.b32.start.end [1/1] (short) (narrow) %v1119_v29, 8  ;;  %v1202_v29 = vrot.slane %v16821_v54, %v14220_v13 }
 0x242   : > { %v14313_v27 = vpop.trf.xlu0 }
 0x243   : > { %v1254_v34 = vcombine.high %v1202_v29, %v1234_v39  ;;  %v1253_v63 = vcombine.low %v1202_v29, %v1234_v39  ;;  %v1250_v39 = vrot.slane %v1236_v32, %v14220_v13 }
 0x244   : > { %v14317_v55 = vpop.trf.xlu1 }
 0x245   : > { %3507 = vxpose.xlu1.b32.start.end [1/1] (short) (narrow) %v1122_v36, 8  ;;  %3475 = vxpose.xlu0.b32.start.end [1/1] (short) (narrow) %v1121_v42, 8  ;;  %v1315_v42 = vrot.slane %v1307_v59, %v13817_v26  ;;  %v1308_v59 = vcombine.high %v14165_v53, %v14236_v17  ;;  %v16823_v53 = vcombine.high %v13875_v37, %v13869_v62 }
 0x246   : > { %v14325_v30 = vpop.trf.xlu0  ;;  %v1443_v62 = vcombine.low %v14169_v48, %v14247_v1 }
 0x247   : > { %v1218_v17 = vrot.slane %v16823_v53, %v14220_v13  ;;  %v1356_v44 = vcombine.high %v1299_v25, %v1315_v42 }
 0x248   : > { %v14330_v46 = vpop.trf.xlu1 }
 0x249   : > { %3571 = vxpose.xlu1.b32.start.end [1/1] (short) (narrow) %v1252_v8, 8  ;;  %3539 = vxpose.xlu0.b32.start.end [1/1] (short) (narrow) %v1251_v18, 8  ;;  %v2396_v43 = vcombine.high %v14197_v58, %v14330_v46  ;;  %v1355_v8 = vcombine.low %v1299_v25, %v1315_v42  ;;  %v1256_v18 = vcombine.high %v1211_v31, %v1243_v23 }
 0x24a   : > { %v14338_v36 = vpop.trf.xlu0  ;;  %v1258_v32 = vcombine.high %v1218_v17, %v1250_v39  ;;  %v1370_v42 = vrot.slane %v1356_v44, %v14220_v13  ;;  %v16826_v44 = vcombine.low %v13899_v24, %v13891_v16 }
 0x24b   : > { %v14344_v21 = vrot.slane %v2396_v43, %v13817_v26  ;;  %v2380_v60 = vcombine.high %v14199_v3, %v14338_v36  ;;  %v1255_v43 = vcombine.low %v1211_v31, %v1243_v23  ;;  %v16824_v23 = vcombine.low %v13896_v15, %v13888_v19 }
 0x24c   : > { %v1427_v31 = vcombine.low %v14171_v40, %v14254_v4  ;;  %v1444_v15 = vcombine.high %v14169_v48, %v14247_v1  ;;  %v1428_v19 = vcombine.high %v14171_v40, %v14254_v4 }
 0x24d   : > { %3635 = vxpose.xlu1.b32.start.end [1/1] (short) (narrow) %v1254_v34, 8  ;;  %v14355_v7 = vrot.slane %v2380_v60, %v13817_v26  ;;  %3603 = vxpose.xlu0.b32.start.end [1/1] (short) (narrow) %v1253_v63, 8  ;;  %v1322_v34 = vrot.slane %v1308_v59, %v13817_v26  ;;  %v1363_v60 = vrot.slane %v1355_v8, %v14220_v13 }
 0x24e   : > { %v1257_v63 = vcombine.low %v1218_v17, %v1250_v39  ;;  %v1331_v9 = vrot.slane %v16824_v23, %v14220_v13  ;;  %v1338_v8 = vrot.slane %v16825_v45, %v14220_v13  ;;  %v1451_v39 = vrot.slane %v1443_v62, %v13817_v26 }
 0x24f   : > { %v2459_v54 = vcombine.low %v14355_v7, %v14344_v21  ;;  %v2460_v29 = vcombine.high %v14355_v7, %v14344_v21  ;;  %v1371_v37 = vcombine.low %v1306_v47, %v1322_v34  ;;  %v1442_v48 = vrot.slane %v1428_v19, %v13817_v26 }
 0x250   : > { %v1388_v59 = vcombine.high %v1331_v9, %v1363_v60  ;;  %v1387_v25 = vcombine.low %v1331_v9, %v1363_v60  ;;  %v1390_v53 = vcombine.high %v1338_v8, %v1370_v42  ;;  %v1347_v60 = vrot.slane %v16826_v44, %v14220_v13 }
 0x251   : > { %3699 = vxpose.xlu1.b32.start.end [1/1] (short) (narrow) %v1256_v18, 8  ;;  %3667 = vxpose.xlu0.b32.start.end [1/1] (short) (narrow) %v1255_v43, 8  ;;  %v1372_v18 = vcombine.high %v1306_v47, %v1322_v34  ;;  %v1435_v43 = vrot.slane %v1427_v31, %v13817_v26  ;;  %v1379_v17 = vrot.slane %v1371_v37, %v14220_v13 }
 0x252   : > { %v16827_v9 = vcombine.high %v13899_v24, %v13891_v16  ;;  %v1458_v37 = vrot.slane %v1444_v15, %v13817_v26  ;;  %v1579_v16 = vcombine.low %v14173_v52, %v14258_v12  ;;  %v16830_v19 = vcombine.low %v13923_v56, %v13917_v33 }
 0x253   : > { %v1491_v34 = vcombine.low %v1435_v43, %v1451_v39  ;;  %v1392_v47 = vcombine.high %v1347_v60, %v1379_v17  ;;  %v1391_v23 = vcombine.low %v1347_v60, %v1379_v17  ;;  %v1492_v1 = vcombine.high %v1435_v43, %v1451_v39 }
 0x254   : > { %v1354_v62 = vrot.slane %v16827_v9, %v14220_v13  ;;  %v1507_v24 = vcombine.low %v1442_v48, %v1458_v37  ;;  %v16829_v39 = vcombine.high %v13920_v0, %v13914_v20  ;;  %v1587_v17 = vrot.slane %v1579_v16, %v13817_v26 }
 0x255   : > { %3763 = vxpose.xlu1.b32.start.end [1/1] (short) (narrow) %v1258_v32, 8  ;;  %3731 = vxpose.xlu0.b32.start.end [1/1] (short) (narrow) %v1257_v63, 8  ;;  %v1389_v32 = vcombine.low %v1338_v8, %v1370_v42  ;;  %v1386_v63 = vrot.slane %v1372_v18, %v14220_v13  ;;  %v1499_v40 = vrot.slane %v1491_v34, %v14220_v13 }
 0x256   : > { %v1506_v8 = vrot.slane %v1492_v1, %v14220_v13  ;;  %v1474_v43 = vrot.slane %v16829_v39, %v14220_v13  ;;  %v1515_v60 = vrot.slane %v1507_v24, %v14220_v13  ;;  %v1483_v34 = vrot.slane %v16830_v19, %v14220_v13 }
 0x257   : > { %v1394_v31 = vcombine.high %v1354_v62, %v1386_v63  ;;  %v1393_v4 = vcombine.low %v1354_v62, %v1386_v63  ;;  %v16831_v62 = vcombine.high %v13923_v56, %v13917_v33  ;;  %v16832_v33 = vcombine.low %v14091_v10, %v14083_v28 }
 0x258   : > { %v1526_v44 = vcombine.high %v1474_v43, %v1506_v8  ;;  %v1525_v15 = vcombine.low %v1474_v43, %v1506_v8  ;;  %v1528_v63 = vcombine.high %v1483_v34, %v1515_v60  ;;  %v1527_v9 = vcombine.low %v1483_v34, %v1515_v60 }
 0x259   : > { %3827 = vxpose.xlu1.b32.start.end [1/1] (short) (narrow) %v1388_v59, 8  ;;  %3795 = vxpose.xlu0.b32.start.end [1/1] (short) (narrow) %v1387_v25, 8  ;;  %v16828_v59 = vcombine.low %v13920_v0, %v13914_v20  ;;  %v1563_v25 = vcombine.low %v14175_v2, %v14265_v49  ;;  %v1580_v20 = vcombine.high %v14173_v52, %v14258_v12 }
 0x25a   : > { %v1564_v0 = vcombine.high %v14175_v2, %v14265_v49  ;;  %v14436_v52 = vrot.slane %v2459_v54, %v14220_v13  ;;  %v14442_v2 = vrot.slane %v2460_v29, %v14220_v13  ;;  %v14450_v56 = vrot.slane %v16832_v33, %v14220_v13 }
 0x25b   : > { %v1467_v42 = vrot.slane %v16828_v59, %v14220_v13  ;;  %v1594_v12 = vrot.slane %v1580_v20, %v13817_v26  ;;  %v16833_v54 = vcombine.high %v14091_v10, %v14083_v28  ;;  %v16834_v28 = vcombine.low %v13944_v11, %v13936_v61 }
 0x25c   : > { %v1578_v49 = vrot.slane %v1564_v0, %v13817_v26  ;;  %v1699_v24 = vcombine.low %v14179_v6, %v14277_v35 }
 0x25d   : > { %3891 = vxpose.xlu1.b32.start.end [1/1] (short) (narrow) %v1390_v53, 8  ;;  %3859 = vxpose.xlu0.b32.start.end [1/1] (short) (narrow) %v1389_v32, 8  ;;  %v1524_v45 = vcombine.high %v1467_v42, %v1499_v40  ;;  %v1523_v18 = vcombine.low %v1467_v42, %v1499_v40  ;;  %v1508_v53 = vcombine.high %v1442_v48, %v1458_v37 }
 0x25e   : > { %v1571_v32 = vrot.slane %v1563_v25, %v13817_v26  ;;  %v1490_v37 = vrot.slane %v16831_v62, %v14220_v13  ;;  %v14456_v48 = vrot.slane %v16833_v54, %v14220_v13  ;;  %v1603_v10 = vrot.slane %v16834_v28, %v14220_v13 }
 0x25f   : > { %v1715_v42 = vcombine.low %v14177_v41, %v14269_v14  ;;  %v1643_v16 = vcombine.low %v1578_v49, %v1594_v12  ;;  %v1644_v43 = vcombine.high %v1578_v49, %v1594_v12  ;;  %v16839_v12 = vld [vmem:[#allocation83_spill] sm:$0xff]  ;;  %v16840_v49 = vld [vmem:[#allocation81_spill] sm:$0xff] }
 0x260   : > { %v1628_v21 = vcombine.high %v1571_v32, %v1587_v17  ;;  %v16841_v33 = vcombine.low %v16839_v12, %v16840_v49 }
 0x261   : > { %3955 = vxpose.xlu1.b32.start.end [1/1] (short) (narrow) %v1392_v47, 8  ;;  %3923 = vxpose.xlu0.b32.start.end [1/1] (short) (narrow) %v1391_v23, 8  ;;  %v1627_v47 = vcombine.low %v1571_v32, %v1587_v17  ;;  %v1522_v23 = vrot.slane %v1508_v53, %v14220_v13  ;;  %v1723_v53 = vrot.slane %v1715_v42, %v13817_v26 }
 0x262   : > { %v1707_v17 = vrot.slane %v1699_v24, %v13817_v26  ;;  %v1739_v54 = vrot.slane %v16841_v33, %v14220_v13 }
 0x263   : > { %v1530_v7 = vcombine.high %v1490_v37, %v1522_v23  ;;  %v1529_v29 = vcombine.low %v1490_v37, %v1522_v23  ;;  %v1635_v1 = vrot.slane %v1627_v47, %v14220_v13  ;;  %v1658_v47 = vrot.slane %v1644_v43, %v14220_v13 }
 0x264   : > { %v1763_v20 = vcombine.low %v1707_v17, %v1723_v53 }
 0x265   : > { %4019 = vxpose.xlu1.b32.start.end [1/1] (short) (narrow) %v1394_v31, 8  ;;  %3987 = vxpose.xlu0.b32.start.end [1/1] (short) (narrow) %v1393_v4, 8  ;;  %v1660_v25 = vcombine.high %v1603_v10, %v1635_v1  ;;  %v1659_v8 = vcombine.low %v1603_v10, %v1635_v1  ;;  %v16896_v4 = vld [vmem:[#allocation113_spill] sm:$0xff] }
 0x269   : > { %4083 = vxpose.xlu1.b32.start.end [1/1] (short) (narrow) %v1524_v45, 8  ;;  %4051 = vxpose.xlu0.b32.start.end [1/1] (short) (narrow) %v1523_v18, 8  ;;  %v1642_v45 = vrot.slane %v1628_v21, %v14220_v13  ;;  %v16835_v18 = vcombine.high %v13944_v11, %v13936_v61  ;;  %v1716_v11 = vcombine.high %v14177_v41, %v14269_v14  ;;  %v16842_v21 = vld [vmem:[#allocation115_spill] sm:$0xff] }
 0x26a   : > { %v1700_v61 = vcombine.high %v14179_v6, %v14277_v35  ;;  %v1764_v14 = vcombine.high %v1707_v17, %v1723_v53  ;;  %v1771_v6 = vrot.slane %v1763_v20, %v14220_v13  ;;  %v16845_v53 = vld [vmem:[#allocation84_spill] sm:$0xff]  ;;  %v16846_v17 = vld [vmem:[#allocation82_spill] sm:$0xff] }
 0x26b   : > { %v1610_v39 = vrot.slane %v16835_v18, %v14220_v13  ;;  %v1730_v62 = vrot.slane %v1716_v11, %v13817_v26  ;;  %v16848_v20 = vcombine.high %v16845_v53, %v16846_v17 }
 0x26c   : > { %v1714_v41 = vrot.slane %v1700_v61, %v13817_v26  ;;  %v1796_v28 = vcombine.high %v1739_v54, %v1771_v6  ;;  %v1778_v10 = vrot.slane %v1764_v14, %v14220_v13  ;;  %v1795_v42 = vcombine.low %v1739_v54, %v1771_v6  ;;  %v16854_v14 = vld [vmem:[#allocation86_spill] sm:$0xff] }
 0x26d   : > { %4147 = vxpose.xlu1.b32.start.end [1/1] (short) (narrow) %v1526_v44, 8  ;;  %4115 = vxpose.xlu0.b32.start.end [1/1] (short) (narrow) %v1525_v15, 8  ;;  %v1662_v32 = vcombine.high %v1610_v39, %v1642_v45  ;;  %v1651_v44 = vrot.slane %v1643_v16, %v14220_v13  ;;  %v1661_v60 = vcombine.low %v1610_v39, %v1642_v45  ;;  %v16836_v15 = vld [vmem:[#allocation80_spill] sm:$0xff] }
 0x26e   : > { %v16837_v19 = vcombine.low %v13947_v22, %v16836_v15  ;;  %v16838_v23 = vcombine.high %v13947_v22, %v16836_v15  ;;  %v1851_v22 = vcombine.low %v16842_v21, %v14282_v57  ;;  %v16844_v16 = vcombine.high %v16839_v12, %v16840_v49  ;;  %v14546_v49 = vpop.trf.xlu1 }
 0x270   : > { %v1619_v34 = vrot.slane %v16837_v19, %v14220_v13  ;;  %v1746_v24 = vrot.slane %v16844_v16, %v14220_v13  ;;  %v1859_v45 = vrot.slane %v1851_v22, %v13817_v26 }
 0x271   : > { %4211 = vxpose.xlu1.b32.start.end [1/1] (short) (narrow) %v1528_v63, 8  ;;  %4179 = vxpose.xlu0.b32.start.end [1/1] (short) (narrow) %v1527_v9, 8  ;;  %v1626_v9 = vrot.slane %v16838_v23, %v14220_v13 }
 0x272   : > { %v1664_v0 = vcombine.high %v1619_v34, %v1651_v44  ;;  %v1663_v63 = vcombine.low %v1619_v34, %v1651_v44  ;;  %v1798_v18 = vcombine.high %v1746_v24, %v1778_v10  ;;  %v1797_v43 = vcombine.low %v1746_v24, %v1778_v10 }
 0x273   : > { %v1666_v37 = vcombine.high %v1626_v9, %v1658_v47  ;;  %v1665_v35 = vcombine.low %v1626_v9, %v1658_v47 }
 0x275   : > { %4275 = vxpose.xlu1.b32.start.end [1/1] (short) (narrow) %v1530_v7, 8  ;;  %4243 = vxpose.xlu0.b32.start.end [1/1] (short) (narrow) %v1529_v29, 8  ;;  %v1779_v7 = vcombine.low %v1714_v41, %v1730_v62  ;;  %v16843_v29 = vld [vmem:[#allocation116_spill] sm:$0xff] }
 0x276   : > { %v1835_v1 = vcombine.low %v16843_v29, %v14288_v5  ;;  %v1836_v15 = vcombine.high %v16843_v29, %v14288_v5 }
 0x277   : > { %v1787_v39 = vrot.slane %v1779_v7, %v14220_v13 }
 0x279   : > { %4339 = vxpose.xlu1.b32.start.end [1/1] (short) (narrow) %v1660_v25, 8  ;;  %4307 = vxpose.xlu0.b32.start.end [1/1] (short) (narrow) %v1659_v8, 8  ;;  %v1780_v25 = vcombine.high %v1714_v41, %v1730_v62  ;;  %v1843_v8 = vrot.slane %v1835_v1, %v13817_v26  ;;  %v16853_v41 = vld [vmem:[#allocation88_spill] sm:$0xff]  ;;  %v16857_v1 = vld [vmem:[#allocation91_spill] sm:$0xff] }
 0x27a   : > { %v16856_v7 = vcombine.high %v16853_v41, %v16854_v14 }
 0x27b   : > { %v1899_v19 = vcombine.low %v1843_v8, %v1859_v45  ;;  %v1794_v11 = vrot.slane %v1780_v25, %v14220_v13  ;;  %v1900_v12 = vcombine.high %v1843_v8, %v1859_v45  ;;  %v16861_v25 = vld [vmem:[#allocation92_spill] sm:$0xff]  ;;  %v16862_v45 = vld [vmem:[#allocation90_spill] sm:$0xff] }
 0x27c   : > { %v14555_v29 = vrot.slane %v16856_v7, %v14220_v13  ;;  %v16863_v8 = vcombine.low %v16861_v25, %v16862_v45 }
 0x27d   : > { %4403 = vxpose.xlu1.b32.start.end [1/1] (short) (narrow) %v1662_v32, 8  ;;  %4371 = vxpose.xlu0.b32.start.end [1/1] (short) (narrow) %v1661_v60, 8  ;;  %v16847_v32 = vcombine.low %v16845_v53, %v16846_v17  ;;  %v1852_v60 = vcombine.high %v16842_v21, %v14282_v57  ;;  %v16849_v57 = vld [vmem:[#allocation87_spill] sm:$0xff]  ;;  %v1907_v54 = vrot.slane %v1899_v19, %v14220_v13  ;;  %v14549_v21 = vpop.trf.xlu0  ;;  %v16866_v17 = vld [vmem:[#allocation93_spill] sm:$0xff] }
 0x27e   : > { %v16865_v53 = vld [vmem:[#allocation95_spill] sm:$0xff]  ;;  %v16869_v19 = vld [vmem:[#allocation117_spill] sm:$0xff] }
 0x27f   : > { %v1755_v44 = vrot.slane %v16847_v32, %v14220_v13  ;;  %v14529_v47 = vrot.slane %v1852_v60, %v13817_v26  ;;  %v16867_v32 = vcombine.low %v16865_v53, %v16866_v17  ;;  %v16868_v60 = vcombine.high %v16865_v53, %v16866_v17 }
 0x281   : > { %4467 = vxpose.xlu1.b32.start.end [1/1] (short) (narrow) %v1664_v0, 8  ;;  %4435 = vxpose.xlu0.b32.start.end [1/1] (short) (narrow) %v1663_v63, 8  ;;  %v1800_v34 = vcombine.high %v1755_v44, %v1787_v39  ;;  %v1799_v61 = vcombine.low %v1755_v44, %v1787_v39  ;;  %v1762_v0 = vrot.slane %v16848_v20, %v14220_v13  ;;  %v16850_v63 = vld [vmem:[#allocation85_spill] sm:$0xff] }
 0x282   : > { %v16851_v23 = vcombine.low %v16849_v57, %v16850_v63  ;;  %v16852_v9 = vcombine.high %v16849_v57, %v16850_v63  ;;  %v16864_v39 = vcombine.high %v16861_v25, %v16862_v45  ;;  %v14585_v44 = vrot.slane %v16867_v32, %v14220_v13  ;;  %v16880_v25 = vld [vmem:[#allocation112_spill] sm:$0xff] }
 0x283   : > { %v1802_v33 = vcombine.high %v1762_v0, %v1794_v11  ;;  %v1801_v22 = vcombine.low %v1762_v0, %v1794_v11  ;;  %v16870_v11 = vld [vmem:[#allocation96_spill] sm:$0xff] }
 0x284   : > { %v1875_v5 = vrot.slane %v16851_v23, %v14220_v13  ;;  %v1882_v62 = vrot.slane %v16852_v9, %v14220_v13  ;;  %v16874_v23 = vld [vmem:[#allocation99_spill] sm:$0xff]  ;;  %v16875_v9 = vld [vmem:[#allocation97_spill] sm:$0xff]  ;;  %v16881_v45 = vld [vmem:[#allocation76_spill] sm:$0xff] }
 0x285   : > { %4531 = vxpose.xlu1.b32.start.end [1/1] (short) (narrow) %v1666_v37, 8  ;;  %4499 = vxpose.xlu0.b32.start.end [1/1] (short) (narrow) %v1665_v35, 8  ;;  %v16855_v37 = vcombine.low %v16853_v41, %v16854_v14  ;;  %v1850_v35 = vrot.slane %v1836_v15, %v13817_v26  ;;  %v14591_v15 = vrot.slane %v16868_v60, %v14220_v13 }
 0x286   : > { %v16876_v41 = vcombine.low %v16874_v23, %v16875_v9  ;;  %v1932_v7 = vcombine.high %v1875_v5, %v1907_v54  ;;  %v16882_v53 = vcombine.high %v16874_v23, %v16875_v9  ;;  %v2756_v60 = vcombine.high %v16881_v45, %v16880_v25  ;;  %v14646_v9 = vpop.trf.xlu0 }
 0x287   : > { %v14543_v6 = vrot.slane %v16855_v37, %v14220_v13  ;;  %v1915_v37 = vcombine.low %v1850_v35, %v14529_v47  ;;  %v1916_v23 = vcombine.high %v1850_v35, %v14529_v47 }
 0x288   : > { %v14611_v14 = vrot.slane %v16876_v41, %v14220_v13  ;;  %v14625_v17 = vrot.slane %v16882_v53, %v14220_v13  ;;  %v16887_v41 = vld [vmem:[#allocation102_spill] sm:$0xff]  ;;  %v16891_v53 = vld [vmem:[#allocation105_spill] sm:$0xff] }
 0x289   : > { %4595 = vxpose.xlu1.b32.start.end [1/1] (short) (narrow) %v1796_v28, 8  ;;  %4563 = vxpose.xlu0.b32.start.end [1/1] (short) (narrow) %v1795_v42, 8  ;;  %v16858_v28 = vld [vmem:[#allocation89_spill] sm:$0xff] }
 0x28a   : > { %v16859_v10 = vcombine.low %v16857_v1, %v16858_v28  ;;  %v16860_v16 = vcombine.high %v16857_v1, %v16858_v28  ;;  %v1914_v1 = vrot.slane %v1900_v12, %v14220_v13  ;;  %v16878_v28 = vld [vmem:[#allocation109_spill] sm:$0xff]  ;;  %v14631_v12 = vpop.trf.xlu1 }
 0x28c   : > { %v14561_v42 = vrot.slane %v16859_v10, %v14220_v13  ;;  %v14567_v24 = vrot.slane %v16860_v16, %v14220_v13  ;;  %v16879_v10 = vld [vmem:[#allocation75_spill] sm:$0xff] }
 0x28d   : > { %4659 = vxpose.xlu1.b32.start.end [1/1] (short) (narrow) %v1798_v18, 8  ;;  %4627 = vxpose.xlu0.b32.start.end [1/1] (short) (narrow) %v1797_v43, 8  ;;  %v14573_v18 = vrot.slane %v16863_v8, %v14220_v13  ;;  %v14579_v43 = vrot.slane %v16864_v39, %v14220_v13  ;;  %v2771_v16 = vcombine.low %v16879_v10, %v16878_v28 }
 0x28e   : > { %v2755_v8 = vcombine.low %v16881_v45, %v16880_v25  ;;  %v1931_v39 = vcombine.low %v1875_v5, %v1907_v54  ;;  %v2772_v32 = vcombine.high %v16879_v10, %v16878_v28 }
 0x290   : > { %v2763_v59 = vrot.slane %v2755_v8, %v13817_v26 }
 0x291   : > { %4723 = vxpose.xlu1.b32.start.end [1/1] (short) (narrow) %v1800_v34, 8  ;;  %4691 = vxpose.xlu0.b32.start.end [1/1] (short) (narrow) %v1799_v61, 8  ;;  %v1987_v34 = vcombine.low %v16869_v19, %v14293_v38  ;;  %v16871_v61 = vld [vmem:[#allocation94_spill] sm:$0xff] }
 0x292   : > { %v16872_v20 = vcombine.low %v16870_v11, %v16871_v61  ;;  %v16873_v57 = vcombine.high %v16870_v11, %v16871_v61  ;;  %v16883_v11 = vld [vmem:[#allocation100_spill] sm:$0xff]  ;;  %v16884_v61 = vld [vmem:[#allocation98_spill] sm:$0xff] }
 0x293   : > { %v16886_v54 = vcombine.high %v16883_v11, %v16884_v61  ;;  %v1995_v35 = vrot.slane %v1987_v34, %v13817_v26  ;;  %v2770_v34 = vrot.slane %v2756_v60, %v13817_v26 }
 0x294   : > { %v14599_v0 = vrot.slane %v16872_v20, %v14220_v13  ;;  %v14605_v63 = vrot.slane %v16873_v57, %v14220_v13  ;;  %v16885_v20 = vcombine.low %v16883_v11, %v16884_v61  ;;  %v16892_v11 = vld [vmem:[#allocation103_spill] sm:$0xff] }
 0x295   : > { %4787 = vxpose.xlu1.b32.start.end [1/1] (short) (narrow) %v1802_v33, 8  ;;  %4755 = vxpose.xlu0.b32.start.end [1/1] (short) (narrow) %v1801_v22, 8  ;;  %v16877_v33 = vld [vmem:[#allocation118_spill] sm:$0xff]  ;;  %v14643_v57 = vrot.slane %v16886_v54, %v14220_v13  ;;  %v16893_v61 = vcombine.low %v16891_v53, %v16892_v11  ;;  %v1923_v54 = vrot.slane %v1915_v37, %v14220_v13 }
 0x296   : > { %v1971_v22 = vcombine.low %v16877_v33, %v14301_v50  ;;  %v14637_v5 = vrot.slane %v16885_v20, %v14220_v13  ;;  %v1934_v20 = vcombine.high %v1882_v62, %v1914_v1  ;;  %v16898_v37 = vld [vmem:[#allocation106_spill] sm:$0xff] }
 0x297   : > { %v14664_v47 = vrot.slane %v16893_v61, %v14220_v13  ;;  %v2786_v61 = vrot.slane %v2772_v32, %v13817_v26  ;;  %v1972_v32 = vcombine.high %v16877_v33, %v14301_v50 }
 0x299   : > { %4851 = vxpose.xlu1.b32.start.end [1/1] (short) (narrow) %v1932_v7, 8  ;;  %4819 = vxpose.xlu0.b32.start.end [1/1] (short) (narrow) %v1931_v39, 8  ;;  %v16888_v7 = vld [vmem:[#allocation101_spill] sm:$0xff]  ;;  %v1979_v39 = vrot.slane %v1971_v22, %v13817_v26 }
 0x29a   : > { %v16889_v28 = vcombine.low %v16887_v41, %v16888_v7  ;;  %v16890_v25 = vcombine.high %v16887_v41, %v16888_v7  ;;  %v1933_v41 = vcombine.low %v1882_v62, %v1914_v1  ;;  %v16894_v7 = vcombine.high %v16891_v53, %v16892_v11  ;;  %v16897_v22 = vld [vmem:[#allocation77_spill] sm:$0xff] }
 0x29b   : > { %v2907_v40 = vcombine.low %v16897_v22, %v16896_v4  ;;  %v2908_v62 = vcombine.high %v16897_v22, %v16896_v4  ;;  %v1988_v1 = vcombine.high %v16869_v19, %v14293_v38  ;;  %v2035_v11 = vcombine.low %v1979_v39, %v1995_v35  ;;  %v16905_v38 = vld [vmem:[#allocation107_spill] sm:$0xff] }
 0x29c   : > { %v14652_v10 = vrot.slane %v16889_v28, %v14220_v13  ;;  %v14658_v45 = vrot.slane %v16890_v25, %v14220_v13  ;;  %v2779_v28 = vrot.slane %v2771_v16, %v13817_v26  ;;  %v14675_v25 = vrot.slane %v16894_v7, %v14220_v13  ;;  %v16899_v16 = vld [vmem:[#allocation104_spill] sm:$0xff]  ;;  %v16904_v7 = vld [vmem:[#allocation110_spill] sm:$0xff] }
 0x29d   : > { %4915 = vxpose.xlu1.b32.start.end [1/1] (short) (narrow) %v1934_v20, 8  ;;  %v16900_v31 = vcombine.low %v16898_v37, %v16899_v16  ;;  %4883 = vxpose.xlu0.b32.start.end [1/1] (short) (narrow) %v1933_v41, 8  ;;  %v16902_v60 = vcombine.high %v16898_v37, %v16899_v16  ;;  %v14699_v20 = vpop.trf.xlu1  ;;  %v1930_v4 = vrot.slane %v1916_v23, %v14220_v13  ;;  %v14709_v41 = vpop.trf.xlu0 }
 0x29e   : > { %16895 = vst [vmem:[#allocation80_spill] sm:$0xff] %v14675_v25  ;;  %v16906_v19 = vcombine.low %v16904_v7, %v16905_v38  ;;  %v2819_v50 = vcombine.low %v2763_v59, %v2779_v28  ;;  %v2820_v33 = vcombine.high %v2763_v59, %v2779_v28  ;;  %v1935_v37 = vcombine.low %v14543_v6, %v1923_v54  ;;  %v16911_v25 = vld [vmem:[#allocation114_spill] sm:$0xff]  ;;  %v16913_v28 = vld [vmem:[#allocation119_spill] sm:$0xff] }
 0x29f   : > { %v14685_v8 = vrot.slane %v16900_v31, %v14220_v13  ;;  %v14697_v53 = vrot.slane %v16902_v60, %v14220_v13  ;;  %v1936_v31 = vcombine.high %v14543_v6, %v1923_v54  ;;  %v16908_v16 = vcombine.high %v16904_v7, %v16905_v38 }
 0x2a0   : > { %v14707_v22 = vrot.slane %v16906_v19, %v14220_v13  ;;  %v2836_v23 = vcombine.high %v2770_v34, %v2786_v61  ;;  %v16912_v19 = vld [vmem:[#allocation78_spill] sm:$0xff]  ;;  %v14726_v6 = vrot.slane %v1988_v1, %v13817_v26  ;;  %v14729_v54 = vrot.slane %v1972_v32, %v13817_v26 }
 0x2a1   : > { %16901 = vst [vmem:[#allocation83_spill] sm:$0xff] %v14685_v8  ;;  %16903 = vst [vmem:[#allocation81_spill] sm:$0xff] %v14697_v53  ;;  %v14716_v60 = vrot.slane %v16908_v16, %v14220_v13  ;;  %v2835_v53 = vcombine.low %v2770_v34, %v2786_v61  ;;  %v14719_v8 = vrot.slane %v2907_v40, %v13817_v26  ;;  %4979 = vxpose.xlu1.b32.start.end [1/1] (short) (narrow) %v1936_v31, 8  ;;  %v16914_v40 = vld [vmem:[#allocation120_spill] sm:$0xff] }
 0x2a2   : > { %16907 = vst [vmem:[#allocation115_spill] sm:$0xff] %v14707_v22  ;;  %v2891_v22 = vcombine.low %v16912_v19, %v16911_v25  ;;  %v2892_v59 = vcombine.high %v16912_v19, %v16911_v25  ;;  %v2123_v7 = vcombine.low %v16913_v28, %v14306_v51  ;;  %4947 = vxpose.xlu0.b32.start.end [1/1] (short) (narrow) %v1935_v37, 8  ;;  %v14745_v37 = vpop.trf.xlu1 }
 0x2a3   : > { %16909 = vst [vmem:[#allocation116_spill] sm:$0xff] %v14716_v60  ;;  %16910 = vst [vmem:[#allocation84_spill] sm:$0xff] %v14719_v8  ;;  %v2036_v61 = vcombine.high %v1979_v39, %v1995_v35  ;;  %v2107_v34 = vcombine.low %v16914_v40, %v14313_v27  ;;  %v1938_v38 = vcombine.high %v14555_v29, %v1930_v4  ;;  %v16916_v35 = vld [vmem:[#allocation111_spill] sm:$0xff]  ;;  %v16917_v39 = vld [vmem:[#allocation108_spill] sm:$0xff] }
 0x2a4   : > { %v2043_v31 = vrot.slane %v2035_v11, %v14220_v13  ;;  %v14738_v25 = vrot.slane %v2908_v62, %v13817_v26  ;;  %v2124_v1 = vcombine.high %v16913_v28, %v14306_v51  ;;  %v2108_v32 = vcombine.high %v16914_v40, %v14313_v27  ;;  %v14773_v40 = vpop.trf.xlu0 }
 0x2a5   : > { %v1937_v16 = vcombine.low %v14555_v29, %v1930_v4  ;;  %5043 = vxpose.xlu1.b32.start.end [1/1] (short) (narrow) %v1938_v38, 8  ;;  %v16918_v19 = vcombine.low %v16916_v35, %v16917_v39  ;;  %v16920_v62 = vcombine.high %v16916_v35, %v16917_v39  ;;  %v14760_v51 = vrot.slane %v2819_v50, %v14220_v13 }
 0x2a6   : > { %16915 = vst [vmem:[#allocation82_spill] sm:$0xff] %v14738_v25  ;;  %v14763_v27 = vrot.slane %v2820_v33, %v14220_v13  ;;  %v14766_v29 = vrot.slane %v2891_v22, %v13817_v26  ;;  %v14769_v4 = vrot.slane %v2892_v59, %v13817_v26  ;;  %v2051_v28 = vcombine.low %v14729_v54, %v14726_v6 }
 0x2a7   : > { %v14751_v60 = vrot.slane %v16918_v19, %v14220_v13  ;;  %v14757_v11 = vrot.slane %v16920_v62, %v14220_v13  ;;  %16922 = vst [vmem:[#allocation88_spill] sm:$0xff] %v14760_v51  ;;  %5011 = vxpose.xlu0.b32.start.end [1/1] (short) (narrow) %v1937_v16, 8  ;;  %v14776_v38 = vrot.slane %v2835_v53, %v14220_v13  ;;  %v16929_v62 = vld [vmem:[#allocation122_spill] sm:$0xff] }
 0x2a8   : > { %16923 = vst [vmem:[#allocation86_spill] sm:$0xff] %v14763_v27  ;;  %16924 = vst [vmem:[#allocation91_spill] sm:$0xff] %v14766_v29  ;;  %v14779_v50 = vrot.slane %v2123_v7, %v13817_v26  ;;  %v14782_v33 = vrot.slane %v2107_v34, %v13817_v26  ;;  %v2068_v22 = vcombine.high %v14561_v42, %v2043_v31  ;;  %v16928_v7 = vld [vmem:[#allocation121_spill] sm:$0xff] }
 0x2a9   : > { %16919 = vst [vmem:[#allocation87_spill] sm:$0xff] %v14751_v60  ;;  %16921 = vst [vmem:[#allocation85_spill] sm:$0xff] %v14757_v11  ;;  %v2050_v59 = vrot.slane %v2036_v61, %v14220_v13  ;;  %v14787_v35 = vrot.slane %v2124_v1, %v13817_v26  ;;  %v14790_v39 = vrot.slane %v2108_v32, %v13817_v26  ;;  %v3043_v32 = vpop.trf.xlu0 }
 0x2aa   : > { %16925 = vst [vmem:[#allocation89_spill] sm:$0xff] %v14769_v4  ;;  %16926 = vst [vmem:[#allocation92_spill] sm:$0xff] %v14776_v38  ;;  %v2067_v16 = vcombine.low %v14561_v42, %v2043_v31  ;;  %v14794_v53 = vrot.slane %v2836_v23, %v14220_v13  ;;  %v2259_v19 = vcombine.low %v16928_v7, %v14317_v55  ;;  %v3075_v38 = vpop.trf.xlu1  ;;  %5107 = vxpose.xlu1.b32.start.end [1/1] (short) (narrow) %v2068_v22, 8 }
 0x2ab   : > { %v2260_v34 = vcombine.high %v16928_v7, %v14317_v55  ;;  %v2243_v61 = vcombine.low %v16929_v62, %v14325_v30  ;;  %v2244_v1 = vcombine.high %v16929_v62, %v14325_v30  ;;  %v2052_v7 = vcombine.high %v14729_v54, %v14726_v6 }
 0x2ac   : > { %16927 = vst [vmem:[#allocation90_spill] sm:$0xff] %v14794_v53  ;;  %5075 = vxpose.xlu0.b32.start.end [1/1] (short) (narrow) %v2067_v16, 8  ;;  %v2171_v30 = vcombine.low %v14782_v33, %v14779_v50  ;;  %v2070_v22 = vcombine.high %v14567_v24, %v2050_v59  ;;  %v2059_v62 = vrot.slane %v2051_v28, %v14220_v13 }
 0x2ad   : > { %v2172_v23 = vcombine.high %v14782_v33, %v14779_v50  ;;  %v2069_v55 = vcombine.low %v14567_v24, %v2050_v59  ;;  %v14826_v6 = vrot.slane %v2259_v19, %v13817_v26  ;;  %v14829_v54 = vrot.slane %v2260_v34, %v13817_v26  ;;  %v3107_v16 = vpop.trf.xlu0 }
 0x2ae   : > { %v14832_v42 = vrot.slane %v2243_v61, %v13817_v26  ;;  %v14835_v28 = vrot.slane %v2244_v1, %v13817_v26  ;;  %v3139_v50 = vpop.trf.xlu1  ;;  %5171 = vxpose.xlu1.b32.start.end [1/1] (short) (narrow) %v2070_v22, 8  ;;  %v2395_v33 = vcombine.low %v14197_v58, %v14330_v46  ;;  %v2379_v24 = vcombine.low %v14199_v3, %v14338_v36  ;;  %v16930_v1 = vld [vmem:[#allocation123_spill] sm:$0xff]  ;;  %v16931_v36 = vld [vmem:[#allocation124_spill] sm:$0xff] }
 0x2af   : > { %v7139_v59 = vcombine.low %v3075_v38, %v3139_v50  ;;  %v7140_v19 = vcombine.high %v3075_v38, %v3139_v50  ;;  %v7123_v34 = vcombine.low %v3043_v32, %v3107_v16  ;;  %v7124_v31 = vcombine.high %v3043_v32, %v3107_v16 }
 0x2b0   : > { %5139 = vxpose.xlu0.b32.start.end [1/1] (short) (narrow) %v2069_v55, 8  ;;  %v2072_v61 = vcombine.high %v14573_v18, %v2059_v62  ;;  %v2066_v25 = vrot.slane %v2052_v7, %v14220_v13  ;;  %v2531_v4 = vcombine.low %v16930_v1, %v14546_v49  ;;  %v2071_v3 = vcombine.low %v14573_v18, %v2059_v62 }
 0x2b1   : > { %v14846_v22 = vrot.slane %v7139_v59, %v13817_v26  ;;  %v14849_v58 = vrot.slane %v7140_v19, %v13817_v26  ;;  %v2532_v46 = vcombine.high %v16930_v1, %v14546_v49  ;;  %v2515_v38 = vcombine.low %v16931_v36, %v14549_v21  ;;  %v3171_v62 = vpop.trf.xlu0 }
 0x2b2   : > { %v14857_v55 = vrot.slane %v7123_v34, %v13817_v26  ;;  %v14860_v32 = vrot.slane %v7124_v31, %v13817_v26  ;;  %v3203_v7 = vpop.trf.xlu1  ;;  %5235 = vxpose.xlu1.b32.start.end [1/1] (short) (narrow) %v2072_v61, 8  ;;  %v2516_v49 = vcombine.high %v16931_v36, %v14549_v21  ;;  %v2179_v50 = vrot.slane %v2171_v30, %v14220_v13 }
 0x2b3   : > { %v2074_v34 = vcombine.high %v14579_v43, %v2066_v25  ;;  %v14881_v1 = vrot.slane %v2395_v33, %v13817_v26  ;;  %v2073_v30 = vcombine.low %v14579_v43, %v2066_v25  ;;  %v14888_v36 = vrot.slane %v2531_v4, %v13817_v26  ;;  %v16932_v33 = vld [vmem:[#allocation125_spill] sm:$0xff] }
 0x2b4   : > { %5203 = vxpose.xlu0.b32.start.end [1/1] (short) (narrow) %v2071_v3, 8  ;;  %v7188_v59 = vcombine.high %v14857_v55, %v14846_v22  ;;  %v7203_v31 = vcombine.low %v14860_v32, %v14849_v58  ;;  %v14885_v3 = vrot.slane %v2379_v24, %v13817_v26  ;;  %v14891_v18 = vrot.slane %v2532_v46, %v13817_v26 }
 0x2b5   : > { %v14894_v16 = vrot.slane %v2515_v38, %v13817_v26  ;;  %v14897_v21 = vrot.slane %v2516_v49, %v13817_v26  ;;  %v2667_v43 = vcombine.low %v16932_v33, %v14631_v12  ;;  %v3235_v19 = vpop.trf.xlu0  ;;  %v2204_v46 = vcombine.high %v14585_v44, %v2179_v50 }
 0x2b6   : > { %v3267_v61 = vpop.trf.xlu1  ;;  %5299 = vxpose.xlu1.b32.start.end [1/1] (short) (narrow) %v2074_v34, 8  ;;  %v7155_v4 = vcombine.low %v3171_v62, %v3235_v19  ;;  %v7156_v8 = vcombine.high %v3171_v62, %v3235_v19  ;;  %v2186_v29 = vrot.slane %v2172_v23, %v14220_v13  ;;  %v2668_v38 = vcombine.high %v16932_v33, %v14631_v12 }
 0x2b7   : > { %v7171_v25 = vcombine.low %v3203_v7, %v3267_v61  ;;  %v7172_v24 = vcombine.high %v3203_v7, %v3267_v61  ;;  %v2203_v53 = vcombine.low %v14585_v44, %v2179_v50  ;;  %v16933_v33 = vcombine.low %v14790_v39, %v14787_v35 }
 0x2b8   : > { %5267 = vxpose.xlu0.b32.start.end [1/1] (short) (narrow) %v2073_v30, 8  ;;  %v14915_v19 = vrot.slane %v7155_v4, %v13817_v26  ;;  %v7170_v23 = vrot.slane %v7156_v8, %v13817_v26  ;;  %v14936_v12 = vrot.slane %v2667_v43, %v13817_v26  ;;  %v2205_v50 = vcombine.low %v14591_v15, %v2186_v29 }
 0x2b9   : > { %v14906_v34 = vrot.slane %v7171_v25, %v13817_v26  ;;  %v7186_v49 = vrot.slane %v7172_v24, %v13817_v26  ;;  %v3299_v30 = vpop.trf.xlu0  ;;  %v2195_v25 = vrot.slane %v16933_v33, %v14220_v13  ;;  %v16934_v33 = vld [vmem:[#allocation126_spill] sm:$0xff]  ;;  %v14958_v27 = vrot.slane %v7188_v59, %v14220_v13 }
 0x2ba   : > { %v14918_v61 = vpop.trf.xlu1  ;;  %5363 = vxpose.xlu1.b32.start.end [1/1] (short) (narrow) %v2204_v46, 8  ;;  %v2206_v46 = vcombine.high %v14591_v15, %v2186_v29  ;;  %v2651_v62 = vcombine.low %v16934_v33, %v14646_v9  ;;  %v2652_v7 = vcombine.high %v16934_v33, %v14646_v9  ;;  %v16935_v15 = vcombine.high %v14790_v39, %v14787_v35  ;;  %v16940_v39 = vld [vmem:[#allocation128_spill] sm:$0xff] }
 0x2bb   : > { %v7220_v8 = vcombine.high %v14915_v19, %v14906_v34  ;;  %v7235_v24 = vcombine.low %v7170_v23, %v7186_v49  ;;  %v7236_v4 = vcombine.high %v7170_v23, %v7186_v49  ;;  %v14966_v33 = vrot.slane %v7203_v31, %v14220_v13 }
 0x2bc   : > { %5331 = vxpose.xlu0.b32.start.end [1/1] (short) (narrow) %v2203_v53, 8  ;;  %v14939_v53 = vrot.slane %v2668_v38, %v13817_v26  ;;  %v2202_v29 = vrot.slane %v16935_v15, %v14220_v13  ;;  %v16936_v59 = vcombine.high %v14860_v32, %v14849_v58  ;;  %v14998_v35 = vrot.slane %v2651_v62, %v13817_v26 }
 0x2bd   : > { %v14947_v23 = vrot.slane %v7220_v8, %v14220_v13  ;;  %v14950_v44 = vrot.slane %v7235_v24, %v14220_v13  ;;  %v3363_v38 = vpop.trf.xlu0  ;;  %v14961_v9 = vrot.slane %v7236_v4, %v14220_v13  ;;  %v2207_v24 = vcombine.low %v14599_v0, %v2195_v25 }
 0x2be   : > { %v3395_v49 = vpop.trf.xlu1  ;;  %5427 = vxpose.xlu1.b32.start.end [1/1] (short) (narrow) %v2206_v46, 8  ;;  %v7259_v8 = vcombine.low %v3299_v30, %v3363_v38  ;;  %v2208_v46 = vcombine.high %v14599_v0, %v2195_v25  ;;  %v14979_v4 = vrot.slane %v16936_v59, %v14220_v13  ;;  %v16937_v25 = vcombine.low %v14832_v42, %v14826_v6 }
 0x2bf   : > { %v7275_v43 = vcombine.low %v14918_v61, %v3395_v49  ;;  %v7276_v58 = vcombine.high %v14918_v61, %v3395_v49  ;;  %v7260_v32 = vcombine.high %v3299_v30, %v3363_v38  ;;  %v2210_v15 = vcombine.high %v14605_v63, %v2202_v29  ;;  %v16939_v38 = vld [vmem:[#allocation127_spill] sm:$0xff] }
 0x2c0   : > { %5395 = vxpose.xlu0.b32.start.end [1/1] (short) (narrow) %v2205_v50, 8  ;;  %v14982_v0 = vrot.slane %v7259_v8, %v13817_v26  ;;  %v16938_v61 = vcombine.high %v14832_v42, %v14826_v6  ;;  %v15008_v49 = vrot.slane %v2652_v7, %v13817_v26  ;;  %v7219_v62 = vcombine.low %v14915_v19, %v14906_v34 }
 0x2c1   : > { %v14969_v50 = vrot.slane %v7275_v43, %v13817_v26  ;;  %v2315_v43 = vrot.slane %v16937_v25, %v14220_v13  ;;  %v3427_v59 = vpop.trf.xlu0  ;;  %v7187_v6 = vcombine.low %v14857_v55, %v14846_v22  ;;  %v7290_v7 = vrot.slane %v7276_v58, %v13817_v26 }
 0x2c2   : > { %v3459_v31 = vpop.trf.xlu1  ;;  %5491 = vxpose.xlu1.b32.start.end [1/1] (short) (narrow) %v2208_v46, 8  ;;  %v2322_v30 = vrot.slane %v16938_v61, %v14220_v13  ;;  %v2209_v46 = vcombine.low %v14605_v63, %v2202_v29  ;;  %v7274_v63 = vrot.slane %v7260_v32, %v13817_v26  ;;  %v16941_v22 = vcombine.low %v14835_v28, %v14829_v54 }
 0x2c3   : > { %v7324_v25 = vcombine.high %v14982_v0, %v14969_v50  ;;  %v2340_v42 = vcombine.high %v14611_v14, %v2315_v43  ;;  %v7227_v58 = vrot.slane %v7219_v62, %v14220_v13  ;;  %v16942_v62 = vcombine.high %v14835_v28, %v14829_v54 }
 0x2c4   : > { %5459 = vxpose.xlu0.b32.start.end [1/1] (short) (narrow) %v2207_v24, 8  ;;  %v2339_v24 = vcombine.low %v14611_v14, %v2315_v43  ;;  %v2342_v51 = vcombine.high %v14625_v17, %v2322_v30  ;;  %v2331_v55 = vrot.slane %v16941_v22, %v14220_v13  ;;  %v2341_v14 = vcombine.low %v14625_v17, %v2322_v30 }
 0x2c5   : > { %v3491_v34 = vpop.trf.xlu0  ;;  %v7323_v43 = vcombine.low %v14982_v0, %v14969_v50 }
 0x2c6   : > { %v3523_v11 = vpop.trf.xlu1  ;;  %5555 = vxpose.xlu1.b32.start.end [1/1] (short) (narrow) %v2210_v15, 8  ;;  %v7291_v19 = vcombine.low %v3427_v59, %v3491_v34  ;;  %v7292_v8 = vcombine.high %v3427_v59, %v3491_v34  ;;  %v7339_v59 = vcombine.low %v7274_v63, %v7290_v7  ;;  %v2338_v34 = vrot.slane %v16942_v62, %v14220_v13 }
 0x2c7   : > { %v7307_v29 = vcombine.low %v3459_v31, %v3523_v11  ;;  %v7308_v61 = vcombine.high %v3459_v31, %v3523_v11  ;;  %v2344_v17 = vcombine.high %v14637_v5, %v2331_v55  ;;  %v2343_v30 = vcombine.low %v14637_v5, %v2331_v55 }
 0x2c8   : > { %5523 = vxpose.xlu0.b32.start.end [1/1] (short) (narrow) %v2209_v46, 8  ;;  %v7299_v11 = vrot.slane %v7291_v19, %v13817_v26  ;;  %v7306_v31 = vrot.slane %v7292_v8, %v13817_v26  ;;  %v7340_v46 = vcombine.high %v7274_v63, %v7290_v7  ;;  %v7338_v63 = vrot.slane %v7324_v25, %v14220_v13 }
 0x2c9   : > { %v7315_v15 = vrot.slane %v7307_v29, %v13817_v26  ;;  %v7322_v60 = vrot.slane %v7308_v61, %v13817_v26  ;;  %v3555_v29 = vpop.trf.xlu0  ;;  %v7195_v61 = vrot.slane %v7187_v6, %v14220_v13 }
 0x2ca   : > { %v3587_v32 = vpop.trf.xlu1  ;;  %5619 = vxpose.xlu1.b32.start.end [1/1] (short) (narrow) %v2340_v42, 8  ;;  %v7354_v5 = vrot.slane %v7340_v46, %v14220_v13 }
 0x2cb   : > { %v7356_v19 = vcombine.high %v7299_v11, %v7315_v15  ;;  %v7371_v8 = vcombine.low %v7306_v31, %v7322_v60  ;;  %v7372_v22 = vcombine.high %v7306_v31, %v7322_v60  ;;  %v7355_v42 = vcombine.low %v7299_v11, %v7315_v15 }
 0x2cc   : > { %5587 = vxpose.xlu0.b32.start.end [1/1] (short) (narrow) %v2339_v24, 8  ;;  %v7251_v50 = vcombine.low %v7195_v61, %v7227_v58  ;;  %v7252_v0 = vcombine.high %v7195_v61, %v7227_v58  ;;  %v7331_v24 = vrot.slane %v7323_v43, %v14220_v13  ;;  %v7347_v15 = vrot.slane %v7339_v59, %v14220_v13 }
 0x2cd   : > { %v7363_v6 = vrot.slane %v7355_v42, %v14220_v13  ;;  %v7370_v54 = vrot.slane %v7356_v19, %v14220_v13  ;;  %v3619_v60 = vpop.trf.xlu0  ;;  %v7379_v11 = vrot.slane %v7371_v8, %v14220_v13  ;;  %v7386_v31 = vrot.slane %v7372_v22, %v14220_v13 }
 0x2ce   : > { %v3651_v7 = vpop.trf.xlu1  ;;  %5683 = vxpose.xlu1.b32.start.end [1/1] (short) (narrow) %v2342_v51, 8  ;;  %v7395_v55 = vcombine.low %v3555_v29, %v3619_v60  ;;  %v7396_v19 = vcombine.high %v3555_v29, %v3619_v60 }
 0x2cf   : > { %v7411_v28 = vcombine.low %v3587_v32, %v3651_v7  ;;  %v7387_v58 = vcombine.low %v7331_v24, %v7363_v6  ;;  %v7388_v51 = vcombine.high %v7331_v24, %v7363_v6  ;;  %v7412_v43 = vcombine.high %v3587_v32, %v3651_v7 }
 0x2d0   : > { %5651 = vxpose.xlu0.b32.start.end [1/1] (short) (narrow) %v2341_v14, 8  ;;  %v7389_v25 = vcombine.low %v7338_v63, %v7370_v54  ;;  %v7390_v62 = vcombine.high %v7338_v63, %v7370_v54  ;;  %v15057_v14 = vrot.slane %v7395_v55, %v13817_v26  ;;  %v16943_v24 = vcombine.low %v14958_v27, %v14947_v23 }
 0x2d1   : > { %v15054_v61 = vrot.slane %v7411_v28, %v13817_v26  ;;  %v11947_v8 = vpack.c.bf16 %v7387_v58, %v7251_v50  ;;  %v11979_v42 = vpack.c.bf16 %v7388_v51, %v7252_v0  ;;  %v3683_v46 = vpop.trf.xlu0  ;;  %v16944_v32 = vcombine.high %v14958_v27, %v14947_v23 }
 0x2d2   : > { %v3715_v59 = vpop.trf.xlu1  ;;  %5747 = vxpose.xlu1.b32.start.end [1/1] (short) (narrow) %v2344_v17, 8  ;;  %v15062_v22 = vpack.c.bf16 %v7389_v25, %v16943_v24  ;;  %v7391_v29 = vcombine.low %v7347_v15, %v7379_v11  ;;  %v7392_v6 = vcombine.high %v7347_v15, %v7379_v11  ;;  %v2346_v17 = vcombine.high %v14643_v57, %v2338_v34 }
 0x2d3   : > { %v15067_v7 = vpack.c.bf16 %v7390_v62, %v16944_v32  ;;  %v7460_v63 = vcombine.high %v15057_v14, %v15054_v61  ;;  %11948 = vmatprep.subr.bf16.mxu0 %v11947_v8  ;;  %v16945_v50 = vcombine.low %v14885_v3, %v14881_v1  ;;  %11980 = vmatprep.subr.bf16.mxu1 %v11979_v42 }
 0x2d4   : > { %5715 = vxpose.xlu0.b32.start.end [1/1] (short) (narrow) %v2343_v30, 8  ;;  %v2345_v30 = vcombine.low %v14643_v57, %v2338_v34  ;;  %11950 = vmatpush3.bf16.msra.mxu0 %v11947_v8  ;;  %v16946_v27 = vcombine.low %v14966_v33, %v14950_v44  ;;  %v16947_v54 = vcombine.high %v14966_v33, %v14950_v44 }
 0x2d5   : > { %v2451_v0 = vrot.slane %v16945_v50, %v14220_v13  ;;  %v7393_v60 = vcombine.low %v7354_v5, %v7386_v31  ;;  %v7426_v57 = vrot.slane %v7412_v43, %v13817_v26  ;;  %v7410_v34 = vrot.slane %v7396_v19, %v13817_v26  ;;  %11982 = vmatpush3.bf16.msra.mxu1 %v11979_v42  ;;  %v3747_v25 = vpop.trf.xlu0 }
 0x2d6   : > { %v15080_v23 = vpack.c.bf16 %v7391_v29, %v16946_v27  ;;  %v15085_v28 = vpack.c.bf16 %v7392_v6, %v16947_v54  ;;  %v3779_v15 = vpop.trf.xlu1  ;;  %5811 = vxpose.xlu1.b32.start.end [1/1] (short) (narrow) %v2346_v17, 8  ;;  %v16948_v11 = vcombine.high %v14885_v3, %v14881_v1  ;;  %v16949_v44 = vcombine.low %v14979_v4, %v14961_v9 }
 0x2d7   : > { %v7443_v58 = vcombine.low %v3715_v59, %v3779_v15  ;;  %v7444_v51 = vcombine.high %v3715_v59, %v3779_v15  ;;  %v7394_v43 = vcombine.high %v7354_v5, %v7386_v31  ;;  %v2788_v62 = vcombine.high %v16940_v39, %v14709_v41 }
 0x2d8   : > { %v2458_v55 = vrot.slane %v16948_v11, %v14220_v13  ;;  %5779 = vxpose.xlu0.b32.start.end [1/1] (short) (narrow) %v2345_v30, 8  ;;  %v15096_v33 = vpack.c.bf16 %v7393_v60, %v16949_v44  ;;  %v7427_v19 = vcombine.low %v3683_v46, %v3747_v25  ;;  %v7428_v8 = vcombine.high %v3683_v46, %v3747_v25  ;;  %v16956_v44 = vld [vmem:[#allocation129_spill] sm:$0xff] }
 0x2d9   : > { %v2476_v42 = vcombine.high %v14652_v10, %v2451_v0  ;;  %v15102_v1 = vrot.slane %v7443_v58, %v13817_v26  ;;  %v7458_v3 = vrot.slane %v7444_v51, %v13817_v26  ;;  %v2475_v59 = vcombine.low %v14652_v10, %v2451_v0  ;;  %v3811_v17 = vpop.trf.xlu0 }
 0x2da   : > { %16950 = vst [vmem:[#allocation95_spill] sm:$0xff] %v15096_v33  ;;  %v16951_v24 = vcombine.high %v14979_v4, %v14961_v9  ;;  %v2715_v5 = vcombine.low %v14998_v35, %v14936_v12  ;;  %v15116_v46 = vrot.slane %v7427_v19, %v13817_v26  ;;  %v7442_v29 = vrot.slane %v7428_v8, %v13817_v26  ;;  %v3843_v6 = vpop.trf.xlu1  ;;  %v16963_v9 = vld [vmem:[#allocation80_spill] sm:$0xff] }
 0x2db   : > { %5875 = vxpose.xlu1.b32.start.end [1/1] (short) (narrow) %v2476_v42, 8  ;;  %v7475_v4 = vcombine.low %v7410_v34, %v7426_v57  ;;  %v2478_v30 = vcombine.high %v14658_v45, %v2458_v55  ;;  %v7476_v50 = vcombine.high %v7410_v34, %v7426_v57  ;;  %v16953_v60 = vcombine.low %v16939_v38, %v14699_v20 }
 0x2dc   : > { %v15109_v32 = vpack.c.bf16 %v7394_v43, %v16951_v24  ;;  %5843 = vxpose.xlu0.b32.start.end [1/1] (short) (narrow) %v2475_v59, 8  ;;  %v7492_v0 = vcombine.high %v15116_v46, %v15102_v1  ;;  %v7507_v27 = vcombine.low %v7442_v29, %v7458_v3  ;;  %v7508_v54 = vcombine.high %v7442_v29, %v7458_v3 }
 0x2dd   : > { %v15130_v15 = vrot.slane %v16953_v60, %v13817_v26  ;;  %v16954_v11 = vcombine.high %v16939_v38, %v14699_v20  ;;  %v16955_v57 = vcombine.low %v16940_v39, %v14709_v41  ;;  %v2477_v51 = vcombine.low %v14658_v45, %v2458_v55  ;;  %v3875_v41 = vpop.trf.xlu0 }
 0x2de   : > { %16952 = vst [vmem:[#allocation93_spill] sm:$0xff] %v15109_v32  ;;  %v15146_v25 = vrot.slane %v2788_v62, %v13817_v26  ;;  %v2939_v43 = vcombine.low %v16956_v44, %v14745_v37  ;;  %v3907_v19 = vpop.trf.xlu1  ;;  %v15151_v20 = vrot.slane %v7492_v0, %v14220_v13  ;;  %v15154_v38 = vrot.slane %v7507_v27, %v14220_v13 }
 0x2df   : > { %v15136_v58 = vrot.slane %v16954_v11, %v13817_v26  ;;  %v15142_v34 = vrot.slane %v16955_v57, %v13817_v26  ;;  %5939 = vxpose.xlu1.b32.start.end [1/1] (short) (narrow) %v2478_v30, 8  ;;  %v7547_v8 = vcombine.low %v3843_v6, %v3907_v19  ;;  %v16957_v45 = vcombine.low %v14894_v16, %v14888_v36 }
 0x2e0   : > { %5907 = vxpose.xlu0.b32.start.end [1/1] (short) (narrow) %v2477_v51, 8  ;;  %v15161_v55 = vrot.slane %v7460_v63, %v14220_v13  ;;  %v15164_v62 = vrot.slane %v7508_v54, %v14220_v13  ;;  %v7531_v42 = vcombine.low %v3811_v17, %v3875_v41  ;;  %v16958_v3 = vcombine.high %v14894_v16, %v14888_v36 }
 0x2e1   : > { %v2587_v39 = vrot.slane %v16957_v45, %v14220_v13  ;;  %v15173_v24 = vrot.slane %v7475_v4, %v14220_v13  ;;  %v15176_v29 = vrot.slane %v7476_v50, %v14220_v13  ;;  %v7548_v30 = vcombine.high %v3843_v6, %v3907_v19  ;;  %v3939_v57 = vpop.trf.xlu0 }
 0x2e2   : > { %v15170_v59 = vrot.slane %v16958_v3, %v14220_v13  ;;  %v15179_v63 = vrot.slane %v7547_v8, %v13817_v26  ;;  %v7525_v0 = vcombine.low %v15161_v55, %v15151_v20  ;;  %v7526_v27 = vcombine.high %v15161_v55, %v15151_v20  ;;  %v3971_v36 = vpop.trf.xlu1 }
 0x2e3   : > { %v7532_v54 = vcombine.high %v3811_v17, %v3875_v41  ;;  %v7539_v16 = vrot.slane %v7531_v42, %v13817_v26  ;;  %v16959_v4 = vcombine.high %v14450_v56, %v14436_v52  ;;  %v7527_v6 = vcombine.low %v15173_v24, %v15154_v38 }
 0x2e4   : > { %v7528_v50 = vcombine.high %v15173_v24, %v15154_v38  ;;  %v16960_v17 = vcombine.low %v14450_v56, %v14436_v52  ;;  %v16961_v52 = vld [vmem:[#allocation130_spill] sm:$0xff]  ;;  %v7491_v3 = vcombine.low %v15116_v46, %v15102_v1  ;;  %v7562_v8 = vrot.slane %v7548_v30, %v13817_v26 }
 0x2e5   : > { %6003 = vxpose.xlu1.b32.start.end [1/1] (short) (narrow) %v16959_v4, 8  ;;  %v7596_v42 = vcombine.high %v7539_v16, %v15179_v63  ;;  %v2612_v4 = vcombine.high %v14664_v47, %v2587_v39  ;;  %v7546_v60 = vrot.slane %v7532_v54, %v13817_v26  ;;  %v16962_v45 = vcombine.high %v14456_v48, %v14442_v2  ;;  %v4003_v11 = vpop.trf.xlu0 }
 0x2e6   : > { %5971 = vxpose.xlu0.b32.start.end [1/1] (short) (narrow) %v16960_v17, 8  ;;  %v2611_v17 = vcombine.low %v14664_v47, %v2587_v39  ;;  %v4035_v41 = vpop.trf.xlu1  ;;  %v2614_v19 = vcombine.high %v16963_v9, %v15170_v59  ;;  %v16964_v1 = vcombine.low %v14897_v21, %v14891_v18  ;;  %v7459_v47 = vcombine.low %v15057_v14, %v15054_v61 }
 0x2e7   : > { %v7579_v39 = vcombine.low %v3971_v36, %v4035_v41  ;;  %v7580_v30 = vcombine.high %v3971_v36, %v4035_v41  ;;  %v16965_v54 = vcombine.low %v14456_v48, %v14442_v2  ;;  %v7563_v51 = vcombine.low %v3939_v57, %v4003_v11 }
 0x2e8   : > { %v2603_v46 = vrot.slane %v16964_v1, %v14220_v13  ;;  %v7564_v31 = vcombine.high %v3939_v57, %v4003_v11  ;;  %v2613_v1 = vcombine.low %v16963_v9, %v15170_v59  ;;  %v15245_v61 = vrot.slane %v2715_v5, %v14220_v13  ;;  %v16967_v5 = vld [vmem:[#allocation83_spill] sm:$0xff] }
 0x2e9   : > { %6067 = vxpose.xlu1.b32.start.end [1/1] (short) (narrow) %v16962_v45, 8  ;;  %v16966_v45 = vcombine.high %v14897_v21, %v14891_v18  ;;  %v7595_v2 = vcombine.low %v7539_v16, %v15179_v63  ;;  %v7587_v48 = vrot.slane %v7579_v39, %v13817_v26  ;;  %v7594_v14 = vrot.slane %v7580_v30, %v13817_v26  ;;  %v4067_v57 = vpop.trf.xlu0  ;;  %v16968_v39 = vld [vmem:[#allocation81_spill] sm:$0xff] }
 0x2ea   : > { %6035 = vxpose.xlu0.b32.start.end [1/1] (short) (narrow) %v16965_v54, 8  ;;  %v7499_v18 = vrot.slane %v7491_v3, %v14220_v13  ;;  %v7611_v21 = vcombine.low %v7546_v60, %v7562_v8  ;;  %v7612_v36 = vcombine.high %v7546_v60, %v7562_v8  ;;  %v7571_v11 = vrot.slane %v7563_v51, %v13817_v26  ;;  %v4099_v59 = vpop.trf.xlu1 }
 0x2eb   : > { %v15237_v10 = vrot.slane %v16966_v45, %v14220_v13  ;;  %v7578_v9 = vrot.slane %v7564_v31, %v13817_v26  ;;  %v2616_v41 = vcombine.high %v16967_v5, %v2603_v46  ;;  %v2615_v63 = vcombine.low %v16967_v5, %v2603_v46 }
 0x2ec   : > { %v7467_v16 = vrot.slane %v7459_v47, %v14220_v13  ;;  %v7627_v3 = vcombine.low %v7571_v11, %v7587_v48  ;;  %v7628_v54 = vcombine.high %v7571_v11, %v7587_v48  ;;  %v7603_v31 = vrot.slane %v7595_v2, %v14220_v13 }
 0x2ed   : > { %6131 = vxpose.xlu1.b32.start.end [1/1] (short) (narrow) %v2612_v4, 8  ;;  %v2618_v30 = vcombine.high %v16968_v39, %v15237_v10  ;;  %v7643_v60 = vcombine.low %v7578_v9, %v7594_v14  ;;  %v7644_v8 = vcombine.high %v7578_v9, %v7594_v14  ;;  %v7610_v4 = vrot.slane %v7596_v42, %v14220_v13  ;;  %v4131_v2 = vpop.trf.xlu0 }
 0x2ee   : > { %6099 = vxpose.xlu0.b32.start.end [1/1] (short) (narrow) %v2611_v17, 8  ;;  %v7523_v51 = vcombine.low %v7467_v16, %v7499_v18  ;;  %v7524_v45 = vcombine.high %v7467_v16, %v7499_v18  ;;  %v7635_v17 = vrot.slane %v7627_v3, %v14220_v13  ;;  %v7642_v56 = vrot.slane %v7628_v54, %v14220_v13  ;;  %v4163_v46 = vpop.trf.xlu1 }
 0x2ef   : > { %v7619_v47 = vrot.slane %v7611_v21, %v14220_v13  ;;  %v7626_v5 = vrot.slane %v7612_v36, %v14220_v13  ;;  %v7651_v48 = vrot.slane %v7643_v60, %v14220_v13  ;;  %v7658_v14 = vrot.slane %v7644_v8, %v14220_v13 }
 0x2f0   : > { %v7683_v11 = vcombine.low %v4099_v59, %v4163_v46  ;;  %v7684_v9 = vcombine.high %v4099_v59, %v4163_v46  ;;  %v7667_v18 = vcombine.low %v4067_v57, %v4131_v2  ;;  %v7668_v42 = vcombine.high %v4067_v57, %v4131_v2 }
 0x2f1   : > { %6195 = vxpose.xlu1.b32.start.end [1/1] (short) (narrow) %v2614_v19, 8  ;;  %v7659_v16 = vcombine.low %v7603_v31, %v7635_v17  ;;  %v7660_v3 = vcombine.high %v7603_v31, %v7635_v17  ;;  %v7661_v21 = vcombine.low %v7610_v4, %v7642_v56  ;;  %v7662_v36 = vcombine.high %v7610_v4, %v7642_v56  ;;  %v4195_v31 = vpop.trf.xlu0 }
 0x2f2   : > { %6163 = vxpose.xlu0.b32.start.end [1/1] (short) (narrow) %v2613_v1, 8  ;;  %v15267_v54 = vrot.slane %v7683_v11, %v13817_v26  ;;  %v15270_v19 = vrot.slane %v7684_v9, %v13817_v26  ;;  %v15273_v60 = vrot.slane %v7667_v18, %v13817_v26  ;;  %v15276_v8 = vrot.slane %v7668_v42, %v13817_v26  ;;  %v4227_v1 = vpop.trf.xlu1 }
 0x2f3   : > { %v11951_v59 = vpack.c.bf16 %v7659_v16, %v7523_v51  ;;  %v11983_v57 = vpack.c.bf16 %v7660_v3, %v7524_v45  ;;  %v15281_v17 = vpack.c.bf16 %v7661_v21, %v7525_v0  ;;  %v15286_v56 = vpack.c.bf16 %v7662_v36, %v7526_v27 }
 0x2f4   : > { %v7663_v4 = vcombine.low %v7619_v47, %v7651_v48  ;;  %v7664_v46 = vcombine.high %v7619_v47, %v7651_v48  ;;  %v7732_v11 = vcombine.high %v15273_v60, %v15267_v54  ;;  %v2617_v0 = vcombine.low %v16968_v39, %v15237_v10 }
 0x2f5   : > { %6259 = vxpose.xlu1.b32.start.end [1/1] (short) (narrow) %v2616_v41, 8  ;;  %v7747_v41 = vcombine.low %v15276_v8, %v15270_v19  ;;  %11952 = vmatprep.subr.bf16.mxu0 %v11951_v59  ;;  %v7665_v27 = vcombine.low %v7626_v5, %v7658_v14  ;;  %v15310_v51 = vrot.slane %v2939_v43, %v13817_v26  ;;  %v4259_v43 = vpop.trf.xlu0 }
 0x2f6   : > { %6227 = vxpose.xlu0.b32.start.end [1/1] (short) (narrow) %v2615_v63, 8  ;;  %v7748_v63 = vcombine.high %v15276_v8, %v15270_v19  ;;  %11984 = vmatprep.subr.bf16.mxu1 %v11983_v57  ;;  %v15299_v20 = vpack.c.bf16 %v7663_v4, %v7527_v6  ;;  %v15304_v55 = vpack.c.bf16 %v7664_v46, %v7528_v50  ;;  %v4291_v38 = vpop.trf.xlu1  ;;  %v16979_v46 = vld [vmem:[#allocation116_spill] sm:$0xff] }
 0x2f7   : > { %11954 = vmatpush3.bf16.msra.mxu0 %v11951_v59  ;;  %v2924_v10 = vcombine.high %v16961_v52, %v14773_v40  ;;  %v16969_v6 = vcombine.low %v16961_v52, %v14773_v40  ;;  %11986 = vmatpush3.bf16.msra.mxu1 %v11983_v57  ;;  %v16970_v24 = vcombine.high %v14998_v35, %v14936_v12 }
 0x2f8   : > { %v7715_v45 = vcombine.low %v4227_v1, %v4291_v38  ;;  %v7716_v47 = vcombine.high %v4227_v1, %v4291_v38  ;;  %v16971_v48 = vcombine.low %v15176_v29, %v15164_v62  ;;  %v7699_v40 = vcombine.low %v4195_v31, %v4259_v43 }
 0x2f9   : > { %v15318_v39 = vrot.slane %v16969_v6, %v13817_v26  ;;  %v2730_v50 = vrot.slane %v16970_v24, %v14220_v13  ;;  %6323 = vxpose.xlu1.b32.start.end [1/1] (short) (narrow) %v2618_v30, 8  ;;  %v7700_v52 = vcombine.high %v4195_v31, %v4259_v43  ;;  %v16973_v2 = vcombine.low %v15008_v49, %v14939_v53  ;;  %v16974_v30 = vld [vmem:[#allocation115_spill] sm:$0xff] }
 0x2fa   : > { %6291 = vxpose.xlu0.b32.start.end [1/1] (short) (narrow) %v2617_v0, 8  ;;  %v15327_v9 = vpack.c.bf16 %v7665_v27, %v16971_v48  ;;  %v7666_v42 = vcombine.high %v7626_v5, %v7658_v14  ;;  %v15334_v12 = vrot.slane %v7715_v45, %v13817_v26  ;;  %v7730_v35 = vrot.slane %v7716_v47, %v13817_v26  ;;  %v4355_v14 = vpop.trf.xlu1 }
 0x2fb   : > { %v2739_v18 = vrot.slane %v16973_v2, %v14220_v13  ;;  %v2748_v16 = vcombine.high %v16974_v30, %v15245_v61  ;;  %v2747_v3 = vcombine.low %v16974_v30, %v15245_v61  ;;  %v16975_v19 = vcombine.high %v16956_v44, %v14745_v37  ;;  %v4323_v44 = vpop.trf.xlu0 }
 0x2fc   : > { %16972 = vst [vmem:[#allocation117_spill] sm:$0xff] %v15327_v9  ;;  %v7707_v36 = vrot.slane %v7699_v40, %v13817_v26  ;;  %v7714_v5 = vrot.slane %v7700_v52, %v13817_v26  ;;  %v16976_v8 = vcombine.high %v15176_v29, %v15164_v62  ;;  %v15355_v59 = vrot.slane %v2924_v10, %v13817_v26  ;;  %v16980_v10 = vld [vmem:[#allocation87_spill] sm:$0xff] }
 0x2fd   : > { %v15345_v21 = vrot.slane %v16975_v19, %v13817_v26  ;;  %v2987_v61 = vcombine.low %v15318_v39, %v15310_v51  ;;  %v2988_v37 = vcombine.high %v15318_v39, %v15310_v51  ;;  %6387 = vxpose.xlu1.b32.start.end [1/1] (short) (narrow) %v2748_v16, 8  ;;  %v16978_v62 = vcombine.high %v15008_v49, %v14939_v53 }
 0x2fe   : > { %v15352_v1 = vpack.c.bf16 %v7666_v42, %v16976_v8  ;;  %6355 = vxpose.xlu0.b32.start.end [1/1] (short) (narrow) %v2747_v3, 8  ;;  %v7764_v57 = vcombine.high %v7707_v36, %v15334_v12  ;;  %v7779_v31 = vcombine.low %v7714_v5, %v7730_v35  ;;  %v7780_v4 = vcombine.high %v7714_v5, %v7730_v35  ;;  %v4419_v49 = vpop.trf.xlu1 }
 0x2ff   : > { %v2746_v29 = vrot.slane %v16978_v62, %v14220_v13  ;;  %v2750_v0 = vcombine.high %v16979_v46, %v2730_v50  ;;  %v2749_v27 = vcombine.low %v16979_v46, %v2730_v50  ;;  %v2752_v6 = vcombine.high %v16980_v10, %v2739_v18  ;;  %v4387_v52 = vpop.trf.xlu0 }
 0x300   : > { %16977 = vst [vmem:[#allocation96_spill] sm:$0xff] %v15352_v1  ;;  %v16981_v38 = vcombine.low %v15142_v34, %v15130_v15  ;;  %v15376_v45 = vrot.slane %v7732_v11, %v14220_v13  ;;  %v15379_v47 = vrot.slane %v7764_v57, %v14220_v13  ;;  %v15382_v53 = vrot.slane %v7779_v31, %v14220_v13 }
 0x301   : > { %v2751_v50 = vcombine.low %v16980_v10, %v2739_v18  ;;  %v15386_v43 = vrot.slane %v7780_v4, %v14220_v13  ;;  %v7819_v48 = vcombine.low %v4355_v14, %v4419_v49  ;;  %v7820_v40 = vcombine.high %v4355_v14, %v4419_v49  ;;  %6451 = vxpose.xlu1.b32.start.end [1/1] (short) (narrow) %v2750_v0, 8  ;;  %v16983_v10 = vld [vmem:[#allocation85_spill] sm:$0xff] }
 0x302   : > { %v15373_v24 = vrot.slane %v16981_v38, %v14220_v13  ;;  %6419 = vxpose.xlu0.b32.start.end [1/1] (short) (narrow) %v2749_v27, 8  ;;  %v15389_v11 = vrot.slane %v7747_v41, %v14220_v13  ;;  %v15392_v2 = vrot.slane %v7748_v63, %v14220_v13  ;;  %v7803_v42 = vcombine.low %v4323_v44, %v4387_v52  ;;  %v4483_v5 = vpop.trf.xlu1 }
 0x303   : > { %v7804_v35 = vcombine.high %v4323_v44, %v4387_v52  ;;  %v7827_v30 = vrot.slane %v7819_v48, %v13817_v26  ;;  %v7834_v18 = vrot.slane %v7820_v40, %v13817_v26  ;;  %v7797_v16 = vcombine.low %v15376_v45, %v15379_v47  ;;  %v4451_v44 = vpop.trf.xlu0 }
 0x304   : > { %v7798_v3 = vcombine.high %v15376_v45, %v15379_v47  ;;  %v7811_v19 = vrot.slane %v7803_v42, %v13817_v26  ;;  %v7799_v63 = vcombine.low %v15389_v11, %v15382_v53  ;;  %v7800_v14 = vcombine.high %v15389_v11, %v15382_v53 }
 0x305   : > { %v7818_v41 = vrot.slane %v7804_v35, %v13817_v26  ;;  %v7763_v8 = vcombine.low %v7707_v36, %v15334_v12  ;;  %6515 = vxpose.xlu1.b32.start.end [1/1] (short) (narrow) %v2752_v6, 8  ;;  %v16982_v0 = vcombine.high %v15142_v34, %v15130_v15  ;;  %v3003_v12 = vcombine.low %v15355_v59, %v15345_v21 }
 0x306   : > { %6483 = vxpose.xlu0.b32.start.end [1/1] (short) (narrow) %v2751_v50, 8  ;;  %v7868_v4 = vcombine.high %v7811_v19, %v7827_v30  ;;  %v7731_v36 = vcombine.low %v15273_v60, %v15267_v54  ;;  %v2754_v6 = vcombine.high %v16983_v10, %v2746_v29  ;;  %v2753_v38 = vcombine.low %v16983_v10, %v2746_v29  ;;  %v4547_v49 = vpop.trf.xlu1  ;;  %v16984_v50 = vld [vmem:[#allocation88_spill] sm:$0xff] }
 0x307   : > { %v7883_v62 = vcombine.low %v7818_v41, %v7834_v18  ;;  %v7884_v46 = vcombine.high %v7818_v41, %v7834_v18  ;;  %v2866_v27 = vrot.slane %v16982_v0, %v14220_v13  ;;  %v2884_v48 = vcombine.high %v16984_v50, %v15373_v24  ;;  %v4515_v35 = vpop.trf.xlu0  ;;  %v16987_v41 = vld [vmem:[#allocation86_spill] sm:$0xff] }
 0x308   : > { %v2883_v40 = vcombine.low %v16984_v50, %v15373_v24  ;;  %v16985_v15 = vcombine.low %v15146_v25, %v15136_v58  ;;  %v16986_v54 = vcombine.high %v15146_v25, %v15136_v58  ;;  %v7771_v29 = vrot.slane %v7763_v8, %v14220_v13 }
 0x309   : > { %v7851_v52 = vcombine.low %v4483_v5, %v4547_v49  ;;  %v7852_v42 = vcombine.high %v4483_v5, %v4547_v49  ;;  %6579 = vxpose.xlu1.b32.start.end [1/1] (short) (narrow) %v2754_v6, 8  ;;  %v7835_v18 = vcombine.low %v4451_v44, %v4515_v35  ;;  %v7836_v24 = vcombine.high %v4451_v44, %v4515_v35 }
 0x30a   : > { %v2875_v34 = vrot.slane %v16985_v15, %v14220_v13  ;;  %v15433_v60 = vrot.slane %v16986_v54, %v14220_v13  ;;  %6547 = vxpose.xlu0.b32.start.end [1/1] (short) (narrow) %v2753_v38, 8  ;;  %v2886_v0 = vcombine.high %v16987_v41, %v2866_v27  ;;  %v2885_v10 = vcombine.low %v16987_v41, %v2866_v27  ;;  %v4611_v6 = vpop.trf.xlu1  ;;  %v16988_v38 = vld [vmem:[#allocation92_spill] sm:$0xff] }
 0x30b   : > { %v7739_v50 = vrot.slane %v7731_v36, %v14220_v13  ;;  %v7867_v15 = vcombine.low %v7811_v19, %v7827_v30  ;;  %v7859_v58 = vrot.slane %v7851_v52, %v13817_v26  ;;  %v7866_v25 = vrot.slane %v7852_v42, %v13817_v26  ;;  %v4579_v30 = vpop.trf.xlu0  ;;  %v16989_v36 = vld [vmem:[#allocation90_spill] sm:$0xff] }
 0x30c   : > { %v7843_v8 = vrot.slane %v7835_v18, %v13817_v26  ;;  %v7850_v5 = vrot.slane %v7836_v24, %v13817_v26  ;;  %v2888_v49 = vcombine.high %v16988_v38, %v2875_v34  ;;  %v15448_v44 = vrot.slane %v2987_v61, %v14220_v13 }
 0x30d   : > { %6643 = vxpose.xlu1.b32.start.end [1/1] (short) (narrow) %v2884_v48, 8  ;;  %v2887_v19 = vcombine.low %v16988_v38, %v2875_v34  ;;  %v7795_v27 = vcombine.low %v7739_v50, %v7771_v29  ;;  %v2890_v54 = vcombine.high %v16989_v36, %v15433_v60  ;;  %v7875_v24 = vrot.slane %v7867_v15, %v14220_v13 }
 0x30e   : > { %6611 = vxpose.xlu0.b32.start.end [1/1] (short) (narrow) %v2883_v40, 8  ;;  %v7899_v52 = vcombine.low %v7843_v8, %v7859_v58  ;;  %v7900_v42 = vcombine.high %v7843_v8, %v7859_v58  ;;  %v7915_v35 = vcombine.low %v7850_v5, %v7866_v25  ;;  %v7916_v18 = vcombine.high %v7850_v5, %v7866_v25  ;;  %v4675_v57 = vpop.trf.xlu1 }
 0x30f   : > { %v7882_v41 = vrot.slane %v7868_v4, %v14220_v13  ;;  %v7891_v61 = vrot.slane %v7883_v62, %v14220_v13  ;;  %v7796_v31 = vcombine.high %v7739_v50, %v7771_v29  ;;  %v15457_v48 = vrot.slane %v7884_v46, %v14220_v13  ;;  %v4643_v4 = vpop.trf.xlu0 }
 0x310   : > { %v7907_v40 = vrot.slane %v7899_v52, %v14220_v13  ;;  %v7914_v34 = vrot.slane %v7900_v42, %v14220_v13  ;;  %v7923_v38 = vrot.slane %v7915_v35, %v14220_v13  ;;  %v7930_v58 = vrot.slane %v7916_v18, %v14220_v13 }
 0x311   : > { %v7955_v25 = vcombine.low %v4611_v6, %v4675_v57  ;;  %v7956_v8 = vcombine.high %v4611_v6, %v4675_v57  ;;  %6707 = vxpose.xlu1.b32.start.end [1/1] (short) (narrow) %v2886_v0, 8  ;;  %v7939_v15 = vcombine.low %v4579_v30, %v4643_v4  ;;  %v7940_v62 = vcombine.high %v4579_v30, %v4643_v4 }
 0x312   : > { %6675 = vxpose.xlu0.b32.start.end [1/1] (short) (narrow) %v2885_v10, 8  ;;  %v7931_v29 = vcombine.low %v7875_v24, %v7907_v40  ;;  %v7932_v50 = vcombine.high %v7875_v24, %v7907_v40  ;;  %v7933_v52 = vcombine.low %v7882_v41, %v7914_v34  ;;  %v7934_v42 = vcombine.high %v7882_v41, %v7914_v34  ;;  %v4739_v0 = vpop.trf.xlu1  ;;  %v16990_v34 = vld [vmem:[#allocation91_spill] sm:$0xff] }
 0x313   : > { %v15464_v46 = vrot.slane %v7955_v25, %v13817_v26  ;;  %v15467_v5 = vrot.slane %v7956_v8, %v13817_v26  ;;  %v15470_v35 = vrot.slane %v7939_v15, %v13817_v26  ;;  %v15473_v57 = vrot.slane %v7940_v62, %v13817_v26  ;;  %v4707_v30 = vpop.trf.xlu0  ;;  %v16991_v25 = vld [vmem:[#allocation84_spill] sm:$0xff] }
 0x314   : > { %v11955_v10 = vpack.c.bf16 %v7931_v29, %v7795_v27  ;;  %v11987_v6 = vpack.c.bf16 %v7932_v50, %v7796_v31  ;;  %v15478_v18 = vpack.c.bf16 %v7933_v52, %v7797_v16  ;;  %v15483_v24 = vpack.c.bf16 %v7934_v42, %v7798_v3  ;;  %v17000_v42 = vld [vmem:[#allocation82_spill] sm:$0xff] }
 0x315   : > { %6771 = vxpose.xlu1.b32.start.end [1/1] (short) (narrow) %v2888_v49, 8  ;;  %v7935_v41 = vcombine.low %v7891_v61, %v7923_v38  ;;  %v8004_v40 = vcombine.high %v15470_v35, %v15464_v46  ;;  %v8019_v31 = vcombine.low %v15473_v57, %v15467_v5  ;;  %v8020_v49 = vcombine.high %v15473_v57, %v15467_v5 }
 0x316   : > { %6739 = vxpose.xlu0.b32.start.end [1/1] (short) (narrow) %v2887_v19, 8  ;;  %11956 = vmatprep.subr.bf16.mxu0 %v11955_v10  ;;  %v2889_v16 = vcombine.low %v16989_v36, %v15433_v60  ;;  %v7936_v47 = vcombine.high %v7891_v61, %v7923_v38  ;;  %v7937_v3 = vcombine.low %v15457_v48, %v7930_v58  ;;  %v4803_v27 = vpop.trf.xlu1 }
 0x317   : > { %11988 = vmatprep.subr.bf16.mxu1 %v11987_v6  ;;  %11958 = vmatpush3.bf16.msra.mxu0 %v11955_v10  ;;  %v15496_v45 = vpack.c.bf16 %v7935_v41, %v7799_v63  ;;  %v3004_v19 = vcombine.high %v15355_v59, %v15345_v21  ;;  %v16992_v8 = vcombine.low %v16990_v34, %v16991_v25  ;;  %v4771_v4 = vpop.trf.xlu0 }
 0x318   : > { %11990 = vmatpush3.bf16.msra.mxu1 %v11987_v6  ;;  %v3002_v36 = vrot.slane %v2988_v37, %v14220_v13  ;;  %v3011_v63 = vrot.slane %v3003_v12, %v14220_v13  ;;  %v7987_v61 = vcombine.low %v4739_v0, %v4803_v27  ;;  %v7988_v38 = vcombine.high %v4739_v0, %v4803_v27 }
 0x319   : > { %v2963_v60 = vrot.slane %v16992_v8, %v14220_v13  ;;  %6835 = vxpose.xlu1.b32.start.end [1/1] (short) (narrow) %v2890_v54, 8  ;;  %v15516_v15 = vpack.c.bf16 %v7936_v47, %v7800_v14  ;;  %v7971_v62 = vcombine.low %v4707_v30, %v4771_v4  ;;  %v7972_v29 = vcombine.high %v4707_v30, %v4771_v4 }
 0x31a   : > { %6803 = vxpose.xlu0.b32.start.end [1/1] (short) (narrow) %v2889_v16, 8  ;;  %v16994_v51 = vcombine.low %v15392_v2, %v15386_v43  ;;  %v7938_v21 = vcombine.high %v15457_v48, %v7930_v58  ;;  %v7995_v59 = vrot.slane %v7987_v61, %v13817_v26  ;;  %v8002_v37 = vrot.slane %v7988_v38, %v13817_v26  ;;  %v4867_v14 = vpop.trf.xlu1 }
 0x31b   : > { %16993 = vst [vmem:[#allocation94_spill] sm:$0xff] %v15516_v15  ;;  %v3020_v12 = vcombine.high %v2963_v60, %v15448_v44  ;;  %v3019_v54 = vcombine.low %v2963_v60, %v15448_v44  ;;  %v7979_v53 = vrot.slane %v7971_v62, %v13817_v26  ;;  %v7986_v11 = vrot.slane %v7972_v29, %v13817_v26  ;;  %v4835_v48 = vpop.trf.xlu0  ;;  %v16999_v44 = vld [vmem:[#allocation89_spill] sm:$0xff] }
 0x31c   : > { %v15521_v39 = vpack.c.bf16 %v7937_v3, %v16994_v51  ;;  %v16996_v50 = vcombine.high %v15392_v2, %v15386_v43  ;;  %v16998_v58 = vcombine.high %v16990_v34, %v16991_v25  ;;  %v17001_v57 = vcombine.low %v16999_v44, %v17000_v42 }
 0x31d   : > { %6899 = vxpose.xlu1.b32.start.end [1/1] (short) (narrow) %v3020_v12, 8  ;;  %v8036_v10 = vcombine.high %v7979_v53, %v7995_v59  ;;  %v8051_v6 = vcombine.low %v7986_v11, %v8002_v37  ;;  %v8052_v30 = vcombine.high %v7986_v11, %v8002_v37  ;;  %v17002_v43 = vcombine.high %v16999_v44, %v17000_v42 }
 0x31e   : > { %16995 = vst [vmem:[#allocation99_spill] sm:$0xff] %v15521_v39  ;;  %v15533_v5 = vpack.c.bf16 %v7938_v21, %v16996_v50  ;;  %6867 = vxpose.xlu0.b32.start.end [1/1] (short) (narrow) %v3019_v54, 8  ;;  %v2970_v52 = vrot.slane %v16998_v58, %v14220_v13  ;;  %v2979_v0 = vrot.slane %v17001_v57, %v14220_v13  ;;  %v4931_v8 = vpop.trf.xlu1 }
 0x31f   : > { %v2986_v2 = vrot.slane %v17002_v43, %v14220_v13  ;;  %v3018_v3 = vrot.slane %v3004_v19, %v14220_v13  ;;  %v15549_v27 = vrot.slane %v8004_v40, %v14220_v13  ;;  %v15552_v34 = vrot.slane %v8036_v10, %v14220_v13 }
 0x320   : > { %16997 = vst [vmem:[#allocation97_spill] sm:$0xff] %v15533_v5  ;;  %v3022_v41 = vcombine.high %v2970_v52, %v3002_v36  ;;  %v3021_v16 = vcombine.low %v2970_v52, %v3002_v36  ;;  %v3024_v47 = vcombine.high %v2979_v0, %v3011_v63  ;;  %v15555_v25 = vrot.slane %v8051_v6, %v14220_v13  ;;  %v4899_v36 = vpop.trf.xlu0 }
 0x321   : > { %v3023_v60 = vcombine.low %v2979_v0, %v3011_v63  ;;  %v15558_v61 = vrot.slane %v8052_v30, %v14220_v13  ;;  %v8091_v38 = vcombine.low %v4867_v14, %v4931_v8  ;;  %v8092_v4 = vcombine.high %v4867_v14, %v4931_v8 }
 0x322   : > { %6963 = vxpose.xlu1.b32.start.end [1/1] (short) (narrow) %v3022_v41, 8  ;;  %6931 = vxpose.xlu0.b32.start.end [1/1] (short) (narrow) %v3021_v16, 8  ;;  %v15561_v19 = vrot.slane %v8019_v31, %v14220_v13  ;;  %v15564_v40 = vrot.slane %v8020_v49, %v14220_v13  ;;  %v8075_v62 = vcombine.low %v4835_v48, %v4899_v36  ;;  %v4995_v54 = vpop.trf.xlu1 }
 0x323   : > { %v8076_v29 = vcombine.high %v4835_v48, %v4899_v36  ;;  %v8099_v51 = vrot.slane %v8091_v38, %v13817_v26  ;;  %v8106_v63 = vrot.slane %v8092_v4, %v13817_v26  ;;  %v8069_v21 = vcombine.low %v15549_v27, %v15552_v34  ;;  %v17004_v36 = vld [vmem:[#allocation12_spill] sm:$0xff] }
 0x324   : > { %v8070_v37 = vcombine.high %v15549_v27, %v15552_v34  ;;  %v8083_v12 = vrot.slane %v8075_v62, %v13817_v26  ;;  %v8071_v49 = vcombine.low %v15561_v19, %v15555_v25  ;;  %v8072_v11 = vcombine.high %v15561_v19, %v15555_v25  ;;  %v4963_v50 = vpop.trf.xlu0  ;;  %v17015_v19 = vld [vmem:[#allocation19_spill] sm:$0xff] }
 0x325   : > { %v8090_v31 = vrot.slane %v8076_v29, %v13817_v26  ;;  %v8035_v14 = vcombine.low %v7979_v53, %v7995_v59  ;;  %v8073_v48 = vcombine.low %v15564_v40, %v15558_v61  ;;  %v8074_v58 = vcombine.high %v15564_v40, %v15558_v61 }
 0x326   : > { %7027 = vxpose.xlu1.b32.start.end [1/1] (short) (narrow) %v3024_v47, 8  ;;  %6995 = vxpose.xlu0.b32.start.end [1/1] (short) (narrow) %v3023_v60, 8  ;;  %v8140_v52 = vcombine.high %v8083_v12, %v8099_v51  ;;  %v8003_v57 = vcombine.low %v15470_v35, %v15464_v46  ;;  %v3026_v0 = vcombine.high %v2986_v2, %v3018_v3  ;;  %v5059_v6 = vpop.trf.xlu1 }
 0x327   : > { %v8155_v44 = vcombine.low %v8090_v31, %v8106_v63  ;;  %v8156_v42 = vcombine.high %v8090_v31, %v8106_v63  ;;  %v3025_v10 = vcombine.low %v2986_v2, %v3018_v3  ;;  %v8043_v59 = vrot.slane %v8035_v14, %v14220_v13  ;;  %v17003_v3 = vld [vmem:[#allocation11_spill] sm:$0xff] }
 0x328   : > { %v8123_v53 = vcombine.low %v4995_v54, %v5059_v6  ;;  %v8124_v30 = vcombine.high %v4995_v54, %v5059_v6  ;;  %v5027_v43 = vpop.trf.xlu0  ;;  %v8011_v47 = vrot.slane %v8003_v57, %v14220_v13  ;;  %v8139_v8 = vcombine.low %v8083_v12, %v8099_v51 }
 0x329   : > { %v8107_v41 = vcombine.low %v4963_v50, %v5027_v43  ;;  %v8108_v16 = vcombine.high %v4963_v50, %v5027_v43  ;;  %v8154_v12 = vrot.slane %v8140_v52, %v14220_v13  ;;  %v8163_v14 = vrot.slane %v8155_v44, %v14220_v13  ;;  %v17006_v52 = vld [vmem:[#allocation14_spill] sm:$0xff] }
 0x32a   : > { %7091 = vxpose.xlu1.b32.start.end [1/1] (short) (narrow) %v3026_v0, 8  ;;  %7059 = vxpose.xlu0.b32.start.end [1/1] (short) (narrow) %v3025_v10, 8  ;;  %v8131_v60 = vrot.slane %v8123_v53, %v13817_v26  ;;  %v8138_v38 = vrot.slane %v8124_v30, %v13817_v26  ;;  %v5123_v2 = vpop.trf.xlu1  ;;  %v8067_v62 = vcombine.low %v8011_v47, %v8043_v59 }
 0x32b   : > { %v8115_v46 = vrot.slane %v8107_v41, %v13817_v26  ;;  %v8122_v35 = vrot.slane %v8108_v16, %v13817_v26  ;;  %v8147_v51 = vrot.slane %v8139_v8, %v14220_v13  ;;  %v8068_v50 = vcombine.high %v8011_v47, %v8043_v59  ;;  %v17005_v16 = vld [vmem:[#allocation13_spill] sm:$0xff] }
 0x32c   : > { %v5091_v4 = vpop.trf.xlu0  ;;  %v8170_v57 = vrot.slane %v8156_v42, %v14220_v13 }
 0x32d   : > { %v8171_v29 = vcombine.low %v8115_v46, %v8131_v60  ;;  %v8172_v63 = vcombine.high %v8115_v46, %v8131_v60  ;;  %v8187_v31 = vcombine.low %v8122_v35, %v8138_v38  ;;  %v8188_v54 = vcombine.high %v8122_v35, %v8138_v38 }
 0x32e   : > { %12824 = vxpose.xlu1.b32.start [1/16] %v17003_v3, 128  ;;  %12712 = vxpose.xlu0.b32.start [1/16] %v17004_v36, 128  ;;  %v5187_v53 = vpop.trf.xlu1 }
 0x32f   : > { %v8179_v0 = vrot.slane %v8171_v29, %v14220_v13  ;;  %v8186_v10 = vrot.slane %v8172_v63, %v14220_v13  ;;  %v8195_v6 = vrot.slane %v8187_v31, %v14220_v13  ;;  %v8202_v30 = vrot.slane %v8188_v54, %v14220_v13  ;;  %v17007_v31 = vld [vmem:[#allocation15_spill] sm:$0xff]  ;;  %v17008_v54 = vld [vmem:[#allocation16_spill] sm:$0xff] }
 0x330   : > { %v8227_v43 = vcombine.low %v5123_v2, %v5187_v53  ;;  %v8228_v41 = vcombine.high %v5123_v2, %v5187_v53  ;;  %v5155_v8 = vpop.trf.xlu0 }
 0x331   : > { %v8211_v44 = vcombine.low %v5091_v4, %v5155_v8  ;;  %v8212_v59 = vcombine.high %v5091_v4, %v5155_v8  ;;  %v8203_v47 = vcombine.low %v8147_v51, %v8179_v0  ;;  %v8204_v42 = vcombine.high %v8147_v51, %v8179_v0  ;;  %v17011_v8 = vld [vmem:[#allocation18_spill] sm:$0xff] }
 0x332   : > { %12826 = vxpose.xlu1.b32.cont [2/16] %v17005_v16, 128  ;;  %12714 = vxpose.xlu0.b32.cont [2/16] %v17006_v52, 128  ;;  %v15603_v60 = vrot.slane %v8227_v43, %v13817_v26  ;;  %v8242_v38 = vrot.slane %v8228_v41, %v13817_v26  ;;  %v8205_v46 = vcombine.low %v8154_v12, %v8186_v10  ;;  %v5251_v36 = vpop.trf.xlu1  ;;  %v17010_v41 = vld [vmem:[#allocation17_spill] sm:$0xff] }
 0x333   : > { %v8206_v35 = vcombine.high %v8154_v12, %v8186_v10  ;;  %v15607_v3 = vrot.slane %v8211_v44, %v13817_v26  ;;  %v8226_v2 = vrot.slane %v8212_v59, %v13817_v26  ;;  %v11959_v29 = vpack.c.bf16 %v8203_v47, %v8067_v62 }
 0x334   : > { %v11991_v63 = vpack.c.bf16 %v8204_v42, %v8068_v50  ;;  %v5219_v4 = vpop.trf.xlu0  ;;  %v15615_v51 = vpack.c.bf16 %v8205_v46, %v8069_v21  ;;  %v8207_v0 = vcombine.low %v8163_v14, %v8195_v6  ;;  %v8208_v21 = vcombine.high %v8163_v14, %v8195_v6 }
 0x335   : > { %v15620_v12 = vpack.c.bf16 %v8206_v35, %v8070_v37  ;;  %v8276_v62 = vcombine.high %v15607_v3, %v15603_v60  ;;  %v8291_v50 = vcombine.low %v8226_v2, %v8242_v38  ;;  %v8292_v10 = vcombine.high %v8226_v2, %v8242_v38  ;;  %11960 = vmatprep.subr.bf16.mxu0 %v11959_v29 }
 0x336   : > { %12828 = vxpose.xlu1.b32.cont [3/16] %v17007_v31, 128  ;;  %12716 = vxpose.xlu0.b32.cont [3/16] %v17008_v54, 128  ;;  %v15627_v53 = vpack.c.bf16 %v8207_v0, %v8071_v49  ;;  %v8209_v43 = vcombine.low %v8170_v57, %v8202_v30  ;;  %v5315_v27 = vpop.trf.xlu1  ;;  %v15634_v52 = vpack.c.bf16 %v8208_v21, %v8072_v11  ;;  %v17017_v31 = vld [vmem:[#allocation21_spill] sm:$0xff]  ;;  %v17018_v54 = vld [vmem:[#allocation22_spill] sm:$0xff] }
 0x337   : > { %11992 = vmatprep.subr.bf16.mxu1 %v11991_v63  ;;  %11962 = vmatpush3.bf16.msra.mxu0 %v11959_v29  ;;  %v8259_v34 = vcombine.low %v5251_v36, %v5315_v27  ;;  %v8260_v37 = vcombine.high %v5251_v36, %v5315_v27  ;;  %v8210_v14 = vcombine.high %v8170_v57, %v8202_v30 }
 0x338   : > { %17009 = vst [vmem:[#allocation118_spill] sm:$0xff] %v15627_v53  ;;  %11994 = vmatpush3.bf16.msra.mxu1 %v11991_v63  ;;  %v5283_v16 = vpop.trf.xlu0  ;;  %17012 = vst [vmem:[#allocation109_spill] sm:$0xff] %v15634_v52  ;;  %v15639_v49 = vpack.c.bf16 %v8209_v43, %v8073_v48  ;;  %v17016_v48 = vld [vmem:[#allocation20_spill] sm:$0xff]  ;;  %v15653_v2 = vrot.slane %v8276_v62, %v14220_v13  ;;  %v15667_v0 = vrot.slane %v8291_v50, %v14220_v13 }
 0x339   : > { %v8243_v44 = vcombine.low %v5219_v4, %v5283_v16  ;;  %v8244_v59 = vcombine.high %v5219_v4, %v5283_v16  ;;  %v8267_v6 = vrot.slane %v8259_v34, %v13817_v26  ;;  %v8274_v47 = vrot.slane %v8260_v37, %v13817_v26 }
 0x33a   : > { %12830 = vxpose.xlu1.b32.cont [4/16] %v17010_v41, 128  ;;  %12718 = vxpose.xlu0.b32.cont [4/16] %v17011_v8, 128  ;;  %17013 = vst [vmem:[#allocation75_spill] sm:$0xff] %v15639_v49  ;;  %v5379_v46 = vpop.trf.xlu1  ;;  %v15648_v25 = vpack.c.bf16 %v8210_v14, %v8074_v58  ;;  %v15670_v62 = vrot.slane %v8292_v10, %v14220_v13  ;;  %v17019_v14 = vld [vmem:[#allocation23_spill] sm:$0xff]  ;;  %v17050_v49 = vld [vmem:[#allocation48_spill] sm:$0xff] }
 0x33b   : > { %v8251_v42 = vrot.slane %v8243_v44, %v13817_v26  ;;  %v8258_v38 = vrot.slane %v8244_v59, %v13817_v26 }
 0x33c   : > { %17014 = vst [vmem:[#allocation112_spill] sm:$0xff] %v15648_v25  ;;  %v5347_v11 = vpop.trf.xlu0  ;;  %v17049_v25 = vld [vmem:[#allocation47_spill] sm:$0xff] }
 0x33d   : > { %v8308_v57 = vcombine.high %v8251_v42, %v8267_v6  ;;  %v8323_v30 = vcombine.low %v8258_v38, %v8274_v47  ;;  %v8324_v35 = vcombine.high %v8258_v38, %v8274_v47  ;;  %v8307_v59 = vcombine.low %v8251_v42, %v8267_v6  ;;  %v17020_v38 = vld [vmem:[#allocation24_spill] sm:$0xff] }
 0x33e   : > { %12832 = vxpose.xlu1.b32.cont [5/16] %v17015_v19, 128  ;;  %12720 = vxpose.xlu0.b32.cont [5/16] %v17016_v48, 128  ;;  %v5443_v61 = vpop.trf.xlu1 }
 0x33f   : > { %v15656_v36 = vrot.slane %v8308_v57, %v14220_v13  ;;  %v15659_v29 = vrot.slane %v8323_v30, %v14220_v13  ;;  %v15662_v40 = vrot.slane %v8324_v35, %v14220_v13  ;;  %v8363_v58 = vcombine.low %v5379_v46, %v5443_v61 }
 0x340   : > { %v8364_v63 = vcombine.high %v5379_v46, %v5443_v61  ;;  %v5411_v4 = vpop.trf.xlu0  ;;  %v8275_v30 = vcombine.low %v15607_v3, %v15603_v60  ;;  %v8315_v6 = vrot.slane %v8307_v59, %v14220_v13 }
 0x341   : > { %v8347_v21 = vcombine.low %v5347_v11, %v5411_v4  ;;  %v8348_v43 = vcombine.high %v5347_v11, %v5411_v4  ;;  %v8371_v27 = vrot.slane %v8363_v58, %v13817_v26  ;;  %v8341_v37 = vcombine.low %v15653_v2, %v15656_v36  ;;  %v17021_v58 = vld [vmem:[#allocation25_spill] sm:$0xff] }
 0x342   : > { %12834 = vxpose.xlu1.b32.cont [6/16] %v17017_v31, 128  ;;  %12722 = vxpose.xlu0.b32.cont [6/16] %v17018_v54, 128  ;;  %v8378_v34 = vrot.slane %v8364_v63, %v13817_v26  ;;  %v8342_v41 = vcombine.high %v15653_v2, %v15656_v36  ;;  %v5507_v8 = vpop.trf.xlu1  ;;  %v8343_v10 = vcombine.low %v15667_v0, %v15659_v29  ;;  %v17022_v31 = vld [vmem:[#allocation26_spill] sm:$0xff] }
 0x343   : > { %v8355_v16 = vrot.slane %v8347_v21, %v13817_v26  ;;  %v8362_v50 = vrot.slane %v8348_v43, %v13817_v26  ;;  %v8344_v44 = vcombine.high %v15667_v0, %v15659_v29  ;;  %v8283_v21 = vrot.slane %v8275_v30, %v14220_v13 }
 0x344   : > { %v5475_v47 = vpop.trf.xlu0  ;;  %v17035_v29 = vcombine.high %v15670_v62, %v15662_v40 }
 0x345   : > { %v8412_v11 = vcombine.high %v8355_v16, %v8371_v27  ;;  %v8427_v48 = vcombine.low %v8362_v50, %v8378_v34  ;;  %v8428_v57 = vcombine.high %v8362_v50, %v8378_v34  ;;  %v8411_v43 = vcombine.low %v8355_v16, %v8371_v27 }
 0x346   : > { %12836 = vxpose.xlu1.b32.cont [7/16] %v17019_v14, 128  ;;  %12724 = vxpose.xlu0.b32.cont [7/16] %v17020_v38, 128  ;;  %v5571_v35 = vpop.trf.xlu1  ;;  %v17024_v38 = vld [vmem:[#allocation28_spill] sm:$0xff] }
 0x347   : > { %v8395_v42 = vcombine.low %v5507_v8, %v5571_v35  ;;  %v8396_v61 = vcombine.high %v5507_v8, %v5571_v35  ;;  %v17023_v8 = vld [vmem:[#allocation27_spill] sm:$0xff]  ;;  %v8339_v35 = vcombine.low %v8283_v21, %v8315_v6  ;;  %v8419_v27 = vrot.slane %v8411_v43, %v14220_v13 }
 0x348   : > { %v5539_v63 = vpop.trf.xlu0  ;;  %v8426_v16 = vrot.slane %v8412_v11, %v14220_v13  ;;  %v17026_v11 = vld [vmem:[#allocation30_spill] sm:$0xff] }
 0x349   : > { %v8379_v4 = vcombine.low %v5475_v47, %v5539_v63  ;;  %v8380_v54 = vcombine.high %v5475_v47, %v5539_v63  ;;  %v8403_v34 = vrot.slane %v8395_v42, %v13817_v26  ;;  %v8410_v50 = vrot.slane %v8396_v61, %v13817_v26 }
 0x34a   : > { %12838 = vxpose.xlu1.b32.cont [8/16] %v17021_v58, 128  ;;  %12726 = vxpose.xlu0.b32.cont [8/16] %v17022_v31, 128  ;;  %v5635_v59 = vpop.trf.xlu1  ;;  %v8435_v42 = vrot.slane %v8427_v48, %v14220_v13  ;;  %v8340_v61 = vcombine.high %v8283_v21, %v8315_v6  ;;  %v8442_v31 = vrot.slane %v8428_v57, %v14220_v13 }
 0x34b   : > { %v8387_v60 = vrot.slane %v8379_v4, %v13817_v26  ;;  %v8394_v3 = vrot.slane %v8380_v54, %v13817_v26 }
 0x34c   : > { %v5603_v14 = vpop.trf.xlu0 }
 0x34d   : > { %v8443_v58 = vcombine.low %v8387_v60, %v8403_v34  ;;  %v8444_v47 = vcombine.high %v8387_v60, %v8403_v34  ;;  %v8459_v63 = vcombine.low %v8394_v3, %v8410_v50  ;;  %v8460_v30 = vcombine.high %v8394_v3, %v8410_v50  ;;  %v17025_v3 = vld [vmem:[#allocation29_spill] sm:$0xff] }
 0x34e   : > { %12840 = vxpose.xlu1.b32.cont [9/16] %v17023_v8, 128  ;;  %12728 = vxpose.xlu0.b32.cont [9/16] %v17024_v38, 128  ;;  %v5699_v38 = vpop.trf.xlu1 }
 0x34f   : > { %v8451_v4 = vrot.slane %v8443_v58, %v14220_v13  ;;  %v8458_v54 = vrot.slane %v8444_v47, %v14220_v13  ;;  %v8467_v8 = vrot.slane %v8459_v63, %v14220_v13  ;;  %v8474_v34 = vrot.slane %v8460_v30, %v14220_v13 }
 0x350   : > { %v8499_v60 = vcombine.low %v5635_v59, %v5699_v38  ;;  %v8500_v50 = vcombine.high %v5635_v59, %v5699_v38  ;;  %v5667_v43 = vpop.trf.xlu0 }
 0x351   : > { %v8483_v48 = vcombine.low %v5603_v14, %v5667_v43  ;;  %v8484_v6 = vcombine.high %v5603_v14, %v5667_v43  ;;  %v8475_v21 = vcombine.low %v8419_v27, %v8451_v4  ;;  %v8476_v57 = vcombine.high %v8419_v27, %v8451_v4  ;;  %v17028_v43 = vld [vmem:[#allocation32_spill] sm:$0xff] }
 0x352   : > { %12842 = vxpose.xlu1.b32.cont [10/16] %v17025_v3, 128  ;;  %12730 = vxpose.xlu0.b32.cont [10/16] %v17026_v11, 128  ;;  %v15713_v58 = vrot.slane %v8499_v60, %v13817_v26  ;;  %v8514_v47 = vrot.slane %v8500_v50, %v13817_v26  ;;  %v8477_v63 = vcombine.low %v8426_v16, %v8458_v54  ;;  %v5763_v38 = vpop.trf.xlu1  ;;  %v17027_v11 = vld [vmem:[#allocation31_spill] sm:$0xff] }
 0x353   : > { %v8478_v19 = vcombine.high %v8426_v16, %v8458_v54  ;;  %v15717_v30 = vrot.slane %v8483_v48, %v13817_v26  ;;  %v8498_v59 = vrot.slane %v8484_v6, %v13817_v26  ;;  %v11963_v3 = vpack.c.bf16 %v8475_v21, %v8339_v35  ;;  %v17031_v6 = vld [vmem:[#allocation34_spill] sm:$0xff] }
 0x354   : > { %v11995_v46 = vpack.c.bf16 %v8476_v57, %v8340_v61  ;;  %v5731_v14 = vpop.trf.xlu0  ;;  %v15725_v27 = vpack.c.bf16 %v8477_v63, %v8341_v37  ;;  %v8479_v4 = vcombine.low %v8435_v42, %v8467_v8  ;;  %v8480_v37 = vcombine.high %v8435_v42, %v8467_v8 }
 0x355   : > { %v15730_v16 = vpack.c.bf16 %v8478_v19, %v8342_v41  ;;  %v8548_v35 = vcombine.high %v15717_v30, %v15713_v58  ;;  %v8563_v61 = vcombine.low %v8498_v59, %v8514_v47  ;;  %v8564_v54 = vcombine.high %v8498_v59, %v8514_v47  ;;  %11964 = vmatprep.subr.bf16.mxu0 %v11963_v3  ;;  %v17030_v19 = vld [vmem:[#allocation33_spill] sm:$0xff] }
 0x356   : > { %12844 = vxpose.xlu1.b32.cont [11/16] %v17027_v11, 128  ;;  %12732 = vxpose.xlu0.b32.cont [11/16] %v17028_v43, 128  ;;  %v15737_v60 = vpack.c.bf16 %v8479_v4, %v8343_v10  ;;  %v8481_v50 = vcombine.low %v8442_v31, %v8474_v34  ;;  %v5827_v2 = vpop.trf.xlu1  ;;  %v15744_v21 = vpack.c.bf16 %v8480_v37, %v8344_v44  ;;  %v17037_v44 = vld [vmem:[#allocation35_spill] sm:$0xff] }
 0x357   : > { %11996 = vmatprep.subr.bf16.mxu1 %v11995_v46  ;;  %11966 = vmatpush3.bf16.msra.mxu0 %v11963_v3  ;;  %v8531_v36 = vcombine.low %v5763_v38, %v5827_v2  ;;  %v8532_v41 = vcombine.high %v5763_v38, %v5827_v2  ;;  %v17033_v10 = vcombine.low %v15670_v62, %v15662_v40 }
 0x358   : > { %17029 = vst [vmem:[#allocation76_spill] sm:$0xff] %v15737_v60  ;;  %11998 = vmatpush3.bf16.msra.mxu1 %v11995_v46  ;;  %v5795_v48 = vpop.trf.xlu0  ;;  %17032 = vst [vmem:[#allocation100_spill] sm:$0xff] %v15744_v21  ;;  %v8482_v46 = vcombine.high %v8442_v31, %v8474_v34  ;;  %v15763_v4 = vrot.slane %v8548_v35, %v14220_v13  ;;  %v15777_v35 = vrot.slane %v8563_v61, %v14220_v13  ;;  %v17077_v21 = vld [vmem:[#allocation63_spill] sm:$0xff]  ;;  %v17078_v60 = vld [vmem:[#allocation64_spill] sm:$0xff] }
 0x359   : > { %v8515_v57 = vcombine.low %v5731_v14, %v5795_v48  ;;  %v8516_v47 = vcombine.high %v5731_v14, %v5795_v48  ;;  %v15749_v42 = vpack.c.bf16 %v8481_v50, %v17033_v10  ;;  %v8539_v8 = vrot.slane %v8531_v36, %v13817_v26  ;;  %v17038_v14 = vld [vmem:[#allocation36_spill] sm:$0xff]  ;;  %v17040_v48 = vld [vmem:[#allocation38_spill] sm:$0xff] }
 0x35a   : > { %12846 = vxpose.xlu1.b32.cont [12/16] %v17030_v19, 128  ;;  %12734 = vxpose.xlu0.b32.cont [12/16] %v17031_v6, 128  ;;  %v8546_v63 = vrot.slane %v8532_v41, %v13817_v26  ;;  %v15758_v0 = vpack.c.bf16 %v8482_v46, %v17035_v29  ;;  %v17039_v41 = vld [vmem:[#allocation37_spill] sm:$0xff]  ;;  %v15780_v6 = vrot.slane %v8564_v54, %v14220_v13 }
 0x35b   : > { %17034 = vst [vmem:[#allocation98_spill] sm:$0xff] %v15749_v42  ;;  %v8523_v59 = vrot.slane %v8515_v57, %v13817_v26  ;;  %v8530_v38 = vrot.slane %v8516_v47, %v13817_v26  ;;  %v5891_v3 = vpop.trf.xlu1 }
 0x35c   : > { %17036 = vst [vmem:[#allocation102_spill] sm:$0xff] %v15758_v0  ;;  %v5859_v11 = vpop.trf.xlu0 }
 0x35d   : > { %v8580_v31 = vcombine.high %v8523_v59, %v8539_v8  ;;  %v8595_v34 = vcombine.low %v8530_v38, %v8546_v63  ;;  %v8596_v43 = vcombine.high %v8530_v38, %v8546_v63 }
 0x35e   : > { %12848 = vxpose.xlu1.b32.cont [13/16] %v17037_v44, 128  ;;  %12736 = vxpose.xlu0.b32.cont [13/16] %v17038_v14, 128 }
 0x35f   : > { %v15766_v37 = vrot.slane %v8580_v31, %v14220_v13  ;;  %v15769_v50 = vrot.slane %v8595_v34, %v14220_v13  ;;  %v5955_v40 = vpop.trf.xlu1  ;;  %v15772_v62 = vrot.slane %v8596_v43, %v14220_v13  ;;  %v17042_v31 = vld [vmem:[#allocation40_spill] sm:$0xff]  ;;  %v8547_v43 = vcombine.low %v15717_v30, %v15713_v58 }
 0x360   : > { %v8635_v2 = vcombine.low %v5891_v3, %v5955_v40  ;;  %v8636_v36 = vcombine.high %v5891_v3, %v5955_v40  ;;  %v5923_v19 = vpop.trf.xlu0 }
 0x361   : > { %v8619_v57 = vcombine.low %v5859_v11, %v5923_v19  ;;  %v8620_v47 = vcombine.high %v5859_v11, %v5923_v19  ;;  %v17041_v11 = vld [vmem:[#allocation39_spill] sm:$0xff]  ;;  %v8579_v19 = vcombine.low %v8523_v59, %v8539_v8  ;;  %v8555_v58 = vrot.slane %v8547_v43, %v14220_v13 }
 0x362   : > { %12850 = vxpose.xlu1.b32.cont [14/16] %v17039_v41, 128  ;;  %12738 = vxpose.xlu0.b32.cont [14/16] %v17040_v48, 128  ;;  %v8643_v10 = vrot.slane %v8635_v2, %v13817_v26  ;;  %v8650_v46 = vrot.slane %v8636_v36, %v13817_v26 }
 0x363   : > { %v8627_v3 = vrot.slane %v8619_v57, %v13817_v26  ;;  %v8634_v61 = vrot.slane %v8620_v47, %v13817_v26  ;;  %v17043_v47 = vld [vmem:[#allocation41_spill] sm:$0xff] }
 0x365   : > { %v6019_v29 = vpop.trf.xlu1  ;;  %v8684_v40 = vcombine.high %v8627_v3, %v8643_v10  ;;  %v8699_v2 = vcombine.low %v8634_v61, %v8650_v46  ;;  %v8700_v36 = vcombine.high %v8634_v61, %v8650_v46  ;;  %v8683_v63 = vcombine.low %v8627_v3, %v8643_v10 }
 0x366   : > { %12852 = vxpose.xlu1.b32.cont [15/16] %v17041_v11, 128  ;;  %v5987_v14 = vpop.trf.xlu0  ;;  %12740 = vxpose.xlu0.b32.cont [15/16] %v17042_v31, 128  ;;  %v17044_v11 = vld [vmem:[#allocation42_spill] sm:$0xff]  ;;  %v8587_v61 = vrot.slane %v8579_v19, %v14220_v13 }
 0x367   : > { %v8691_v30 = vrot.slane %v8683_v63, %v14220_v13  ;;  %v8698_v19 = vrot.slane %v8684_v40, %v14220_v13  ;;  %v8714_v40 = vrot.slane %v8700_v36, %v14220_v13 }
 0x369   : > { %v6083_v41 = vpop.trf.xlu1 }
 0x36a   : > { %v8667_v48 = vcombine.low %v6019_v29, %v6083_v41  ;;  %v8668_v57 = vcombine.high %v6019_v29, %v6083_v41  ;;  %12854 = vxpose.xlu1.b32.end [16/16] %v17043_v47, 128  ;;  %v6051_v44 = vpop.trf.xlu0  ;;  %12742 = vxpose.xlu0.b32.end [16/16] %v17044_v11, 128  ;;  %v17045_v29 = vld [vmem:[#allocation43_spill] sm:$0xff]  ;;  %v17047_v11 = vld [vmem:[#allocation45_spill] sm:$0xff] }
 0x36b   : > { %v8651_v54 = vcombine.low %v5987_v14, %v6051_v44  ;;  %v8652_v31 = vcombine.high %v5987_v14, %v6051_v44  ;;  %v17046_v44 = vld [vmem:[#allocation44_spill] sm:$0xff] }
 0x36c   : > { %v8675_v38 = vrot.slane %v8667_v48, %v13817_v26  ;;  %v8682_v34 = vrot.slane %v8668_v57, %v13817_v26 }
 0x36d   : > { %v8659_v46 = vrot.slane %v8651_v54, %v13817_v26  ;;  %v8666_v8 = vrot.slane %v8652_v31, %v13817_v26  ;;  %v15808_v59 = vpop.trf.xlu1 }
 0x36e   : > { %13048 = vxpose.xlu1.b32.start [1/16] %v17045_v29, 128  ;;  %v15812_v41 = vpop.trf.xlu0  ;;  %12936 = vxpose.xlu0.b32.start [1/16] %v17046_v44, 128  ;;  %v17048_v29 = vld [vmem:[#allocation46_spill] sm:$0xff] }
 0x36f   : > { %v8715_v14 = vcombine.low %v8659_v46, %v8675_v38  ;;  %v8716_v48 = vcombine.high %v8659_v46, %v8675_v38  ;;  %v8731_v57 = vcombine.low %v8666_v8, %v8682_v34  ;;  %v8732_v47 = vcombine.high %v8666_v8, %v8682_v34 }
 0x370   : > { %v8611_v34 = vcombine.low %v8555_v58, %v8587_v61  ;;  %v8612_v46 = vcombine.high %v8555_v58, %v8587_v61  ;;  %v8707_v8 = vrot.slane %v8699_v2, %v14220_v13  ;;  %v17051_v61 = vcombine.low %v15763_v4, %v15766_v37 }
 0x371   : > { %v15817_v10 = vpop.trf.xlu1  ;;  %v8723_v3 = vrot.slane %v8715_v14, %v14220_v13  ;;  %v8730_v54 = vrot.slane %v8716_v48, %v14220_v13  ;;  %v8739_v38 = vrot.slane %v8731_v57, %v14220_v13  ;;  %v8746_v48 = vrot.slane %v8732_v47, %v14220_v13 }
 0x372   : > { %13050 = vxpose.xlu1.b32.cont [2/16] %v17047_v11, 128  ;;  %v15823_v31 = vpop.trf.xlu0  ;;  %12938 = vxpose.xlu0.b32.cont [2/16] %v17048_v29, 128  ;;  %v17052_v2 = vcombine.high %v15763_v4, %v15766_v37  ;;  %v17056_v4 = vld [vmem:[#allocation50_spill] sm:$0xff]  ;;  %v17057_v37 = vcombine.high %v15777_v35, %v15769_v50 }
 0x373   : > { %v8747_v43 = vcombine.low %v8691_v30, %v8723_v3  ;;  %v8748_v63 = vcombine.high %v8691_v30, %v8723_v3  ;;  %v8749_v44 = vcombine.low %v8698_v19, %v8730_v54  ;;  %v8750_v14 = vcombine.high %v8698_v19, %v8730_v54  ;;  %v17055_v19 = vld [vmem:[#allocation49_spill] sm:$0xff] }
 0x374   : > { %v8751_v47 = vcombine.low %v8707_v8, %v8739_v38  ;;  %v8753_v30 = vcombine.low %v8714_v40, %v8746_v48  ;;  %v8754_v3 = vcombine.high %v8714_v40, %v8746_v48 }
 0x375   : > { %v6275_v0 = vpop.trf.xlu1  ;;  %v11967_v11 = vpack.c.bf16 %v8747_v43, %v8611_v34  ;;  %v11999_v42 = vpack.c.bf16 %v8748_v63, %v8612_v46  ;;  %v15835_v57 = vpack.c.bf16 %v8749_v44, %v17051_v61  ;;  %v15840_v58 = vpack.c.bf16 %v8750_v14, %v17052_v2 }
 0x376   : > { %13052 = vxpose.xlu1.b32.cont [3/16] %v17049_v25, 128  ;;  %v6243_v29 = vpop.trf.xlu0  ;;  %12940 = vxpose.xlu0.b32.cont [3/16] %v17050_v49, 128  ;;  %v17053_v25 = vcombine.low %v15777_v35, %v15769_v50  ;;  %v8752_v49 = vcombine.high %v8707_v8, %v8739_v38  ;;  %v17059_v46 = vcombine.low %v15780_v6, %v15772_v62  ;;  %v17063_v35 = vld [vmem:[#allocation51_spill] sm:$0xff] }
 0x377   : > { %11968 = vmatprep.subr.bf16.mxu0 %v11967_v11  ;;  %12000 = vmatprep.subr.bf16.mxu1 %v11999_v42 }
 0x378   : > { %11970 = vmatpush3.bf16.msra.mxu0 %v11967_v11  ;;  %v15845_v36 = vpack.c.bf16 %v8751_v47, %v17053_v25  ;;  %12002 = vmatpush3.bf16.msra.mxu1 %v11999_v42  ;;  %v15852_v43 = vpack.c.bf16 %v8752_v49, %v17057_v37  ;;  %v15857_v63 = vpack.c.bf16 %v8753_v30, %v17059_v46  ;;  %v17064_v11 = vld [vmem:[#allocation52_spill] sm:$0xff]  ;;  %v17065_v25 = vld [vmem:[#allocation53_spill] sm:$0xff]  ;;  %v17066_v30 = vld [vmem:[#allocation54_spill] sm:$0xff] }
 0x379   : > { %v6339_v54 = vpop.trf.xlu1  ;;  %v17061_v42 = vcombine.high %v15780_v6, %v15772_v62  ;;  %v8772_v37 = vcombine.high %v15808_v59, %v15817_v10  ;;  %v8755_v46 = vcombine.low %v15812_v41, %v15823_v31 }
 0x37a   : > { %17054 = vst [vmem:[#allocation101_spill] sm:$0xff] %v15845_v36  ;;  %13054 = vxpose.xlu1.b32.cont [4/16] %v17055_v19, 128  ;;  %v6307_v34 = vpop.trf.xlu0  ;;  %12942 = vxpose.xlu0.b32.cont [4/16] %v17056_v4, 128  ;;  %17058 = vst [vmem:[#allocation105_spill] sm:$0xff] %v15852_v43  ;;  %v8804_v38 = vcombine.high %v6275_v0, %v6339_v54  ;;  %v8803_v6 = vcombine.low %v6275_v0, %v6339_v54 }
 0x37b   : > { %17060 = vst [vmem:[#allocation103_spill] sm:$0xff] %v15857_v63  ;;  %v8788_v8 = vcombine.high %v6243_v29, %v6307_v34  ;;  %v15862_v44 = vpack.c.bf16 %v8754_v3, %v17061_v42  ;;  %v8787_v2 = vcombine.low %v6243_v29, %v6307_v34  ;;  %v8771_v4 = vcombine.low %v15808_v59, %v15817_v10  ;;  %v17067_v42 = vld [vmem:[#allocation55_spill] sm:$0xff] }
 0x37c   : > { %v15865_v14 = vrot.slane %v8804_v38, %v13817_v26  ;;  %v8756_v0 = vcombine.high %v15812_v41, %v15823_v31  ;;  %v15887_v29 = vrot.slane %v8803_v6, %v13817_v26 }
 0x37d   : > { %17062 = vst [vmem:[#allocation113_spill] sm:$0xff] %v15862_v44  ;;  %v15868_v48 = vrot.slane %v8788_v8, %v13817_v26  ;;  %v6403_v50 = vpop.trf.xlu1  ;;  %v15896_v38 = vrot.slane %v8787_v2, %v13817_v26  ;;  %v15905_v6 = vrot.slane %v8771_v4, %v13817_v26  ;;  %v15908_v2 = vrot.slane %v8755_v46, %v13817_v26  ;;  %v17070_v4 = vld [vmem:[#allocation58_spill] sm:$0xff] }
 0x37e   : > { %13056 = vxpose.xlu1.b32.cont [5/16] %v17063_v35, 128  ;;  %v6371_v40 = vpop.trf.xlu0  ;;  %12944 = vxpose.xlu0.b32.cont [5/16] %v17064_v11, 128  ;;  %v17068_v11 = vld [vmem:[#allocation56_spill] sm:$0xff] }
 0x381   : > { %v6467_v47 = vpop.trf.xlu1 }
 0x382   : > { %13058 = vxpose.xlu1.b32.cont [6/16] %v17065_v25, 128  ;;  %v6435_v49 = vpop.trf.xlu0  ;;  %12946 = vxpose.xlu0.b32.cont [6/16] %v17066_v30, 128  ;;  %v8908_v3 = vcombine.high %v6403_v50, %v6467_v47  ;;  %v8907_v8 = vcombine.low %v6403_v50, %v6467_v47  ;;  %v8786_v50 = vrot.slane %v8772_v37, %v13817_v26 }
 0x383   : > { %v8892_v19 = vcombine.high %v6371_v40, %v6435_v49  ;;  %v8891_v59 = vcombine.low %v6371_v40, %v6435_v49  ;;  %v8770_v40 = vrot.slane %v8756_v0, %v13817_v26  ;;  %v8851_v47 = vcombine.low %v15896_v38, %v15887_v29 }
 0x384   : > { %v15890_v54 = vrot.slane %v8908_v3, %v13817_v26  ;;  %v15915_v25 = vrot.slane %v8907_v8, %v13817_v26  ;;  %v17069_v3 = vld [vmem:[#allocation57_spill] sm:$0xff]  ;;  %v8819_v0 = vcombine.low %v15908_v2, %v15905_v6 }
 0x385   : > { %v15893_v34 = vrot.slane %v8892_v19, %v13817_v26  ;;  %v6531_v10 = vpop.trf.xlu1  ;;  %v15918_v49 = vrot.slane %v8891_v59, %v13817_v26  ;;  %v8835_v62 = vcombine.low %v8770_v40, %v8786_v50  ;;  %v8836_v61 = vcombine.high %v8770_v40, %v8786_v50 }
 0x386   : > { %13060 = vxpose.xlu1.b32.cont [7/16] %v17067_v42, 128  ;;  %v6499_v35 = vpop.trf.xlu0  ;;  %12948 = vxpose.xlu0.b32.cont [7/16] %v17068_v11, 128  ;;  %v8827_v40 = vrot.slane %v8819_v0, %v14220_v13 }
 0x387   : > { %v8971_v41 = vcombine.low %v15893_v34, %v15890_v54  ;;  %v8850_v39 = vrot.slane %v8836_v61, %v14220_v13  ;;  %v17076_v61 = vcombine.high %v15868_v48, %v15865_v14 }
 0x389   : > { %v6595_v30 = vpop.trf.xlu1  ;;  %v8979_v32 = vrot.slane %v8971_v41, %v14220_v13  ;;  %v17079_v41 = vcombine.high %v15893_v34, %v15890_v54  ;;  %v17083_v54 = vld [vmem:[#allocation66_spill] sm:$0xff] }
 0x38a   : > { %13062 = vxpose.xlu1.b32.cont [8/16] %v17069_v3, 128  ;;  %v6563_v19 = vpop.trf.xlu0  ;;  %12950 = vxpose.xlu0.b32.cont [8/16] %v17070_v4, 128  ;;  %v8939_v46 = vcombine.low %v6531_v10, %v6595_v30  ;;  %v8940_v42 = vcombine.high %v6531_v10, %v6595_v30  ;;  %v8955_v10 = vcombine.low %v15918_v49, %v15915_v25  ;;  %v17072_v4 = vld [vmem:[#allocation60_spill] sm:$0xff] }
 0x38b   : > { %v8923_v37 = vcombine.low %v6499_v35, %v6563_v19  ;;  %v8924_v11 = vcombine.high %v6499_v35, %v6563_v19  ;;  %v17071_v35 = vld [vmem:[#allocation59_spill] sm:$0xff] }
 0x38c   : > { %v15925_v31 = vrot.slane %v8939_v46, %v13817_v26  ;;  %v8954_v8 = vrot.slane %v8940_v42, %v13817_v26  ;;  %v8859_v46 = vrot.slane %v8851_v47, %v14220_v13  ;;  %v8963_v44 = vrot.slane %v8955_v10, %v14220_v13 }
 0x38d   : > { %v15929_v59 = vrot.slane %v8923_v37, %v13817_v26  ;;  %v8938_v3 = vrot.slane %v8924_v11, %v13817_v26  ;;  %v15934_v30 = vpop.trf.xlu1  ;;  %v8843_v47 = vrot.slane %v8835_v62, %v14220_v13  ;;  %v8882_v62 = vrot.slane %v17076_v61, %v14220_v13 }
 0x38e   : > { %13064 = vxpose.xlu1.b32.cont [9/16] %v17071_v35, 128  ;;  %v15937_v19 = vpop.trf.xlu0  ;;  %12952 = vxpose.xlu0.b32.cont [9/16] %v17072_v4, 128  ;;  %v17073_v35 = vld [vmem:[#allocation61_spill] sm:$0xff]  ;;  %v17074_v4 = vld [vmem:[#allocation62_spill] sm:$0xff] }
 0x38f   : > { %v8987_v42 = vcombine.low %v15929_v59, %v15925_v31  ;;  %v9003_v37 = vcombine.low %v8938_v3, %v8954_v8  ;;  %v9004_v11 = vcombine.high %v8938_v3, %v8954_v8  ;;  %v17075_v8 = vcombine.low %v15868_v48, %v15865_v14 }
 0x391   : > { %v8995_v50 = vrot.slane %v8987_v42, %v14220_v13  ;;  %v15946_v63 = vpop.trf.xlu1  ;;  %v8875_v3 = vrot.slane %v17075_v8, %v14220_v13  ;;  %v8883_v42 = vcombine.low %v8827_v40, %v8859_v46  ;;  %v9018_v43 = vrot.slane %v9004_v11, %v14220_v13 }
 0x392   : > { %13066 = vxpose.xlu1.b32.cont [10/16] %v17073_v35, 128  ;;  %v15949_v5 = vpop.trf.xlu0  ;;  %12954 = vxpose.xlu0.b32.cont [10/16] %v17074_v4, 128  ;;  %v9044_v0 = vcombine.high %v15934_v30, %v15946_v63  ;;  %v9011_v35 = vrot.slane %v9003_v37, %v14220_v13  ;;  %v8884_v4 = vcombine.high %v8827_v40, %v8859_v46 }
 0x393   : > { %v9028_v10 = vcombine.high %v15937_v19, %v15949_v5  ;;  %v9019_v1 = vcombine.low %v8963_v44, %v8995_v50  ;;  %v9020_v9 = vcombine.high %v8963_v44, %v8995_v50  ;;  %v8887_v14 = vcombine.low %v8843_v47, %v8875_v3 }
 0x394   : > { %v9058_v8 = vrot.slane %v9044_v0, %v13817_v26  ;;  %v8888_v48 = vcombine.high %v8843_v47, %v8875_v3  ;;  %v8986_v0 = vrot.slane %v17079_v41, %v14220_v13  ;;  %v9023_v11 = vcombine.low %v8979_v32, %v9011_v35 }
 0x395   : > { %v9042_v33 = vrot.slane %v9028_v10, %v13817_v26  ;;  %v6787_v36 = vpop.trf.xlu1  ;;  %v11971_v44 = vpack.c.bf16 %v9019_v1, %v8883_v42  ;;  %v12003_v46 = vpack.c.bf16 %v9020_v9, %v8884_v4  ;;  %v9024_v10 = vcombine.high %v8979_v32, %v9011_v35 }
 0x396   : > { %13068 = vxpose.xlu1.b32.cont [11/16] %v17077_v21, 128  ;;  %v6755_v37 = vpop.trf.xlu0  ;;  %12956 = vxpose.xlu0.b32.cont [11/16] %v17078_v60, 128  ;;  %v8889_v21 = vcombine.low %v8850_v39, %v8882_v62  ;;  %v17080_v60 = vld [vmem:[#allocation65_spill] sm:$0xff]  ;;  %v15978_v1 = vpack.c.bf16 %v9023_v11, %v8887_v14  ;;  %v9025_v47 = vcombine.low %v8986_v0, %v9018_v43 }
 0x397   : > { %v9107_v50 = vcombine.low %v9042_v33, %v9058_v8  ;;  %v9108_v40 = vcombine.high %v9042_v33, %v9058_v8  ;;  %11972 = vmatprep.subr.bf16.mxu0 %v11971_v44  ;;  %12004 = vmatprep.subr.bf16.mxu1 %v12003_v46  ;;  %v15980_v33 = vpack.c.bf16 %v9024_v10, %v8888_v48  ;;  %v17087_v10 = vld [vmem:[#allocation68_spill] sm:$0xff] }
 0x398   : > { %11974 = vmatpush3.bf16.msra.mxu0 %v11971_v44  ;;  %12006 = vmatpush3.bf16.msra.mxu1 %v12003_v46  ;;  %17081 = vst [vmem:[#allocation77_spill] sm:$0xff] %v15978_v1  ;;  %v15983_v34 = vpack.c.bf16 %v9025_v47, %v8889_v21  ;;  %v8890_v4 = vcombine.high %v8850_v39, %v8882_v62  ;;  %v17085_v44 = vld [vmem:[#allocation67_spill] sm:$0xff]  ;;  %v17088_v21 = vld [vmem:[#allocation69_spill] sm:$0xff] }
 0x399   : > { %v6851_v61 = vpop.trf.xlu1  ;;  %17082 = vst [vmem:[#allocation106_spill] sm:$0xff] %v15980_v33  ;;  %v9026_v32 = vcombine.high %v8986_v0, %v9018_v43  ;;  %v9043_v39 = vcombine.low %v15934_v30, %v15946_v63  ;;  %v9027_v43 = vcombine.low %v15937_v19, %v15949_v5 }
 0x39a   : > { %13070 = vxpose.xlu1.b32.cont [12/16] %v17080_v60, 128  ;;  %v6819_v9 = vpop.trf.xlu0  ;;  %v9076_v3 = vcombine.high %v6787_v36, %v6851_v61  ;;  %12958 = vxpose.xlu0.b32.cont [12/16] %v17083_v54, 128  ;;  %17084 = vst [vmem:[#allocation104_spill] sm:$0xff] %v15983_v34  ;;  %v9075_v60 = vcombine.low %v6787_v36, %v6851_v61 }
 0x39b   : > { %v9060_v42 = vcombine.high %v6755_v37, %v6819_v9  ;;  %v15988_v41 = vpack.c.bf16 %v9026_v32, %v8890_v4  ;;  %v9059_v54 = vcombine.low %v6755_v37, %v6819_v9  ;;  %v16006_v36 = vrot.slane %v9108_v40, %v14220_v13  ;;  %v17089_v37 = vld [vmem:[#allocation70_spill] sm:$0xff] }
 0x39c   : > { %v9090_v35 = vrot.slane %v9076_v3, %v13817_v26  ;;  %v16010_v5 = vrot.slane %v9075_v60, %v13817_v26  ;;  %v16016_v4 = vrot.slane %v9043_v39, %v13817_v26 }
 0x39d   : > { %v9074_v8 = vrot.slane %v9060_v42, %v13817_v26  ;;  %v6915_v46 = vpop.trf.xlu1  ;;  %17086 = vst [vmem:[#allocation110_spill] sm:$0xff] %v15988_v41  ;;  %v16003_v42 = vrot.slane %v9107_v50, %v14220_v13  ;;  %v16013_v19 = vrot.slane %v9059_v54, %v13817_v26  ;;  %v16019_v50 = vrot.slane %v9027_v43, %v13817_v26  ;;  %v17091_v54 = vld [vmem:[#allocation72_spill] sm:$0xff] }
 0x39e   : > { %13072 = vxpose.xlu1.b32.cont [13/16] %v17085_v44, 128  ;;  %v6883_v14 = vpop.trf.xlu0  ;;  %12960 = vxpose.xlu0.b32.cont [13/16] %v17087_v10, 128 }
 0x39f   : > { %v9139_v48 = vcombine.low %v9074_v8, %v9090_v35  ;;  %v9140_v11 = vcombine.high %v9074_v8, %v9090_v35  ;;  %v17090_v35 = vld [vmem:[#allocation71_spill] sm:$0xff]  ;;  %v9123_v39 = vcombine.low %v16013_v19, %v16010_v5 }
 0x3a1   : > { %v15996_v62 = vrot.slane %v9139_v48, %v14220_v13  ;;  %v15999_v0 = vrot.slane %v9140_v11, %v14220_v13 }
 0x3a2   : > { %13074 = vxpose.xlu1.b32.cont [14/16] %v17088_v21, 128  ;;  %v6979_v47 = vpop.trf.xlu1  ;;  %v6947_v3 = vpop.trf.xlu0  ;;  %12962 = vxpose.xlu0.b32.cont [14/16] %v17089_v37, 128 }
 0x3a3   : > { %v9180_v63 = vcombine.high %v6915_v46, %v6979_v47  ;;  %v9164_v30 = vcombine.high %v6883_v14, %v6947_v3  ;;  %v9179_v61 = vcombine.low %v6915_v46, %v6979_v47  ;;  %v9163_v9 = vcombine.low %v6883_v14, %v6947_v3  ;;  %v17092_v47 = vld [vmem:[#allocation73_spill] sm:$0xff] }
 0x3a4   : > { %v9159_v48 = vcombine.low %v16003_v42, %v15996_v62  ;;  %v9160_v46 = vcombine.high %v16003_v42, %v15996_v62  ;;  %v9091_v62 = vcombine.low %v16019_v50, %v16016_v4 }
 0x3a5   : > { %v9194_v40 = vrot.slane %v9180_v63, %v13817_v26  ;;  %v9178_v32 = vrot.slane %v9164_v30, %v13817_v26  ;;  %v16036_v43 = vrot.slane %v9179_v61, %v13817_v26  ;;  %v16039_v21 = vrot.slane %v9163_v9, %v13817_v26 }
 0x3a6   : > { %13076 = vxpose.xlu1.b32.cont [15/16] %v17090_v35, 128  ;;  %v7043_v8 = vpop.trf.xlu1  ;;  %v7011_v44 = vpop.trf.xlu0  ;;  %12964 = vxpose.xlu0.b32.cont [15/16] %v17091_v54, 128  ;;  %v9131_v35 = vrot.slane %v9123_v39, %v14220_v13 }
 0x3a7   : > { %v9243_v10 = vcombine.low %v9178_v32, %v9194_v40  ;;  %v9244_v60 = vcombine.high %v9178_v32, %v9194_v40  ;;  %v17093_v32 = vld [vmem:[#allocation74_spill] sm:$0xff]  ;;  %v9227_v61 = vcombine.low %v16039_v21, %v16036_v43 }
 0x3a9   : > { %v9235_v41 = vrot.slane %v9227_v61, %v14220_v13  ;;  %v9251_v52 = vrot.slane %v9243_v10, %v14220_v13 }
 0x3aa   : > { %13078 = vxpose.xlu1.b32.end [16/16] %v17092_v47, 128  ;;  %v7107_v3 = vpop.trf.xlu1  ;;  %v7075_v42 = vpop.trf.xlu0  ;;  %12966 = vxpose.xlu0.b32.end [16/16] %v17093_v32, 128 }
 0x3ab   : > { %v9211_v63 = vcombine.low %v7043_v8, %v7107_v3  ;;  %v9212_v30 = vcombine.high %v7043_v8, %v7107_v3  ;;  %v9195_v37 = vcombine.low %v7011_v44, %v7075_v42  ;;  %v9196_v40 = vcombine.high %v7011_v44, %v7075_v42 }
 0x3ac   : > { %v9099_v44 = vrot.slane %v9091_v62, %v14220_v13 }
 0x3ad   : > { %v16049_v9 = vrot.slane %v9211_v63, %v13817_v26  ;;  %v9226_v54 = vrot.slane %v9212_v30, %v13817_v26  ;;  %v16053_v47 = vrot.slane %v9195_v37, %v13817_v26  ;;  %v9210_v11 = vrot.slane %v9196_v40, %v13817_v26 }
 0x3ae   : > { %v12743_v8 = vpop.trf.xlu0  ;;  %v16056_v3 = vpop.trf.xlu1  ;;  %v9155_v37 = vcombine.low %v9099_v44, %v9131_v35  ;;  %v9156_v26 = vcombine.high %v9099_v44, %v9131_v35  ;;  %v9258_v44 = vrot.slane %v9244_v60, %v14220_v13 }
 0x3af   : > { %v9259_v39 = vcombine.low %v16053_v47, %v16049_v9  ;;  %v9275_v42 = vcombine.low %v9210_v11, %v9226_v54  ;;  %v9276_v32 = vcombine.high %v9210_v11, %v9226_v54  ;;  %v12744_v14 = vunpack.i.l.bf16 %v12743_v8 }
 0x3b0   : > { %v12747_v63 = vunpack.i.h.bf16 %v12743_v8 }
 0x3b1   : > { %v9267_v30 = vrot.slane %v9259_v39, %v14220_v13  ;;  %v9283_v34 = vrot.slane %v9275_v42, %v14220_v13  ;;  %11531 = vmatprep.mubr.f32.mxu0 %v12744_v14  ;;  %v9290_v8 = vrot.slane %v9276_v32, %v14220_v13 }
 0x3b2   : > { %v12748_v40 = vpop.trf.xlu0  ;;  %11587 = vmatprep.mubr.f32.mxu1 %v12747_v63  ;;  %v16064_v33 = vpop.trf.xlu1 }
 0x3b3   : > { %v9291_v62 = vcombine.low %v9235_v41, %v9267_v30  ;;  %v9292_v1 = vcombine.high %v9235_v41, %v9267_v30  ;;  %v9295_v39 = vcombine.low %v9251_v52, %v9283_v34  ;;  %v9296_v15 = vcombine.high %v9251_v52, %v9283_v34 }
 0x3b4   : > { %v12749_v14 = vunpack.i.l.bf16 %v12748_v40  ;;  %v12752_v35 = vunpack.i.h.bf16 %v12748_v40  ;;  %v9297_v34 = vcombine.low %v9258_v44, %v9290_v8  ;;  %v9298_v32 = vcombine.high %v9258_v44, %v9290_v8 }
 0x3b5   : > { %v11975_v11 = vpack.c.bf16 %v9291_v62, %v9155_v37  ;;  %v12007_v54 = vpack.c.bf16 %v9292_v1, %v9156_v26  ;;  %v16073_v26 = vpack.c.bf16 %v9295_v39, %v9159_v48  ;;  %v16075_v1 = vpack.c.bf16 %v9296_v15, %v9160_v46 }
 0x3b6   : > { %v12753_v61 = vpop.trf.xlu0  ;;  %v16068_v53 = vpop.trf.xlu1  ;;  %v17094_v15 = vcombine.low %v16006_v36, %v15999_v0  ;;  %v17095_v46 = vcombine.high %v16006_v36, %v15999_v0  ;;  %v8852_v62 = vcombine.high %v15896_v38, %v15887_v29  ;;  %v8988_v0 = vcombine.high %v15929_v59, %v15925_v31 }
 0x3b7   : > { %11976 = vmatprep.subr.bf16.mxu0 %v11975_v11  ;;  %12008 = vmatprep.subr.bf16.mxu1 %v12007_v54  ;;  %v12754_v10 = vunpack.i.l.bf16 %v12753_v61  ;;  %v12757_v42 = vunpack.i.h.bf16 %v12753_v61  ;;  %v8820_v36 = vcombine.high %v15908_v2, %v15905_v6  ;;  %v9260_v2 = vcombine.high %v16053_v47, %v16049_v9 }
 0x3b8   : > { %11978 = vmatpush3.bf16.msra.mxu0 %v11975_v11  ;;  %12010 = vmatpush3.bf16.msra.mxu1 %v12007_v54  ;;  %v16086_v48 = vpack.c.bf16 %v9297_v34, %v17094_v15  ;;  %v16091_v30 = vpack.c.bf16 %v9298_v32, %v17095_v46  ;;  %v8956_v11 = vcombine.high %v15918_v49, %v15915_v25 }
 0x3b9   : > { %12012 = vmatprep.subr.bf16.mxu0 %v15062_v22  ;;  %12044 = vmatprep.subr.bf16.mxu1 %v15067_v7  ;;  %v8866_v38 = vrot.slane %v8852_v62, %v14220_v13  ;;  %v9002_v31 = vrot.slane %v8988_v0, %v14220_v13  ;;  %v9124_v8 = vcombine.high %v16013_v19, %v16010_v5 }
 0x3ba   : > { %v12758_v41 = vpop.trf.xlu0  ;;  %v16077_v52 = vpop.trf.xlu1  ;;  %v8970_v6 = vrot.slane %v8956_v11, %v14220_v13  ;;  %v9228_v61 = vcombine.high %v16039_v21, %v16036_v43 }
 0x3bb   : > { %11532 = vmatmul.mubr.f32.vlgmr.msra.gmra.mrb[0].mxu0 %v12749_v14  ;;  %11588 = vmatmul.mubr.f32.vlgmr.msra.gmra.mrb[0].mxu1 %v12752_v35  ;;  %v12759_v60 = vunpack.i.l.bf16 %v12758_v41  ;;  %v12762_v63 = vunpack.i.h.bf16 %v12758_v41  ;;  %v9092_v14 = vcombine.high %v16019_v50, %v16016_v4  ;;  %v9274_v35 = vrot.slane %v9260_v2, %v14220_v13 }
 0x3bc   : > { %12014 = vmatpush3.bf16.msra.mxu0 %v15062_v22  ;;  %12046 = vmatpush3.bf16.msra.mxu1 %v15067_v7  ;;  %v9021_v47 = vcombine.low %v8970_v6, %v9002_v31  ;;  %v9022_v39 = vcombine.high %v8970_v6, %v9002_v31  ;;  %v9138_v21 = vrot.slane %v9124_v8, %v14220_v13 }
 0x3bd   : > { %12016 = vmatprep.subr.bf16.mxu0 %v15281_v17  ;;  %12048 = vmatprep.subr.bf16.mxu1 %v15286_v56  ;;  %v9242_v44 = vrot.slane %v9228_v61, %v14220_v13  ;;  %v9106_v41 = vrot.slane %v9092_v14, %v14220_v13  ;;  %v12856_v14 = vunpack.i.l.bf16 %v16056_v3 }
 0x3be   : > { %v12763_v37 = vpop.trf.xlu0  ;;  %11534 = vmatprep.mubr.f32.mxu0 %v12754_v10  ;;  %11590 = vmatprep.mubr.f32.mxu1 %v12757_v42  ;;  %v16093_v22 = vpop.trf.xlu1 }
 0x3bf   : > { %11535 = vmatmul.mubr.f32.gmra.mrb[2].mxu0 %v12759_v60  ;;  %11591 = vmatmul.mubr.f32.gmra.mrb[2].mxu1 %v12762_v63  ;;  %v12764_v7 = vunpack.i.l.bf16 %v12763_v37  ;;  %v12767_v40 = vunpack.i.h.bf16 %v12763_v37  ;;  %v9293_v42 = vcombine.low %v9242_v44, %v9274_v35  ;;  %v9294_v34 = vcombine.high %v9242_v44, %v9274_v35 }
 0x3c0   : > { %12018 = vmatpush3.bf16.msra.mxu0 %v15281_v17  ;;  %12050 = vmatpush3.bf16.msra.mxu1 %v15286_v56  ;;  %v12859_v35 = vunpack.i.h.bf16 %v16056_v3  ;;  %v12869_v3 = vunpack.i.h.bf16 %v16068_v53 }
 0x3c1   : > { %12020 = vmatprep.subr.bf16.mxu0 %v15478_v18  ;;  %12052 = vmatprep.subr.bf16.mxu1 %v15483_v24 }
 0x3c2   : > { %v12768_v54 = vpop.trf.xlu0  ;;  %11537 = vmatprep.mubr.f32.mxu0 %v12764_v7  ;;  %11593 = vmatprep.mubr.f32.mxu1 %v12767_v40  ;;  %v16107_v17 = vpop.trf.xlu1 }
 0x3c3   : > { %v12769_v56 = vunpack.i.l.bf16 %v12768_v54  ;;  %v12772_v29 = vunpack.i.h.bf16 %v12768_v54 }
 0x3c4   : > { %12022 = vmatpush3.bf16.msra.mxu0 %v15478_v18  ;;  %12054 = vmatpush3.bf16.msra.mxu1 %v15483_v24  ;;  %v8834_v18 = vrot.slane %v8820_v36, %v14220_v13 }
 0x3c5   : > { %12024 = vmatprep.subr.bf16.mxu0 %v15615_v51  ;;  %12056 = vmatprep.subr.bf16.mxu1 %v15620_v12 }
 0x3c6   : > { %v12773_v25 = vpop.trf.xlu0  ;;  %11538 = vmatmul.mubr.f32.gmra.mrb[4].mxu0 %v12769_v56  ;;  %11594 = vmatmul.mubr.f32.gmra.mrb[4].mxu1 %v12772_v29  ;;  %v16119_v49 = vpop.trf.xlu1  ;;  %v8885_v9 = vcombine.low %v8834_v18, %v8866_v38  ;;  %v8886_v19 = vcombine.high %v8834_v18, %v8866_v38 }
 0x3c7   : > { %v12774_v24 = vunpack.i.l.bf16 %v12773_v25  ;;  %v12777_v59 = vunpack.i.h.bf16 %v12773_v25 }
 0x3c8   : > { %12026 = vmatpush3.bf16.msra.mxu0 %v15615_v51  ;;  %12058 = vmatpush3.bf16.msra.mxu1 %v15620_v12  ;;  %v12035_v4 = vpack.c.bf16 %v9021_v47, %v8885_v9  ;;  %v12067_v50 = vpack.c.bf16 %v9022_v39, %v8886_v19 }
 0x3c9   : > { %12028 = vmatprep.subr.bf16.mxu0 %v15725_v27  ;;  %12060 = vmatprep.subr.bf16.mxu1 %v15730_v16 }
 0x3ca   : > { %v12778_v5 = vpop.trf.xlu0  ;;  %11540 = vmatprep.mubr.f32.mxu0 %v12774_v24  ;;  %11596 = vmatprep.mubr.f32.mxu1 %v12777_v59  ;;  %v16132_v43 = vpop.trf.xlu1 }
 0x3cb   : > { %v12779_v51 = vunpack.i.l.bf16 %v12778_v5  ;;  %v12782_v12 = vunpack.i.h.bf16 %v12778_v5 }
 0x3cc   : > { %12030 = vmatpush3.bf16.msra.mxu0 %v15725_v27  ;;  %12062 = vmatpush3.bf16.msra.mxu1 %v15730_v16  ;;  %v9157_v27 = vcombine.low %v9106_v41, %v9138_v21  ;;  %v9158_v16 = vcombine.high %v9106_v41, %v9138_v21  ;;  %v12861_v21 = vunpack.i.l.bf16 %v16064_v33  ;;  %v12871_v41 = vunpack.i.l.bf16 %v16077_v52 }
 0x3cd   : > { %12032 = vmatprep.subr.bf16.mxu0 %v15835_v57  ;;  %12064 = vmatprep.subr.bf16.mxu1 %v15840_v58 }
 0x3ce   : > { %v12783_v10 = vpop.trf.xlu0  ;;  %11541 = vmatmul.mubr.f32.gmra.mrb[6].mxu0 %v12779_v51  ;;  %11597 = vmatmul.mubr.f32.gmra.mrb[6].mxu1 %v12782_v12  ;;  %v16141_v32 = vpop.trf.xlu1  ;;  %v12039_v46 = vpack.c.bf16 %v9293_v42, %v9157_v27  ;;  %v12071_v37 = vpack.c.bf16 %v9294_v34, %v9158_v16  ;;  %v12864_v12 = vunpack.i.h.bf16 %v16064_v33  ;;  %v12879_v34 = vunpack.i.h.bf16 %v16093_v22  ;;  %v17097_v16 = vld [vmem:[#allocation118_spill] sm:$0xff] }
 0x3cf   : > { %v12784_v60 = vunpack.i.l.bf16 %v12783_v10  ;;  %v12787_v63 = vunpack.i.h.bf16 %v12783_v10  ;;  %v12874_v10 = vunpack.i.h.bf16 %v16077_v52  ;;  %v12889_v27 = vunpack.i.h.bf16 %v16119_v49 }
 0x3d0   : > { %12034 = vmatpush3.bf16.msra.mxu0 %v15835_v57  ;;  %12066 = vmatpush3.bf16.msra.mxu1 %v15840_v58 }
 0x3d1   : > { %12036 = vmatprep.subr.bf16.mxu0 %v12035_v4  ;;  %12068 = vmatprep.subr.bf16.mxu1 %v12067_v50 }
 0x3d2   : > { %v12788_v15 = vpop.trf.xlu0  ;;  %11543 = vmatprep.mubr.f32.mxu0 %v12784_v60  ;;  %11599 = vmatprep.mubr.f32.mxu1 %v12787_v63  ;;  %v16145_v7 = vpop.trf.xlu1  ;;  %v17096_v60 = vld [vmem:[#allocation94_spill] sm:$0xff] }
 0x3d3   : > { %v12789_v40 = vunpack.i.l.bf16 %v12788_v15  ;;  %v12792_v62 = vunpack.i.h.bf16 %v12788_v15  ;;  %v17098_v15 = vld [vmem:[#allocation109_spill] sm:$0xff] }
 0x3d4   : > { %12038 = vmatpush3.bf16.msra.mxu0 %v12035_v4  ;;  %12070 = vmatpush3.bf16.msra.mxu1 %v12067_v50  ;;  %v12866_v50 = vunpack.i.l.bf16 %v16068_v53  ;;  %v12876_v53 = vunpack.i.l.bf16 %v16093_v22  ;;  %v12886_v22 = vunpack.i.l.bf16 %v16119_v49  ;;  %v12896_v49 = vunpack.i.l.bf16 %v16141_v32 }
 0x3d5   : > { %12040 = vmatprep.subr.bf16.mxu0 %v12039_v46  ;;  %12072 = vmatprep.subr.bf16.mxu1 %v12071_v37 }
 0x3d6   : > { %v12793_v57 = vpop.trf.xlu0  ;;  %11544 = vmatmul.mubr.f32.gmra.mrb[8].mxu0 %v12789_v40  ;;  %11600 = vmatmul.mubr.f32.gmra.mrb[8].mxu1 %v12792_v62  ;;  %v16147_v58 = vpop.trf.xlu1  ;;  %v17099_v62 = vld [vmem:[#allocation76_spill] sm:$0xff] }
 0x3d7   : > { %v12794_v0 = vunpack.i.l.bf16 %v12793_v57  ;;  %v12797_v36 = vunpack.i.h.bf16 %v12793_v57  ;;  %v17100_v57 = vld [vmem:[#allocation100_spill] sm:$0xff] }
 0x3d8   : > { %12042 = vmatpush3.bf16.msra.mxu0 %v12039_v46  ;;  %12074 = vmatpush3.bf16.msra.mxu1 %v12071_v37  ;;  %v12899_v37 = vunpack.i.h.bf16 %v16141_v32  ;;  %v12906_v32 = vunpack.i.l.bf16 %v16147_v58 }
 0x3d9   : > { %12076 = vmatprep.subr.bf16.mxu0 %v15080_v23  ;;  %12108 = vmatprep.subr.bf16.mxu1 %v15085_v28 }
 0x3da   : > { %v12798_v11 = vpop.trf.xlu0  ;;  %11546 = vmatprep.mubr.f32.mxu0 %v12794_v0  ;;  %11602 = vmatprep.mubr.f32.mxu1 %v12797_v36  ;;  %v16151_v54 = vpop.trf.xlu1  ;;  %v12909_v36 = vunpack.i.h.bf16 %v16147_v58 }
 0x3db   : > { %v12799_v56 = vunpack.i.l.bf16 %v12798_v11  ;;  %v12802_v29 = vunpack.i.h.bf16 %v12798_v11  ;;  %v12914_v11 = vunpack.i.h.bf16 %v16151_v54 }
 0x3dd   : > { %11547 = vmatmul.mubr.f32.gmra.mrb[10].mxu0 %v12799_v56  ;;  %11603 = vmatmul.mubr.f32.gmra.mrb[10].mxu1 %v12802_v29  ;;  %v17101_v29 = vld [vmem:[#allocation101_spill] sm:$0xff] }
 0x3de   : > { %v12803_v38 = vpop.trf.xlu0  ;;  %v16153_v31 = vpop.trf.xlu1 }
 0x3df   : > { %v12804_v6 = vunpack.i.l.bf16 %v12803_v38  ;;  %v12807_v2 = vunpack.i.h.bf16 %v12803_v38  ;;  %v17102_v38 = vld [vmem:[#allocation105_spill] sm:$0xff]  ;;  %v12916_v58 = vunpack.i.l.bf16 %v16153_v31 }
 0x3e1   : > { %11549 = vmatprep.mubr.f32.mxu0 %v12804_v6  ;;  %11605 = vmatprep.mubr.f32.mxu1 %v12807_v2  ;;  %v12919_v2 = vunpack.i.h.bf16 %v16153_v31 }
 0x3e2   : > { %v12808_v25 = vpop.trf.xlu0  ;;  %v16155_v18 = vpop.trf.xlu1 }
 0x3e3   : > { %v12809_v24 = vunpack.i.l.bf16 %v12808_v25  ;;  %v12812_v59 = vunpack.i.h.bf16 %v12808_v25  ;;  %v12924_v25 = vunpack.i.h.bf16 %v16155_v18 }
 0x3e5   : > { %11550 = vmatmul.mubr.f32.gmra.mrb[12].mxu0 %v12809_v24  ;;  %11606 = vmatmul.mubr.f32.gmra.mrb[12].mxu1 %v12812_v59  ;;  %v17103_v59 = vld [vmem:[#allocation77_spill] sm:$0xff] }
 0x3e6   : > { %v12813_v8 = vpop.trf.xlu0  ;;  %v16157_v61 = vpop.trf.xlu1 }
 0x3e7   : > { %v12814_v9 = vunpack.i.l.bf16 %v12813_v8  ;;  %v12817_v47 = vunpack.i.h.bf16 %v12813_v8  ;;  %v17104_v8 = vld [vmem:[#allocation106_spill] sm:$0xff]  ;;  %v12926_v31 = vunpack.i.l.bf16 %v16157_v61 }
 0x3e9   : > { %11552 = vmatprep.mubr.f32.mxu0 %v12814_v9  ;;  %11608 = vmatprep.mubr.f32.mxu1 %v12817_v47  ;;  %v12929_v47 = vunpack.i.h.bf16 %v16157_v61 }
 0x3ea   : > { %v12818_v39 = vpop.trf.xlu0  ;;  %v16161_v5 = vpop.trf.xlu1 }
 0x3eb   : > { %v12819_v19 = vunpack.i.l.bf16 %v12818_v39  ;;  %v12822_v51 = vunpack.i.h.bf16 %v12818_v39  ;;  %v12934_v39 = vunpack.i.h.bf16 %v16161_v5 }
 0x3ed   : > { %11553 = vmatmul.mubr.f32.gmra.mrb[14].mxu0 %v12819_v19  ;;  %11609 = vmatmul.mubr.f32.gmra.mrb[14].mxu1 %v12822_v51 }
 0x3ee   : > { %11643 = vmatprep.mubr.f32.mxu0 %v12856_v14  ;;  %11699 = vmatprep.mubr.f32.mxu1 %v12859_v35  ;;  %v16165_v44 = vpop.trf.xlu1  ;;  %v16167_v4 = vpop.trf.xlu0 }
 0x3ef   : > { %v12968_v35 = vunpack.i.l.bf16 %v16167_v4  ;;  %v12971_v61 = vunpack.i.h.bf16 %v16167_v4 }
 0x3f1   : > { %11644 = vmatmul.mubr.f32.vlgmr.msra.gmra.mrb[16].mxu0 %v12861_v21  ;;  %11700 = vmatmul.mubr.f32.vlgmr.msra.gmra.mrb[16].mxu1 %v12864_v12  ;;  %v17105_v12 = vld [vmem:[#allocation95_spill] sm:$0xff]  ;;  %v17106_v21 = vld [vmem:[#allocation93_spill] sm:$0xff] }
 0x3f2   : > { %12078 = vmatpush3.bf16.msra.mxu0 %v15080_v23  ;;  %12110 = vmatpush3.bf16.msra.mxu1 %v15085_v28  ;;  %v16175_v33 = vpop.trf.xlu1  ;;  %v16179_v42 = vpop.trf.xlu0  ;;  %v12881_v23 = vunpack.i.l.bf16 %v16107_v17  ;;  %v12884_v28 = vunpack.i.h.bf16 %v16107_v17 }
 0x3f3   : > { %12080 = vmatprep.subr.bf16.mxu0 %v15299_v20  ;;  %12112 = vmatprep.subr.bf16.mxu1 %v15304_v55  ;;  %v12976_v19 = vunpack.i.h.bf16 %v16179_v42 }
 0x3f4   : > { %11646 = vmatprep.mubr.f32.mxu0 %v12866_v50  ;;  %11702 = vmatprep.mubr.f32.mxu1 %v12869_v3 }
 0x3f5   : > { %11647 = vmatmul.mubr.f32.gmra.mrb[18].mxu0 %v12871_v41  ;;  %11703 = vmatmul.mubr.f32.gmra.mrb[18].mxu1 %v12874_v10  ;;  %v17107_v10 = vld [vmem:[#allocation117_spill] sm:$0xff] }
 0x3f6   : > { %12082 = vmatpush3.bf16.msra.mxu0 %v15299_v20  ;;  %12114 = vmatpush3.bf16.msra.mxu1 %v15304_v55  ;;  %v16187_v52 = vpop.trf.xlu1  ;;  %v16191_v63 = vpop.trf.xlu0  ;;  %v12891_v20 = vunpack.i.l.bf16 %v16132_v43  ;;  %v12894_v55 = vunpack.i.h.bf16 %v16132_v43  ;;  %v12904_v43 = vunpack.i.h.bf16 %v16145_v7 }
 0x3f7   : > { %12084 = vmatprep.subr.bf16.mxu0 %v15496_v45  ;;  %12116 = vmatprep.subr.bf16.mxu1 %v17096_v60  ;;  %v12978_v4 = vunpack.i.l.bf16 %v16191_v63  ;;  %v12981_v3 = vunpack.i.h.bf16 %v16191_v63 }
 0x3f8   : > { %11649 = vmatprep.mubr.f32.mxu0 %v12876_v53  ;;  %11705 = vmatprep.mubr.f32.mxu1 %v12879_v34 }
 0x3f9   : > { %11650 = vmatmul.mubr.f32.gmra.mrb[20].mxu0 %v12881_v23  ;;  %11706 = vmatmul.mubr.f32.gmra.mrb[20].mxu1 %v12884_v28 }
 0x3fa   : > { %12086 = vmatpush3.bf16.msra.mxu0 %v15496_v45  ;;  %12118 = vmatpush3.bf16.msra.mxu1 %v17096_v60  ;;  %v16199_v17 = vpop.trf.xlu1  ;;  %v16203_v46 = vpop.trf.xlu0  ;;  %v12901_v45 = vunpack.i.l.bf16 %v16145_v7  ;;  %v12911_v7 = vunpack.i.l.bf16 %v16151_v54  ;;  %v12921_v54 = vunpack.i.l.bf16 %v16155_v18  ;;  %v12931_v18 = vunpack.i.l.bf16 %v16161_v5 }
 0x3fb   : > { %12088 = vmatprep.subr.bf16.mxu0 %v17097_v16  ;;  %12120 = vmatprep.subr.bf16.mxu1 %v17098_v15  ;;  %v12973_v5 = vunpack.i.l.bf16 %v16179_v42  ;;  %v12983_v41 = vunpack.i.l.bf16 %v16203_v46  ;;  %v17108_v42 = vld [vmem:[#allocation96_spill] sm:$0xff] }
 0x3fc   : > { %11652 = vmatprep.mubr.f32.mxu0 %v12886_v22  ;;  %11708 = vmatprep.mubr.f32.mxu1 %v12889_v27  ;;  %v17109_v22 = vld [vmem:[#allocation99_spill] sm:$0xff]  ;;  %v17110_v27 = vld [vmem:[#allocation97_spill] sm:$0xff] }
 0x3fd   : > { %11653 = vmatmul.mubr.f32.gmra.mrb[22].mxu0 %v12891_v20  ;;  %11709 = vmatmul.mubr.f32.gmra.mrb[22].mxu1 %v12894_v55 }
 0x3fe   : > { %12090 = vmatpush3.bf16.msra.mxu0 %v17097_v16  ;;  %12122 = vmatpush3.bf16.msra.mxu1 %v17098_v15  ;;  %v16211_v40 = vpop.trf.xlu1  ;;  %v16215_v0 = vpop.trf.xlu0 }
 0x3ff   : > { %12092 = vmatprep.subr.bf16.mxu0 %v17099_v62  ;;  %12124 = vmatprep.subr.bf16.mxu1 %v17100_v57  ;;  %v12988_v34 = vunpack.i.l.bf16 %v16215_v0  ;;  %v12991_v23 = vunpack.i.h.bf16 %v16215_v0 }
 0x400   : > { %11655 = vmatprep.mubr.f32.mxu0 %v12896_v49  ;;  %11711 = vmatprep.mubr.f32.mxu1 %v12899_v37  ;;  %v17111_v37 = vld [vmem:[#allocation75_spill] sm:$0xff] }
 0x401   : > { %11656 = vmatmul.mubr.f32.gmra.mrb[24].mxu0 %v12901_v45  ;;  %11712 = vmatmul.mubr.f32.gmra.mrb[24].mxu1 %v12904_v43  ;;  %v17112_v45 = vld [vmem:[#allocation112_spill] sm:$0xff] }
 0x402   : > { %12094 = vmatpush3.bf16.msra.mxu0 %v17099_v62  ;;  %12126 = vmatpush3.bf16.msra.mxu1 %v17100_v57  ;;  %v16223_v56 = vpop.trf.xlu1  ;;  %v16227_v6 = vpop.trf.xlu0 }
 0x403   : > { %12096 = vmatprep.subr.bf16.mxu0 %v17101_v29  ;;  %12128 = vmatprep.subr.bf16.mxu1 %v17102_v38  ;;  %v12993_v28 = vunpack.i.l.bf16 %v16227_v6  ;;  %v12996_v60 = vunpack.i.h.bf16 %v16227_v6 }
 0x404   : > { %11658 = vmatprep.mubr.f32.mxu0 %v12906_v32  ;;  %11714 = vmatprep.mubr.f32.mxu1 %v12909_v36 }
 0x405   : > { %11659 = vmatmul.mubr.f32.gmra.mrb[26].mxu0 %v12911_v7  ;;  %11715 = vmatmul.mubr.f32.gmra.mrb[26].mxu1 %v12914_v11  ;;  %v17113_v7 = vld [vmem:[#allocation98_spill] sm:$0xff] }
 0x406   : > { %12098 = vmatpush3.bf16.msra.mxu0 %v17101_v29  ;;  %12130 = vmatpush3.bf16.msra.mxu1 %v17102_v38  ;;  %v16235_v24 = vpop.trf.xlu1  ;;  %v16239_v9 = vpop.trf.xlu0  ;;  %v17114_v11 = vld [vmem:[#allocation102_spill] sm:$0xff] }
 0x407   : > { %12100 = vmatprep.subr.bf16.mxu0 %v17103_v59  ;;  %12132 = vmatprep.subr.bf16.mxu1 %v17104_v8  ;;  %v12998_v55 = vunpack.i.l.bf16 %v16239_v9  ;;  %v13001_v16 = vunpack.i.h.bf16 %v16239_v9 }
 0x408   : > { %11661 = vmatprep.mubr.f32.mxu0 %v12916_v58  ;;  %11717 = vmatprep.mubr.f32.mxu1 %v12919_v2 }
 0x409   : > { %11662 = vmatmul.mubr.f32.gmra.mrb[28].mxu0 %v12921_v54  ;;  %11718 = vmatmul.mubr.f32.gmra.mrb[28].mxu1 %v12924_v25  ;;  %v17115_v25 = vld [vmem:[#allocation103_spill] sm:$0xff] }
 0x40a   : > { %12102 = vmatpush3.bf16.msra.mxu0 %v17103_v59  ;;  %12134 = vmatpush3.bf16.msra.mxu1 %v17104_v8  ;;  %v13002_v14 = vpop.trf.xlu0  ;;  %v16255_v51 = vpop.trf.xlu1  ;;  %v17116_v59 = vld [vmem:[#allocation113_spill] sm:$0xff] }
 0x40b   : > { %12104 = vmatprep.subr.bf16.mxu0 %v16073_v26  ;;  %12136 = vmatprep.subr.bf16.mxu1 %v16075_v1  ;;  %v13003_v15 = vunpack.i.l.bf16 %v13002_v14 }
 0x40c   : > { %11664 = vmatprep.mubr.f32.mxu0 %v12926_v31  ;;  %11720 = vmatprep.mubr.f32.mxu1 %v12929_v47 }
 0x40d   : > { %11665 = vmatmul.mubr.f32.gmra.mrb[30].mxu0 %v12931_v18  ;;  %11721 = vmatmul.mubr.f32.gmra.mrb[30].mxu1 %v12934_v39 }
 0x40e   : > { %12106 = vmatpush3.bf16.msra.mxu0 %v16073_v26  ;;  %12138 = vmatpush3.bf16.msra.mxu1 %v16075_v1  ;;  %v13007_v50 = vpop.trf.xlu0  ;;  %v12986_v26 = vunpack.i.h.bf16 %v16203_v46  ;;  %v16265_v1 = vpop.trf.xlu1  ;;  %v13006_v46 = vunpack.i.h.bf16 %v13002_v14  ;;  %v17117_v14 = vld [vmem:[#allocation104_spill] sm:$0xff] }
 0x40f   : > { %12140 = vmatprep.subr.bf16.mxu0 %v17105_v12  ;;  %12172 = vmatprep.subr.bf16.mxu1 %v17106_v21  ;;  %v13008_v62 = vunpack.i.l.bf16 %v13007_v50  ;;  %v13011_v57 = vunpack.i.h.bf16 %v13007_v50  ;;  %v13080_v50 = vunpack.i.l.bf16 %v16165_v44 }
 0x410   : > { %11755 = vmatprep.mubr.f32.mxu0 %v12968_v35  ;;  %11811 = vmatprep.mubr.f32.mxu1 %v12971_v61  ;;  %v17118_v35 = vld [vmem:[#allocation110_spill] sm:$0xff] }
 0x411   : > { %11756 = vmatmul.mubr.f32.vlgmr.msra.gmra.mrb[32].mxu0 %v12973_v5  ;;  %11812 = vmatmul.mubr.f32.vlgmr.msra.gmra.mrb[32].mxu1 %v12976_v19 }
 0x412   : > { %12142 = vmatpush3.bf16.msra.mxu0 %v17105_v12  ;;  %12174 = vmatpush3.bf16.msra.mxu1 %v17106_v21  ;;  %v13012_v53 = vpop.trf.xlu0  ;;  %v16275_v63 = vpop.trf.xlu1 }
 0x413   : > { %12144 = vmatprep.subr.bf16.mxu0 %v17107_v10  ;;  %12176 = vmatprep.subr.bf16.mxu1 %v17108_v42  ;;  %v13013_v0 = vunpack.i.l.bf16 %v13012_v53  ;;  %v13016_v32 = vunpack.i.h.bf16 %v13012_v53  ;;  %v13093_v53 = vunpack.i.h.bf16 %v16187_v52 }
 0x414   : > { %11758 = vmatprep.mubr.f32.mxu0 %v12978_v4  ;;  %11814 = vmatprep.mubr.f32.mxu1 %v12981_v3  ;;  %v13083_v4 = vunpack.i.h.bf16 %v16165_v44  ;;  %v13090_v44 = vunpack.i.l.bf16 %v16187_v52  ;;  %v13110_v52 = vunpack.i.l.bf16 %v16235_v24 }
 0x415   : > { %11759 = vmatmul.mubr.f32.gmra.mrb[34].mxu0 %v12983_v41  ;;  %11815 = vmatmul.mubr.f32.gmra.mrb[34].mxu1 %v12986_v26 }
 0x416   : > { %12146 = vmatpush3.bf16.msra.mxu0 %v17107_v10  ;;  %12178 = vmatpush3.bf16.msra.mxu1 %v17108_v42  ;;  %v13017_v20 = vpop.trf.xlu0  ;;  %v16283_v49 = vpop.trf.xlu1  ;;  %v13088_v10 = vunpack.i.h.bf16 %v16175_v33  ;;  %v13085_v42 = vunpack.i.l.bf16 %v16175_v33  ;;  %v13105_v33 = vunpack.i.l.bf16 %v16223_v56 }
 0x417   : > { %12148 = vmatprep.subr.bf16.mxu0 %v17109_v22  ;;  %12180 = vmatprep.subr.bf16.mxu1 %v17110_v27  ;;  %v13018_v38 = vunpack.i.l.bf16 %v13017_v20  ;;  %v13021_v6 = vunpack.i.h.bf16 %v13017_v20  ;;  %v13128_v20 = vunpack.i.h.bf16 %v16275_v63 }
 0x418   : > { %11761 = vmatprep.mubr.f32.mxu0 %v12988_v34  ;;  %11817 = vmatprep.mubr.f32.mxu1 %v12991_v23  ;;  %v13100_v34 = vunpack.i.l.bf16 %v16211_v40  ;;  %v13103_v23 = vunpack.i.h.bf16 %v16211_v40  ;;  %v13120_v40 = vunpack.i.l.bf16 %v16265_v1 }
 0x419   : > { %11762 = vmatmul.mubr.f32.gmra.mrb[36].mxu0 %v12993_v28  ;;  %11818 = vmatmul.mubr.f32.gmra.mrb[36].mxu1 %v12996_v60  ;;  %v13108_v28 = vunpack.i.h.bf16 %v16223_v56  ;;  %v13113_v60 = vunpack.i.h.bf16 %v16235_v24  ;;  %v13125_v56 = vunpack.i.l.bf16 %v16275_v63  ;;  %v13130_v24 = vunpack.i.l.bf16 %v16283_v49 }
 0x41a   : > { %12150 = vmatpush3.bf16.msra.mxu0 %v17109_v22  ;;  %12182 = vmatpush3.bf16.msra.mxu1 %v17110_v27  ;;  %v13022_v43 = vpop.trf.xlu0  ;;  %v16289_v36 = vpop.trf.xlu1  ;;  %v13118_v22 = vunpack.i.h.bf16 %v16255_v51  ;;  %v13123_v27 = vunpack.i.h.bf16 %v16265_v1 }
 0x41b   : > { %12152 = vmatprep.subr.bf16.mxu0 %v17111_v37  ;;  %12184 = vmatprep.subr.bf16.mxu1 %v17112_v45  ;;  %v13023_v58 = vunpack.i.l.bf16 %v13022_v43  ;;  %v13026_v2 = vunpack.i.h.bf16 %v13022_v43 }
 0x41c   : > { %11764 = vmatprep.mubr.f32.mxu0 %v12998_v55  ;;  %11820 = vmatprep.mubr.f32.mxu1 %v13001_v16  ;;  %v13133_v55 = vunpack.i.h.bf16 %v16283_v49  ;;  %v13138_v16 = vunpack.i.h.bf16 %v16289_v36 }
 0x41d   : > { %11765 = vmatmul.mubr.f32.gmra.mrb[38].mxu0 %v13003_v15  ;;  %11821 = vmatmul.mubr.f32.gmra.mrb[38].mxu1 %v13006_v46 }
 0x41e   : > { %12154 = vmatpush3.bf16.msra.mxu0 %v17111_v37  ;;  %12186 = vmatpush3.bf16.msra.mxu1 %v17112_v45  ;;  %v13027_v29 = vpop.trf.xlu0  ;;  %v16295_v54 = vpop.trf.xlu1 }
 0x41f   : > { %12156 = vmatprep.subr.bf16.mxu0 %v17113_v7  ;;  %12188 = vmatprep.subr.bf16.mxu1 %v17114_v11  ;;  %v13028_v9 = vunpack.i.l.bf16 %v13027_v29  ;;  %v13031_v31 = vunpack.i.h.bf16 %v13027_v29  ;;  %v13140_v1 = vunpack.i.l.bf16 %v16295_v54  ;;  %v13143_v15 = vunpack.i.h.bf16 %v16295_v54 }
 0x420   : > { %11767 = vmatprep.mubr.f32.mxu0 %v13008_v62  ;;  %11823 = vmatprep.mubr.f32.mxu1 %v13011_v57 }
 0x421   : > { %11768 = vmatmul.mubr.f32.gmra.mrb[40].mxu0 %v13013_v0  ;;  %11824 = vmatmul.mubr.f32.gmra.mrb[40].mxu1 %v13016_v32 }
 0x422   : > { %12158 = vmatpush3.bf16.msra.mxu0 %v17113_v7  ;;  %12190 = vmatpush3.bf16.msra.mxu1 %v17114_v11  ;;  %v13032_v8 = vpop.trf.xlu0  ;;  %v16301_v39 = vpop.trf.xlu1 }
 0x423   : > { %12160 = vmatprep.subr.bf16.mxu0 %v17115_v25  ;;  %12192 = vmatprep.subr.bf16.mxu1 %v17116_v59  ;;  %v13033_v47 = vunpack.i.l.bf16 %v13032_v8  ;;  %v13036_v18 = vunpack.i.h.bf16 %v13032_v8  ;;  %v13145_v63 = vunpack.i.l.bf16 %v16301_v39  ;;  %v13148_v46 = vunpack.i.h.bf16 %v16301_v39 }
 0x424   : > { %11770 = vmatprep.mubr.f32.mxu0 %v13018_v38  ;;  %11826 = vmatprep.mubr.f32.mxu1 %v13021_v6 }
 0x425   : > { %11771 = vmatmul.mubr.f32.gmra.mrb[42].mxu0 %v13023_v58  ;;  %11827 = vmatmul.mubr.f32.gmra.mrb[42].mxu1 %v13026_v2 }
 0x426   : > { %12162 = vmatpush3.bf16.msra.mxu0 %v17115_v25  ;;  %12194 = vmatpush3.bf16.msra.mxu1 %v17116_v59  ;;  %v13037_v61 = vpop.trf.xlu0  ;;  %v16307_v12 = vpop.trf.xlu1 }
 0x427   : > { %12164 = vmatprep.subr.bf16.mxu0 %v17117_v14  ;;  %12196 = vmatprep.subr.bf16.mxu1 %v17118_v35  ;;  %v13038_v19 = vunpack.i.l.bf16 %v13037_v61  ;;  %v13041_v5 = vunpack.i.h.bf16 %v13037_v61  ;;  %v13150_v49 = vunpack.i.l.bf16 %v16307_v12  ;;  %v13153_v37 = vunpack.i.h.bf16 %v16307_v12 }
 0x428   : > { %11773 = vmatprep.mubr.f32.mxu0 %v13028_v9  ;;  %11829 = vmatprep.mubr.f32.mxu1 %v13031_v31 }
 0x429   : > { %11774 = vmatmul.mubr.f32.gmra.mrb[44].mxu0 %v13033_v47  ;;  %11830 = vmatmul.mubr.f32.gmra.mrb[44].mxu1 %v13036_v18 }
 0x42a   : > { %12166 = vmatpush3.bf16.msra.mxu0 %v17117_v14  ;;  %12198 = vmatpush3.bf16.msra.mxu1 %v17118_v35  ;;  %v13042_v21 = vpop.trf.xlu0  ;;  %v16315_v26 = vpop.trf.xlu1 }
 0x42b   : > { %12168 = vmatprep.subr.bf16.mxu0 %v16086_v48  ;;  %12200 = vmatprep.subr.bf16.mxu1 %v16091_v30  ;;  %v13043_v3 = vunpack.i.l.bf16 %v13042_v21  ;;  %v13046_v41 = vunpack.i.h.bf16 %v13042_v21  ;;  %v13155_v45 = vunpack.i.l.bf16 %v16315_v26  ;;  %v13158_v43 = vunpack.i.h.bf16 %v16315_v26 }
 0x42c   : > { %11776 = vmatprep.mubr.f32.mxu0 %v13038_v19  ;;  %11832 = vmatprep.mubr.f32.mxu1 %v13041_v5 }
 0x42d   : > { %11777 = vmatmul.mubr.f32.gmra.mrb[46].mxu0 %v13043_v3  ;;  %11833 = vmatmul.mubr.f32.gmra.mrb[46].mxu1 %v13046_v41 }
 0x42e   : > { %12170 = vmatpush3.bf16.msra.mxu0 %v16086_v48  ;;  %12202 = vmatpush3.bf16.msra.mxu1 %v16091_v30  ;;  %v13095_v48 = vunpack.i.l.bf16 %v16199_v17  ;;  %v13098_v30 = vunpack.i.h.bf16 %v16199_v17  ;;  %v13115_v17 = vunpack.i.l.bf16 %v16255_v51  ;;  %v13135_v51 = vunpack.i.l.bf16 %v16289_v36 }
 0x42f   : > { %11867 = vmatprep.mubr.f32.mxu0 %v13080_v50  ;;  %11923 = vmatprep.mubr.f32.mxu1 %v13083_v4 }
 0x431   : > { %11868 = vmatmul.mubr.f32.vlgmr.msra.gmra.mrb[48].mxu0 %v13085_v42  ;;  %11924 = vmatmul.mubr.f32.vlgmr.msra.gmra.mrb[48].mxu1 %v13088_v10 }
 0x432   : > { %11870 = vmatprep.mubr.f32.mxu0 %v13090_v44  ;;  %11926 = vmatprep.mubr.f32.mxu1 %v13093_v53 }
 0x435   : > { %11871 = vmatmul.mubr.f32.gmra.mrb[50].mxu0 %v13095_v48  ;;  %11927 = vmatmul.mubr.f32.gmra.mrb[50].mxu1 %v13098_v30 }
 0x436   : > { %11873 = vmatprep.mubr.f32.mxu0 %v13100_v34  ;;  %11929 = vmatprep.mubr.f32.mxu1 %v13103_v23 }
 0x439   : > { %11874 = vmatmul.mubr.f32.gmra.mrb[52].mxu0 %v13105_v33  ;;  %11930 = vmatmul.mubr.f32.gmra.mrb[52].mxu1 %v13108_v28 }
 0x43a   : > { %11876 = vmatprep.mubr.f32.mxu0 %v13110_v52  ;;  %11932 = vmatprep.mubr.f32.mxu1 %v13113_v60 }
 0x43d   : > { %11877 = vmatmul.mubr.f32.gmra.mrb[54].mxu0 %v13115_v17  ;;  %11933 = vmatmul.mubr.f32.gmra.mrb[54].mxu1 %v13118_v22 }
 0x43e   : > { %11879 = vmatprep.mubr.f32.mxu0 %v13120_v40  ;;  %11935 = vmatprep.mubr.f32.mxu1 %v13123_v27 }
 0x441   : > { %11880 = vmatmul.mubr.f32.gmra.mrb[56].mxu0 %v13125_v56  ;;  %11936 = vmatmul.mubr.f32.gmra.mrb[56].mxu1 %v13128_v20 }
 0x442   : > { %11882 = vmatprep.mubr.f32.mxu0 %v13130_v24  ;;  %11938 = vmatprep.mubr.f32.mxu1 %v13133_v55 }
 0x445   : > { %11883 = vmatmul.mubr.f32.gmra.mrb[58].mxu0 %v13135_v51  ;;  %11939 = vmatmul.mubr.f32.gmra.mrb[58].mxu1 %v13138_v16 }
 0x446   : > { %11885 = vmatprep.mubr.f32.mxu0 %v13140_v1  ;;  %11941 = vmatprep.mubr.f32.mxu1 %v13143_v15 }
 0x449   : > { %11886 = vmatmul.mubr.f32.gmra.mrb[60].mxu0 %v13145_v63  ;;  %11942 = vmatmul.mubr.f32.gmra.mrb[60].mxu1 %v13148_v46 }
 0x44a   : > { %11888 = vmatprep.mubr.f32.mxu0 %v13150_v49  ;;  %11944 = vmatprep.mubr.f32.mxu1 %v13153_v37 }
 0x44d   : > { %11889 = vmatmul.mubr.f32.gmra.mrb[62].mxu0 %v13155_v45  ;;  %11945 = vmatmul.mubr.f32.gmra.mrb[62].mxu1 %v13158_v43 }
 0x48e   : > { %v11533_v62 = vpop.f32.mrb[0].mxu0  ;;  %v11589_v57 = vpop.f32.mrb[0].mxu1 }
 0x48f   : > { %v9397_v0 = vpop.f32.mrb[1].mxu0  ;;  %v9574_v32 = vpop.f32.mrb[1].mxu1 }
 0x490   : > { %10747 = vxpose.xlu1.b32.start [1/16] (narrow) %v9574_v32, 8  ;;  %10715 = vxpose.xlu0.b32.start [1/16] (narrow) %v9397_v0, 8 }
 0x492   : > { %v11536_v36 = vpop.f32.mrb[2].mxu0  ;;  %v11592_v7 = vpop.f32.mrb[2].mxu1 }
 0x493   : > { %v9407_v11 = vpop.f32.mrb[3].mxu0  ;;  %v9584_v29 = vpop.f32.mrb[3].mxu1 }
 0x494   : > { %10748 = vxpose.xlu1.b32.cont [2/16] (narrow) %v11589_v57, 8  ;;  %10716 = vxpose.xlu0.b32.cont [2/16] (narrow) %v11533_v62, 8 }
 0x498   : > { %10749 = vxpose.xlu1.b32.cont [3/16] (narrow) %v9584_v29, 8  ;;  %10717 = vxpose.xlu0.b32.cont [3/16] (narrow) %v9407_v11, 8 }
 0x499   : > { %v11539_v38 = vpop.f32.mrb[4].mxu0  ;;  %v11595_v6 = vpop.f32.mrb[4].mxu1 }
 0x49a   : > { %v9417_v58 = vpop.f32.mrb[5].mxu0  ;;  %v9594_v2 = vpop.f32.mrb[5].mxu1 }
 0x49c   : > { %10750 = vxpose.xlu1.b32.cont [4/16] (narrow) %v11592_v7, 8  ;;  %10718 = vxpose.xlu0.b32.cont [4/16] (narrow) %v11536_v36, 8 }
 0x4a0   : > { %10751 = vxpose.xlu1.b32.cont [5/16] (narrow) %v9594_v2, 8  ;;  %10719 = vxpose.xlu0.b32.cont [5/16] (narrow) %v9417_v58, 8 }
 0x4a1   : > { %v11542_v54 = vpop.f32.mrb[6].mxu0  ;;  %v11598_v25 = vpop.f32.mrb[6].mxu1 }
 0x4a2   : > { %v9427_v59 = vpop.f32.mrb[7].mxu0  ;;  %v9604_v8 = vpop.f32.mrb[7].mxu1 }
 0x4a4   : > { %10752 = vxpose.xlu1.b32.cont [6/16] (narrow) %v11595_v6, 8  ;;  %10720 = vxpose.xlu0.b32.cont [6/16] (narrow) %v11539_v38, 8 }
 0x4a8   : > { %10753 = vxpose.xlu1.b32.cont [7/16] (narrow) %v9604_v8, 8  ;;  %10721 = vxpose.xlu0.b32.cont [7/16] (narrow) %v9427_v59, 8 }
 0x4a9   : > { %v11545_v9 = vpop.f32.mrb[8].mxu0  ;;  %v11601_v31 = vpop.f32.mrb[8].mxu1 }
 0x4aa   : > { %v9437_v47 = vpop.f32.mrb[9].mxu0  ;;  %v9614_v18 = vpop.f32.mrb[9].mxu1 }
 0x4ac   : > { %10754 = vxpose.xlu1.b32.cont [8/16] (narrow) %v11598_v25, 8  ;;  %10722 = vxpose.xlu0.b32.cont [8/16] (narrow) %v11542_v54, 8 }
 0x4b0   : > { %10755 = vxpose.xlu1.b32.cont [9/16] (narrow) %v9614_v18, 8  ;;  %10723 = vxpose.xlu0.b32.cont [9/16] (narrow) %v9437_v47, 8  ;;  %v11548_v39 = vpop.f32.mrb[10].mxu0  ;;  %v11604_v14 = vpop.f32.mrb[10].mxu1 }
 0x4b1   : > { %v9447_v35 = vpop.f32.mrb[11].mxu0  ;;  %v9624_v61 = vpop.f32.mrb[11].mxu1 }
 0x4b4   : > { %10756 = vxpose.xlu1.b32.cont [10/16] (narrow) %v11601_v31, 8  ;;  %10724 = vxpose.xlu0.b32.cont [10/16] (narrow) %v11545_v9, 8 }
 0x4b8   : > { %10757 = vxpose.xlu1.b32.cont [11/16] (narrow) %v9624_v61, 8  ;;  %10725 = vxpose.xlu0.b32.cont [11/16] (narrow) %v9447_v35, 8  ;;  %v11551_v19 = vpop.f32.mrb[12].mxu0  ;;  %v11607_v5 = vpop.f32.mrb[12].mxu1 }
 0x4b9   : > { %v9457_v12 = vpop.f32.mrb[13].mxu0  ;;  %v9634_v21 = vpop.f32.mrb[13].mxu1 }
 0x4bc   : > { %10758 = vxpose.xlu1.b32.cont [12/16] (narrow) %v11604_v14, 8  ;;  %10726 = vxpose.xlu0.b32.cont [12/16] (narrow) %v11548_v39, 8 }
 0x4c0   : > { %10759 = vxpose.xlu1.b32.cont [13/16] (narrow) %v9634_v21, 8  ;;  %10727 = vxpose.xlu0.b32.cont [13/16] (narrow) %v9457_v12, 8  ;;  %v11554_v50 = vpop.f32.mrb[14].mxu0  ;;  %v11610_v4 = vpop.f32.mrb[14].mxu1 }
 0x4c1   : > { %v9467_v3 = vpop.f32.mrb[15].mxu0  ;;  %v9644_v41 = vpop.f32.mrb[15].mxu1 }
 0x4c4   : > { %10760 = vxpose.xlu1.b32.cont [14/16] (narrow) %v11607_v5, 8  ;;  %10728 = vxpose.xlu0.b32.cont [14/16] (narrow) %v11551_v19, 8  ;;  %v11645_v26 = vpop.f32.mrb[16].mxu0  ;;  %v11701_v10 = vpop.f32.mrb[16].mxu1 }
 0x4c5   : > { %v9751_v42 = vpop.f32.mrb[17].mxu0  ;;  %v9928_v44 = vpop.f32.mrb[17].mxu1 }
 0x4c8   : > { %10761 = vxpose.xlu1.b32.cont [15/16] (narrow) %v9644_v41, 8  ;;  %10729 = vxpose.xlu0.b32.cont [15/16] (narrow) %v9467_v3, 8  ;;  %v11648_v53 = vpop.f32.mrb[18].mxu0  ;;  %v11704_v48 = vpop.f32.mrb[18].mxu1 }
 0x4c9   : > { %v9761_v30 = vpop.f32.mrb[19].mxu0  ;;  %v9938_v34 = vpop.f32.mrb[19].mxu1 }
 0x4cc   : > { %10762 = vxpose.xlu1.b32.end [16/16] (narrow) %v11610_v4, 8  ;;  %10730 = vxpose.xlu0.b32.end [16/16] (narrow) %v11554_v50, 8  ;;  %v11651_v23 = vpop.f32.mrb[20].mxu0  ;;  %v11707_v33 = vpop.f32.mrb[20].mxu1 }
 0x4cd   : > { %v9771_v28 = vpop.f32.mrb[21].mxu0  ;;  %v9948_v52 = vpop.f32.mrb[21].mxu1 }
 0x4d0   : > { %10811 = vxpose.xlu1.b32.start [1/16] (narrow) %v9928_v44, 8  ;;  %10779 = vxpose.xlu0.b32.start [1/16] (narrow) %v9751_v42, 8  ;;  %v11654_v60 = vpop.f32.mrb[22].mxu0  ;;  %v11710_v17 = vpop.f32.mrb[22].mxu1 }
 0x4d1   : > { %v9781_v22 = vpop.f32.mrb[23].mxu0  ;;  %v9958_v40 = vpop.f32.mrb[23].mxu1 }
 0x4d4   : > { %10812 = vxpose.xlu1.b32.cont [2/16] (narrow) %v11701_v10, 8  ;;  %10780 = vxpose.xlu0.b32.cont [2/16] (narrow) %v11645_v26, 8  ;;  %v11657_v27 = vpop.f32.mrb[24].mxu0  ;;  %v11713_v56 = vpop.f32.mrb[24].mxu1 }
 0x4d5   : > { %v9791_v20 = vpop.f32.mrb[25].mxu0  ;;  %v9968_v24 = vpop.f32.mrb[25].mxu1 }
 0x4d8   : > { %10813 = vxpose.xlu1.b32.cont [3/16] (narrow) %v9938_v34, 8  ;;  %10781 = vxpose.xlu0.b32.cont [3/16] (narrow) %v9761_v30, 8  ;;  %v11660_v55 = vpop.f32.mrb[26].mxu0  ;;  %v11716_v51 = vpop.f32.mrb[26].mxu1 }
 0x4d9   : > { %v9801_v16 = vpop.f32.mrb[27].mxu0  ;;  %v9978_v1 = vpop.f32.mrb[27].mxu1 }
 0x4dc   : > { %10814 = vxpose.xlu1.b32.cont [4/16] (narrow) %v11704_v48, 8  ;;  %10782 = vxpose.xlu0.b32.cont [4/16] (narrow) %v11648_v53, 8  ;;  %v11663_v15 = vpop.f32.mrb[28].mxu0  ;;  %v11719_v63 = vpop.f32.mrb[28].mxu1 }
 0x4dd   : > { %v9811_v46 = vpop.f32.mrb[29].mxu0  ;;  %v9988_v49 = vpop.f32.mrb[29].mxu1 }
 0x4e0   : > { %10815 = vxpose.xlu1.b32.cont [5/16] (narrow) %v9948_v52, 8  ;;  %10783 = vxpose.xlu0.b32.cont [5/16] (narrow) %v9771_v28, 8  ;;  %v16347_v37 = vpop.f32.mrb[30].mxu0  ;;  %v11722_v45 = vpop.f32.mrb[30].mxu1 }
 0x4e1   : > { %v9821_v43 = vpop.f32.mrb[31].mxu0  ;;  %v9998_v62 = vpop.f32.mrb[31].mxu1 }
 0x4e4   : > { %10816 = vxpose.xlu1.b32.cont [6/16] (narrow) %v11707_v33, 8  ;;  %10784 = vxpose.xlu0.b32.cont [6/16] (narrow) %v11651_v23, 8  ;;  %v16349_v57 = vpop.f32.mrb[32].mxu0  ;;  %v16351_v0 = vpop.f32.mrb[32].mxu1 }
 0x4e5   : > { %v10105_v32 = vpop.f32.mrb[33].mxu0  ;;  %v10282_v36 = vpop.f32.mrb[33].mxu1 }
 0x4e8   : > { %10817 = vxpose.xlu1.b32.cont [7/16] (narrow) %v9958_v40, 8  ;;  %10785 = vxpose.xlu0.b32.cont [7/16] (narrow) %v9781_v22, 8  ;;  %v16353_v7 = vpop.f32.mrb[34].mxu0  ;;  %v16355_v11 = vpop.f32.mrb[34].mxu1 }
 0x4e9   : > { %v16357_v29 = vpop.f32.mrb[35].mxu0  ;;  %v16359_v38 = vpop.f32.mrb[35].mxu1 }
 0x4ec   : > { %10818 = vxpose.xlu1.b32.cont [8/16] (narrow) %v11710_v17, 8  ;;  %10786 = vxpose.xlu0.b32.cont [8/16] (narrow) %v11654_v60, 8  ;;  %v16361_v6 = vpop.f32.mrb[36].mxu0  ;;  %v16363_v58 = vpop.f32.mrb[36].mxu1 }
 0x4ed   : > { %v16365_v2 = vpop.f32.mrb[37].mxu0  ;;  %v16367_v54 = vpop.f32.mrb[37].mxu1 }
 0x4f0   : > { %10819 = vxpose.xlu1.b32.cont [9/16] (narrow) %v9968_v24, 8  ;;  %10787 = vxpose.xlu0.b32.cont [9/16] (narrow) %v9791_v20, 8  ;;  %v16369_v25 = vpop.f32.mrb[38].mxu0  ;;  %v16371_v59 = vpop.f32.mrb[38].mxu1 }
 0x4f1   : > { %v16373_v8 = vpop.f32.mrb[39].mxu0  ;;  %v16375_v9 = vpop.f32.mrb[39].mxu1 }
 0x4f4   : > { %10820 = vxpose.xlu1.b32.cont [10/16] (narrow) %v11713_v56, 8  ;;  %10788 = vxpose.xlu0.b32.cont [10/16] (narrow) %v11657_v27, 8  ;;  %v16377_v31 = vpop.f32.mrb[40].mxu0  ;;  %v16379_v47 = vpop.f32.mrb[40].mxu1 }
 0x4f5   : > { %v16381_v18 = vpop.f32.mrb[41].mxu0  ;;  %v16383_v39 = vpop.f32.mrb[41].mxu1 }
 0x4f8   : > { %10821 = vxpose.xlu1.b32.cont [11/16] (narrow) %v9978_v1, 8  ;;  %10789 = vxpose.xlu0.b32.cont [11/16] (narrow) %v9801_v16, 8  ;;  %v16385_v14 = vpop.f32.mrb[42].mxu0  ;;  %v16387_v35 = vpop.f32.mrb[42].mxu1 }
 0x4f9   : > { %v16389_v61 = vpop.f32.mrb[43].mxu0  ;;  %v16391_v19 = vpop.f32.mrb[43].mxu1 }
 0x4fc   : > { %10822 = vxpose.xlu1.b32.cont [12/16] (narrow) %v11716_v51, 8  ;;  %10790 = vxpose.xlu0.b32.cont [12/16] (narrow) %v11660_v55, 8  ;;  %v16393_v5 = vpop.f32.mrb[44].mxu0  ;;  %v16395_v12 = vpop.f32.mrb[44].mxu1 }
 0x4fd   : > { %v16397_v21 = vpop.f32.mrb[45].mxu0  ;;  %v16399_v50 = vpop.f32.mrb[45].mxu1 }
 0x500   : > { %10823 = vxpose.xlu1.b32.cont [13/16] (narrow) %v9988_v49, 8  ;;  %10791 = vxpose.xlu0.b32.cont [13/16] (narrow) %v9811_v46, 8  ;;  %v16401_v4 = vpop.f32.mrb[46].mxu0  ;;  %v16403_v3 = vpop.f32.mrb[46].mxu1 }
 0x501   : > { %v16405_v41 = vpop.f32.mrb[47].mxu0  ;;  %v16407_v26 = vpop.f32.mrb[47].mxu1 }
 0x504   : > { %10824 = vxpose.xlu1.b32.cont [14/16] (narrow) %v11719_v63, 8  ;;  %10792 = vxpose.xlu0.b32.cont [14/16] (narrow) %v11663_v15, 8  ;;  %v16409_v10 = vpop.f32.mrb[48].mxu0  ;;  %v16411_v42 = vpop.f32.mrb[48].mxu1 }
 0x505   : > { %v16413_v44 = vpop.f32.mrb[49].mxu0  ;;  %v16415_v53 = vpop.f32.mrb[49].mxu1 }
 0x508   : > { %10825 = vxpose.xlu1.b32.cont [15/16] (narrow) %v9998_v62, 8  ;;  %10793 = vxpose.xlu0.b32.cont [15/16] (narrow) %v9821_v43, 8  ;;  %v16417_v48 = vpop.f32.mrb[50].mxu0  ;;  %v16419_v30 = vpop.f32.mrb[50].mxu1 }
 0x509   : > { %v16421_v34 = vpop.f32.mrb[51].mxu0  ;;  %v10646_v23 = vpop.f32.mrb[51].mxu1 }
 0x50c   : > { %10826 = vxpose.xlu1.b32.end [16/16] (narrow) %v11722_v45, 8  ;;  %10794 = vxpose.xlu0.b32.end [16/16] (narrow) %v16347_v37, 8  ;;  %v16424_v33 = vpop.f32.mrb[52].mxu0  ;;  %v16426_v28 = vpop.f32.mrb[52].mxu1 }
 0x50d   : > { %v10479_v52 = vpop.f32.mrb[53].mxu0  ;;  %v10656_v60 = vpop.f32.mrb[53].mxu1 }
 0x510   : > { %10875 = vxpose.xlu1.b32.start [1/16] (narrow) %v10282_v36, 8  ;;  %10843 = vxpose.xlu0.b32.start [1/16] (narrow) %v10105_v32, 8  ;;  %v16428_v17 = vpop.f32.mrb[54].mxu0  ;;  %v11934_v22 = vpop.f32.mrb[54].mxu1 }
 0x511   : > { %v10489_v40 = vpop.f32.mrb[55].mxu0  ;;  %v10666_v27 = vpop.f32.mrb[55].mxu1 }
 0x512   : > { %v10731_v32 = vpop.trf.xlu0 }
 0x514   : > { %10876 = vxpose.xlu1.b32.cont [2/16] (narrow) %v16351_v0, 8  ;;  %10844 = vxpose.xlu0.b32.cont [2/16] (narrow) %v16349_v57, 8  ;;  %v11881_v56 = vpop.f32.mrb[56].mxu0  ;;  %v11937_v20 = vpop.f32.mrb[56].mxu1 }
 0x515   : > { %v10499_v24 = vpop.f32.mrb[57].mxu0  ;;  %v10676_v55 = vpop.f32.mrb[57].mxu1 }
 0x516   : > { %v10763_v0 = vpop.trf.xlu1 }
 0x518   : > { %10877 = vxpose.xlu1.b32.cont [3/16] (narrow) %v16359_v38, 8  ;;  %10845 = vxpose.xlu0.b32.cont [3/16] (narrow) %v16357_v29, 8  ;;  %v11884_v51 = vpop.f32.mrb[58].mxu0  ;;  %v11940_v16 = vpop.f32.mrb[58].mxu1 }
 0x519   : > { %v10509_v1 = vpop.f32.mrb[59].mxu0  ;;  %v10686_v15 = vpop.f32.mrb[59].mxu1 }
 0x51c   : > { %10878 = vxpose.xlu1.b32.cont [4/16] (narrow) %v16355_v11, 8  ;;  %10846 = vxpose.xlu0.b32.cont [4/16] (narrow) %v16353_v7, 8  ;;  %v11887_v63 = vpop.f32.mrb[60].mxu0  ;;  %v11943_v46 = vpop.f32.mrb[60].mxu1 }
 0x51d   : > { %v10519_v49 = vpop.f32.mrb[61].mxu0  ;;  %v10696_v37 = vpop.f32.mrb[61].mxu1 }
 0x520   : > { %10879 = vxpose.xlu1.b32.cont [5/16] (narrow) %v16367_v54, 8  ;;  %10847 = vxpose.xlu0.b32.cont [5/16] (narrow) %v16365_v2, 8  ;;  %v11890_v45 = vpop.f32.mrb[62].mxu0  ;;  %v11946_v43 = vpop.f32.mrb[62].mxu1  ;;  %v17119_v54 = vld [vmem:[#allocation79_spill] sm:$0xff] }
 0x521   : > { %v10529_v62 = vpop.f32.mrb[63].mxu0  ;;  %v10706_v57 = vpop.f32.mrb[63].mxu1 }
 0x524   : > { %10880 = vxpose.xlu1.b32.cont [6/16] (narrow) %v16363_v58, 8  ;;  %10848 = vxpose.xlu0.b32.cont [6/16] (narrow) %v16361_v6, 8 }
 0x528   : > { %10881 = vxpose.xlu1.b32.cont [7/16] (narrow) %v16375_v9, 8  ;;  %10849 = vxpose.xlu0.b32.cont [7/16] (narrow) %v16373_v8, 8 }
 0x52c   : > { %10882 = vxpose.xlu1.b32.cont [8/16] (narrow) %v16371_v59, 8  ;;  %10850 = vxpose.xlu0.b32.cont [8/16] (narrow) %v16369_v25, 8 }
 0x530   : > { %10883 = vxpose.xlu1.b32.cont [9/16] (narrow) %v16383_v39, 8  ;;  %10851 = vxpose.xlu0.b32.cont [9/16] (narrow) %v16381_v18, 8 }
 0x534   : > { %10884 = vxpose.xlu1.b32.cont [10/16] (narrow) %v16379_v47, 8  ;;  %10852 = vxpose.xlu0.b32.cont [10/16] (narrow) %v16377_v31, 8 }
 0x538   : > { %10885 = vxpose.xlu1.b32.cont [11/16] (narrow) %v16391_v19, 8  ;;  %10853 = vxpose.xlu0.b32.cont [11/16] (narrow) %v16389_v61, 8 }
 0x53c   : > { %10886 = vxpose.xlu1.b32.cont [12/16] (narrow) %v16387_v35, 8  ;;  %10854 = vxpose.xlu0.b32.cont [12/16] (narrow) %v16385_v14, 8 }
 0x540   : > { %10887 = vxpose.xlu1.b32.cont [13/16] (narrow) %v16399_v50, 8  ;;  %10855 = vxpose.xlu0.b32.cont [13/16] (narrow) %v16397_v21, 8 }
 0x544   : > { %10888 = vxpose.xlu1.b32.cont [14/16] (narrow) %v16395_v12, 8  ;;  %10856 = vxpose.xlu0.b32.cont [14/16] (narrow) %v16393_v5, 8 }
 0x548   : > { %10889 = vxpose.xlu1.b32.cont [15/16] (narrow) %v16407_v26, 8  ;;  %10857 = vxpose.xlu0.b32.cont [15/16] (narrow) %v16405_v41, 8 }
 0x54c   : > { %10890 = vxpose.xlu1.b32.end [16/16] (narrow) %v16403_v3, 8  ;;  %10858 = vxpose.xlu0.b32.end [16/16] (narrow) %v16401_v4, 8 }
 0x550   : > { %10939 = vxpose.xlu1.b32.start [1/16] (narrow) %v16415_v53, 8  ;;  %10907 = vxpose.xlu0.b32.start [1/16] (narrow) %v16413_v44, 8  ;;  %v10827_v36 = vpop.trf.xlu1  ;;  %v10795_v7 = vpop.trf.xlu0 }
 0x551   : > { %v10987_v11 = vcombine.low %v10763_v0, %v10827_v36  ;;  %v10971_v29 = vcombine.low %v10731_v32, %v10795_v7  ;;  %v10988_v58 = vcombine.high %v10763_v0, %v10827_v36  ;;  %v10972_v2 = vcombine.high %v10731_v32, %v10795_v7 }
 0x553   : > { %v10995_v25 = vrot.slane %v10987_v11, %v17119_v54  ;;  %v10979_v59 = vrot.slane %v10971_v29, %v17119_v54  ;;  %v11002_v8 = vrot.slane %v10988_v58, %v17119_v54  ;;  %v10986_v9 = vrot.slane %v10972_v2, %v17119_v54 }
 0x554   : > { %10940 = vxpose.xlu1.b32.cont [2/16] (narrow) %v16411_v42, 8  ;;  %10908 = vxpose.xlu0.b32.cont [2/16] (narrow) %v16409_v10, 8 }
 0x555   : > { %v11035_v61 = vcombine.low %v10979_v59, %v10995_v25  ;;  %v11036_v19 = vcombine.high %v10979_v59, %v10995_v25  ;;  %v11051_v4 = vcombine.low %v10986_v9, %v11002_v8  ;;  %v11052_v3 = vcombine.high %v10986_v9, %v11002_v8 }
 0x557   : > { %v11043_v44 = vrot.slane %v11035_v61, %v14220_v13  ;;  %v11050_v53 = vrot.slane %v11036_v19, %v14220_v13 }
 0x558   : > { %10941 = vxpose.xlu1.b32.cont [3/16] (narrow) %v10646_v23, 8  ;;  %10909 = vxpose.xlu0.b32.cont [3/16] (narrow) %v16421_v34, 8 }
 0x55c   : > { %10942 = vxpose.xlu1.b32.cont [4/16] (narrow) %v16419_v30, 8  ;;  %10910 = vxpose.xlu0.b32.cont [4/16] (narrow) %v16417_v48, 8 }
 0x560   : > { %10943 = vxpose.xlu1.b32.cont [5/16] (narrow) %v10656_v60, 8  ;;  %10911 = vxpose.xlu0.b32.cont [5/16] (narrow) %v10479_v52, 8 }
 0x564   : > { %10944 = vxpose.xlu1.b32.cont [6/16] (narrow) %v16426_v28, 8  ;;  %10912 = vxpose.xlu0.b32.cont [6/16] (narrow) %v16424_v33, 8  ;;  %v11059_v33 = vrot.slane %v11051_v4, %v14220_v13  ;;  %v11066_v28 = vrot.slane %v11052_v3, %v14220_v13 }
 0x568   : > { %10945 = vxpose.xlu1.b32.cont [7/16] (narrow) %v10666_v27, 8  ;;  %10913 = vxpose.xlu0.b32.cont [7/16] (narrow) %v10489_v40, 8 }
 0x56c   : > { %10946 = vxpose.xlu1.b32.cont [8/16] (narrow) %v11934_v22, 8  ;;  %10914 = vxpose.xlu0.b32.cont [8/16] (narrow) %v16428_v17, 8 }
 0x570   : > { %10947 = vxpose.xlu1.b32.cont [9/16] (narrow) %v10676_v55, 8  ;;  %10915 = vxpose.xlu0.b32.cont [9/16] (narrow) %v10499_v24, 8 }
 0x574   : > { %10948 = vxpose.xlu1.b32.cont [10/16] (narrow) %v11937_v20, 8  ;;  %10916 = vxpose.xlu0.b32.cont [10/16] (narrow) %v11881_v56, 8 }
 0x578   : > { %10949 = vxpose.xlu1.b32.cont [11/16] (narrow) %v10686_v15, 8  ;;  %10917 = vxpose.xlu0.b32.cont [11/16] (narrow) %v10509_v1, 8 }
 0x57c   : > { %10950 = vxpose.xlu1.b32.cont [12/16] (narrow) %v11940_v16, 8  ;;  %10918 = vxpose.xlu0.b32.cont [12/16] (narrow) %v11884_v51, 8 }
 0x580   : > { %10951 = vxpose.xlu1.b32.cont [13/16] (narrow) %v10696_v37, 8  ;;  %10919 = vxpose.xlu0.b32.cont [13/16] (narrow) %v10519_v49, 8 }
 0x584   : > { %10952 = vxpose.xlu1.b32.cont [14/16] (narrow) %v11943_v46, 8  ;;  %10920 = vxpose.xlu0.b32.cont [14/16] (narrow) %v11887_v63, 8 }
 0x588   : > { %10953 = vxpose.xlu1.b32.cont [15/16] (narrow) %v10706_v57, 8  ;;  %10921 = vxpose.xlu0.b32.cont [15/16] (narrow) %v10529_v62, 8 }
 0x58c   : > { %10954 = vxpose.xlu1.b32.end [16/16] (narrow) %v11946_v43, 8  ;;  %10922 = vxpose.xlu0.b32.end [16/16] (narrow) %v11890_v45, 8 }
 0x590   : > { %v10891_v38 = vpop.trf.xlu1  ;;  %v10859_v6 = vpop.trf.xlu0 }
 0x5d0   : > { %v10955_v31 = vpop.trf.xlu1  ;;  %v10923_v47 = vpop.trf.xlu0 }
 0x5d1   : > { %v11019_v18 = vcombine.low %v10891_v38, %v10955_v31  ;;  %v11020_v39 = vcombine.high %v10891_v38, %v10955_v31  ;;  %v11003_v14 = vcombine.low %v10859_v6, %v10923_v47  ;;  %v11004_v35 = vcombine.high %v10859_v6, %v10923_v47 }
 0x5d3   : > { %v11027_v5 = vrot.slane %v11019_v18, %v17119_v54  ;;  %v11034_v12 = vrot.slane %v11020_v39, %v17119_v54  ;;  %v11011_v21 = vrot.slane %v11003_v14, %v17119_v54  ;;  %v11018_v50 = vrot.slane %v11004_v35, %v17119_v54 }
 0x5d5   : > { %v11067_v41 = vcombine.low %v11011_v21, %v11027_v5  ;;  %v11068_v26 = vcombine.high %v11011_v21, %v11027_v5  ;;  %v11083_v10 = vcombine.low %v11018_v50, %v11034_v12  ;;  %v11084_v42 = vcombine.high %v11018_v50, %v11034_v12 }
 0x5d7   : > { %v11075_v48 = vrot.slane %v11067_v41, %v14220_v13  ;;  %v11082_v30 = vrot.slane %v11068_v26, %v14220_v13  ;;  %v11091_v34 = vrot.slane %v11083_v10, %v14220_v13  ;;  %v11098_v23 = vrot.slane %v11084_v42, %v14220_v13 }
 0x5d9   : > { %v11099_v52 = vcombine.low %v11043_v44, %v11075_v48  ;;  %v11100_v60 = vcombine.high %v11043_v44, %v11075_v48  ;;  %v11101_v17 = vcombine.low %v11050_v53, %v11082_v30  ;;  %v11102_v22 = vcombine.high %v11050_v53, %v11082_v30 }
 0x5da   : > { %v11103_v40 = vcombine.low %v11059_v33, %v11091_v34  ;;  %v11104_v13 = vcombine.high %v11059_v33, %v11091_v34  ;;  %v11105_v27 = vcombine.low %v11066_v28, %v11098_v23  ;;  %v11106_v56 = vcombine.high %v11066_v28, %v11098_v23 }
 0x5db   : > { %11107 = vst [vmem:[%s16480_s20] sm:$0xff] %v11099_v52  ;;  %11108 = vst [vmem:[%s16480_s20 + $0x8] sm:$0xff] %v11100_v60 }
 0x5dc   : > { %11109 = vst [vmem:[%s16480_s20 + $0x10] sm:$0xff] %v11101_v17  ;;  %11110 = vst [vmem:[%s16480_s20 + $0x18] sm:$0xff] %v11102_v22 }
 0x5dd   : > { %11111 = vst [vmem:[%s16480_s20 + $0x20] sm:$0xff] %v11103_v40  ;;  %11112 = vst [vmem:[%s16480_s20 + $0x28] sm:$0xff] %v11104_v13 }
 0x5de   : > { %11113 = vst [vmem:[%s16480_s20 + $0x30] sm:$0xff] %v11105_v27  ;;  %11114 = vst [vmem:[%s16480_s20 + $0x38] sm:$0xff] %v11106_v56 }
 0x5df   : > { %13232 = shalt.err (!%p13229_p11)
}
 0x5e0   : > { %s13233_s14 = scalar_lea.hbm %s16497_s28, 1024  ;;  %s13237_s3 = scalar_lea.hbm %s16551_s2, 2048 }
 0x5e1   : > { %p13234_p0 = scmp.ne.s32.totalorder %s16497_s28, %s13233_s14  ;;  %p13238_p3 = scmp.lt.u32.totalorder %s16497_s28, %s16551_s2 }
 0x5e2   : > { %p13239_p5 = scmp.lt.u32.totalorder %s13237_s3, %s13233_s14  ;;  %p13241_p13 = scmp.lt.u32.totalorder %s13233_s14, %s16497_s28 }
 0x5e3   : > { %p13235_p4 = pnand %p13234_p0, %p17120_p2 }
 0x5e4   : > { %p13240_p6 = por %p13239_p5, %p13238_p3 }
 0x5e5   : > { %p13236_p1 = pneg %p13235_p4 }
 0x5e6   : > { %p13242_p12 = por %p13241_p13, %p13240_p6 }
 0x5e8   : > { %p13243_p10 = pnand %p13242_p12, %p13236_p1 }
 0x5ea   : > { %13246 = shalt.err (!%p13243_p10)
}
 0x5eb   : > { %s13299_s27 = smov 128   ;;  %s13300_s29 = smov 256  }
 0x5ec   : > { %s13301_s20 = smov 8  }
 0x5ed   : > { %12207 = dma.vmem_to_hbm [thread:$0]  (%p17120_p2), %s16492_s7, 1024, %s16497_s28, %s11116_s25, %s13299_s27, %s13300_s29, %s13301_s20  }
 0x5ee PF: > { %s11143_s16 = sand.u32 1, %s13277_s9   ;;  %p17121_p7 = scmp.ne.s32.totalorder %s16687_s22, 0 }
 0x5ef   : > { %p17122_p8 = scmp.ge.s32.totalorder %s13289_s12, 2  ;;  %s11144_s13 = scalar_lea.sflag [#allocation4], %s11143_s16 }
 0x5f1   : > { %p12217_p9 = pnand %p17122_p8, %p17121_p7 }
 0x5f3   : > { %13272 = dma.done.wait (!%p12217_p9), %s11144_s13, 1024  }
 0x5f4   : > { %13274 = vsyncadd (!%p12217_p9), %s11144_s13, 4294966272  ;;  %p18_p11 = scmp.ge.s32.totalorder %s13342_s15, 4   ;;  %s17123_s9 = smov %s13281_s10 }
 0x5f5   : > { %s17124_s10 = smov %s13285_s11  ;;  %s17125_s11 = smov %s13354_s18 }
 0x5f6   : > { %s17126_s12 = smov %s13342_s15  ;;  %20 = sbr.rel (!%p18_p11) target bundleno = 7 (0x7), region = 86 }
 0x5fd   :  { %11149 = vsyncpa [#allocation3], 1 }
 0x5fe   :  { %11151 = vsyncpa [#allocation3 + $0x1], 1 }
 0x5ff   :  { %11152 = vsyncpa [#allocation6], 1 }
 0x600   :  { %11154 = vsyncpa [#allocation6 + $0x1], 1 }
 0x601   :  { %11155 = vsyncpa [#allocation4], 1 }
 0x602   :  { %11157 = vsyncpa [#allocation4 + $0x1], 1 }

</bundles_post_ra>
